<compile_context>
chip_gen: v7x
topology: tpu7x:2x2x1
jax: 0.10.0
libtpu: 0.0.40
codegen_flags: <defaults>
</compile_context>

<pallas_src>
import functools

import jax
import jax.numpy as jnp
from jax.experimental import pallas as pl
from jax.experimental.pallas import tpu as pltpu

EPS_BN = 1e-5
_PAD = -1e30                     # sentinel: conv zero-padding must be exactly 0 after BN+ReLU
_VMEM_LIMIT = 48 * 1024 * 1024   # stays under v7x's 64 MiB physical VMEM; ample on v5e/v6e


def _pick_row_tile(ho, wo, target_rows=1024):
    """Largest divisor of `ho` whose row tile keeps matmul rows (tile*wo) <= ~1024."""
    best = 1
    limit = max(target_rows, wo)
    for d in range(1, ho + 1):
        if ho % d == 0 and d * wo <= limit:
            best = d
    return best


# ----------------------------- Pallas kernels ------------------------------ #

def _moments_kernel(x_ref, o_ref, *, m_total):
    """Per-lane partial [sum; sum-of-squares] for one row tile."""
    tm = x_ref.shape[0]
    x = x_ref[...]
    if m_total % tm != 0:                                 # static: mask OOB tail rows
        rows = jax.lax.broadcasted_iota(jnp.int32, x.shape, 0) + pl.program_id(0) * tm
        x = jnp.where(rows < m_total, x, 0.0)
    o_ref[0, 0:1, :] = jnp.sum(x, axis=0, keepdims=True)
    o_ref[0, 1:2, :] = jnp.sum(x * x, axis=0, keepdims=True)


def channel_moments(x2d, tm=512):
    """Per-channel mean / biased variance (PyTorch training-mode BN statistics)."""
    m, c = x2d.shape
    # Lane-densify: with c << 128 only c of 128 lanes carry data, so fold row groups
    # into the lane dim and un-fold the partial sums on the JAX side.
    fold = 1
    if c < 128:
        target = max(1, 128 // c)
        while fold * 2 <= target and m % (fold * 2) == 0:
            fold *= 2
    xf = x2d.reshape(m // fold, fold * c)
    mf, cf = xf.shape
    tm = min(tm, mf)
    grid = pl.cdiv(mf, tm)
    partial = pl.pallas_call(
        functools.partial(_moments_kernel, m_total=mf),
        out_shape=jax.ShapeDtypeStruct((grid, 2, cf), jnp.float32),
        grid=(grid,),
        in_specs=[pl.BlockSpec((tm, cf), lambda i: (i, 0))],
        out_specs=pl.BlockSpec((1, 2, cf), lambda i: (i, 0, 0)),
        compiler_params=pltpu.CompilerParams(dimension_semantics=("parallel",)),
    )(xf)
    sums = jnp.sum(partial, axis=0).reshape(2, fold, c).sum(axis=1)
    mean = sums[0] / m
    var = sums[1] / m - mean * mean                      # biased var, like torch BN fwd
    return mean, var


def _down_kernel(pee_ref, peo_ref, poe_ref, poo_ref, s_ref, b_ref,
                 w1_ref, wr_ref, h_ref, r_ref, mom_ref, act_col, raw_col):
    """Row tile of BN1-affine + ReLU + conv1 (3x3/s2) and residual conv (3x3/s2),
    plus BN2 partial moments of the conv1 output (from the f32 accumulator)."""
    _, th, wo, cp = h_ref.shape
    cin = pee_ref.shape[3]
    scale = s_ref[...].reshape(1, 1, 1, cin)
    shift = b_ref[...].reshape(1, 1, 1, cin)

    def split(ref):                                      # elementwise kept in f32 (v5e VPU)
        p = ref[...].astype(jnp.float32)
        is_pad = p <= _PAD * 0.5
        raw = jnp.where(is_pad, 0.0, p)                                       # residual path
        act = jnp.where(is_pad, 0.0, jnp.maximum(p * scale + shift, 0.0))     # relu(bn1(x))
        return raw, act

    phases = {(0, 0): split(pee_ref), (0, 1): split(peo_ref),
              (1, 0): split(poe_ref), (1, 1): split(poo_ref)}

    def src(k):      # 3x3 kernel offset -> (row/col parity, slice offset inside phase)
        return (0, 0) if k == 0 else ((1, 0) if k == 1 else (0, 1))

    # im2col into VMEM: taps are folded into the contraction dim -> one matmul per conv.
    for kh in range(3):
        rp, oh = src(kh)
        for kw in range(3):
            cpar, ow = src(kw)
            t = kh * 3 + kw
            raw, act = phases[(rp, cpar)]
            raw_col[:, t * cin:(t + 1) * cin] = (
                raw[0, oh:oh + th, ow:ow + wo, :].reshape(th * wo, cin).astype(jnp.bfloat16))
            act_col[:, t * cin:(t + 1) * cin] = (
                act[0, oh:oh + th, ow:ow + wo, :].reshape(th * wo, cin).astype(jnp.bfloat16))

    acc_h = jnp.dot(act_col[...], w1_ref[...], preferred_element_type=jnp.float32)
    acc_r = jnp.dot(raw_col[...], wr_ref[...], preferred_element_type=jnp.float32)

    # BN2 per-tile partial moments from the f32 accumulator (no HBM re-read of h1).
    mom_ref[0, 0:1, :] = jnp.sum(acc_h, axis=0, keepdims=True)
    mom_ref[0, 1:2, :] = jnp.sum(acc_h * acc_h, axis=0, keepdims=True)

    h_ref[...] = acc_h.reshape(1, th, wo, cp).astype(h_ref.dtype)
    r_ref[...] = acc_r.reshape(1, th, wo, cp).astype(r_ref.dtype)


def _conv2_res_kernel(hp_ref, s_ref, b_ref, w2_ref, res_ref, o_ref, col):
    """Row tile of BN2-affine + ReLU + conv2 (3x3/s1) + residual add."""
    _, th, wo, cp = o_ref.shape
    x = hp_ref[...].astype(jnp.float32)                  # (1, th+2, wo+2, cp)
    scale = s_ref[...].reshape(1, 1, 1, cp)
    shift = b_ref[...].reshape(1, 1, 1, cp)
    act = jnp.where(x <= _PAD * 0.5, 0.0, jnp.maximum(x * scale + shift, 0.0))
    for kh in range(3):
        for kw in range(3):
            t = kh * 3 + kw
            col[:, t * cp:(t + 1) * cp] = (
                act[0, kh:kh + th, kw:kw + wo, :].reshape(th * wo, cp).astype(jnp.bfloat16))
    acc = jnp.dot(col[...], w2_ref[...], preferred_element_type=jnp.float32)
    o_ref[...] = acc.reshape(1, th, wo, cp) + res_ref[...].astype(jnp.float32)


# ---------------------------- kernel wrappers ------------------------------- #

def conv_down_fused(pee, peo, poe, poo, scale, shift, w1, wr, th, wo, cin, cp):
    nt = pee.shape[0]
    halo_spec = pl.BlockSpec((1, th + 1, wo + 1, cin), lambda i: (i, 0, 0, 0))
    plain_spec = pl.BlockSpec((1, th, wo + 1, cin), lambda i: (i, 0, 0, 0))
    vec_spec = pl.BlockSpec((1, cin), lambda i: (0, 0))
    w_spec = pl.BlockSpec((9 * cin, cp), lambda i: (0, 0))
    hr_spec = pl.BlockSpec((1, th, wo, cp), lambda i: (i, 0, 0, 0))
    hr_sds = jax.ShapeDtypeStruct((nt, th, wo, cp), jnp.bfloat16)
    mom_sds = jax.ShapeDtypeStruct((nt, 2, cp), jnp.float32)
    flops = 2 * nt * (th * wo) * (9 * cin) * cp * 2      # conv1 + residual conv
    bytes_acc = 2 * (pee.size + peo.size + poe.size + poo.size + w1.size + wr.size
                     + 2 * nt * th * wo * cp) + 4 * nt * 2 * cp
    return pl.pallas_call(
        _down_kernel,
        out_shape=(hr_sds, hr_sds, mom_sds),
        grid=(nt,),
        in_specs=[halo_spec, halo_spec, plain_spec, plain_spec,
                  vec_spec, vec_spec, w_spec, w_spec],
        out_specs=(hr_spec, hr_spec, pl.BlockSpec((1, 2, cp), lambda i: (i, 0, 0))),
        scratch_shapes=[pltpu.VMEM((th * wo, 9 * cin), jnp.bfloat16),
                        pltpu.VMEM((th * wo, 9 * cin), jnp.bfloat16)],
        compiler_params=pltpu.CompilerParams(
            dimension_semantics=("parallel",), vmem_limit_bytes=_VMEM_LIMIT),
        cost_estimate=pl.CostEstimate(flops=int(flops), transcendentals=0,
                                      bytes_accessed=int(bytes_acc)),
    )(pee, peo, poe, poo,
      scale.reshape(1, cin).astype(jnp.float32),
      shift.reshape(1, cin).astype(jnp.float32),
      w1, wr)


def conv2_res_fused(h1p_t, scale2, shift2, w2, res, th, wo, cp):
    nt = h1p_t.shape[0]
    flops = 2 * nt * (th * wo) * (9 * cp) * cp
    bytes_acc = 2 * (h1p_t.size + res.size + w2.size) + 4 * nt * th * wo * cp
    return pl.pallas_call(
        _conv2_res_kernel,
        out_shape=jax.ShapeDtypeStruct((nt, th, wo, cp), jnp.float32),
        grid=(nt,),
        in_specs=[pl.BlockSpec((1, th + 2, wo + 2, cp), lambda i: (i, 0, 0, 0)),
                  pl.BlockSpec((1, cp), lambda i: (0, 0)),
                  pl.BlockSpec((1, cp), lambda i: (0, 0)),
                  pl.BlockSpec((9 * cp, cp), lambda i: (0, 0)),
                  pl.BlockSpec((1, th, wo, cp), lambda i: (i, 0, 0, 0))],
        out_specs=pl.BlockSpec((1, th, wo, cp), lambda i: (i, 0, 0, 0)),
        scratch_shapes=[pltpu.VMEM((th * wo, 9 * cp), jnp.bfloat16)],
        compiler_params=pltpu.CompilerParams(
            dimension_semantics=("parallel",), vmem_limit_bytes=_VMEM_LIMIT),
        cost_estimate=pl.CostEstimate(flops=int(flops), transcendentals=0,
                                      bytes_accessed=int(bytes_acc)),
    )(h1p_t, scale2.reshape(1, cp).astype(jnp.float32),
      shift2.reshape(1, cp).astype(jnp.float32), w2, res)


# ------------------------------- JAX glue ---------------------------------- #

def spectral_normalize(w, u):
    """One power-iteration spectral norm (PyTorch sn default: n_power_iterations=1)."""
    cout = w.shape[0]
    w_mat = w.reshape(cout, -1)
    v = w_mat.T @ u
    v = v / (jnp.linalg.norm(v) + 1e-12)
    u_new = w_mat @ v
    u_new = u_new / (jnp.linalg.norm(u_new) + 1e-12)
    sigma = u_new @ w_mat @ v
    return w / sigma


def pack_taps_folded(w_oihw, cp):
    """(Cout, Cin, 3, 3) -> (9*Cin, Cp) bf16; row = (kh*3+kw)*Cin + ci, Cout 0-padded."""
    cout, cin = w_oihw.shape[0], w_oihw.shape[1]
    wt = jnp.transpose(w_oihw, (2, 3, 1, 0)).reshape(9 * cin, cout)
    if cp > cout:
        wt = jnp.pad(wt, ((0, 0), (0, cp - cout)))
    return wt.astype(jnp.bfloat16)


def block_down(x_nchw, params):
    x = jnp.transpose(x_nchw, (0, 2, 3, 1)).astype(jnp.float32)     # NCHW -> NHWC
    n, h, w, cin = x.shape
    assert h % 2 == 0 and w % 2 == 0, "stride-2 phase split assumes even H, W"
    cout = params["w1"].shape[0]
    cp = ((cout + 127) // 128) * 128          # lane-dense channel count for intermediates
    ho, wo = h // 2, w // 2
    th = _pick_row_tile(ho, wo)               # row tile -> bounded VMEM, pipelined grid
    n_tiles = ho // th
    nt = n * n_tiles

    # BN1 batch statistics (training-mode biased variance), computed on f32 x.
    mean1, var1 = channel_moments(x.reshape(-1, cin))
    scale1 = params["gamma1"] / jnp.sqrt(var1 + EPS_BN)
    shift1 = params["beta1"] - mean1 * scale1

    # spectral-normalized, tap-folded (K = 9*C), lane-padded, bf16 weights
    w1 = pack_taps_folded(spectral_normalize(params["w1"], params["u1"]), cp)
    wr = pack_taps_folded(spectral_normalize(params["wr"], params["ur"]), cp)
    w2sn = spectral_normalize(params["w2"], params["u2"])
    w2sn = jnp.pad(w2sn, ((0, 0), (0, cp - cout), (0, 0), (0, 0)))   # pad conv2 in-channels
    w2 = pack_taps_folded(w2sn, cp)                                  # (9*cp, cp)

    # one-time pad + even/odd phase split (stride-2 taps become contiguous slices),
    # stored bf16 (matmul-only data).
    # TODO(synk): for large Cin, pull phases straight from padded x via manual strided DMA
    # (memory_space=pl.ANY) to skip this wrapper-side HBM round trip.
    xp = jnp.pad(x, ((0, 0), (1, 1), (1, 1), (0, 0)),
                 constant_values=_PAD).astype(jnp.bfloat16)
    p_ee = xp[:, 0::2, 0::2, :]
    p_eo = xp[:, 0::2, 1::2, :]
    p_oe = xp[:, 1::2, 0::2, :]
    p_oo = xp[:, 1::2, 1::2, :]

    def tile_halo(p):      # even-row phases: overlapping (th+1)-row tiles (1-row halo)
        tiles = [p[:, t * th:t * th + th + 1] for t in range(n_tiles)]
        return jnp.stack(tiles, axis=1).reshape(nt, th + 1, wo + 1, cin)

    def tile_plain(p):     # odd-row phases: exact th-row tiles
        return p[:, :ho].reshape(nt, th, wo + 1, cin)

    h1, res, mom2 = conv_down_fused(
        tile_halo(p_ee), tile_halo(p_eo), tile_plain(p_oe), tile_plain(p_oo),
        scale1, shift1, w1, wr, th, wo, cin, cp)

    # BN2 statistics from the kernel-emitted partial moments (h1 is not re-read).
    m2 = n * ho * wo
    sums2 = jnp.sum(mom2, axis=0)
    mean2 = sums2[0] / m2
    var2 = sums2[1] / m2 - mean2 * mean2
    gamma2 = jnp.pad(params["gamma2"], (0, cp - cout))
    beta2 = jnp.pad(params["beta2"], (0, cp - cout))
    scale2 = gamma2 / jnp.sqrt(var2 + EPS_BN)
    shift2 = beta2 - mean2 * scale2

    # haloed, sentinel-padded row-tile layout of h1 for the stride-1 conv2.
    h1_full = h1.reshape(n, ho, wo, cp)
    h1p = jnp.pad(h1_full, ((0, 0), (1, 1), (1, 1), (0, 0)), constant_values=_PAD)
    h1p_t = jnp.stack([h1p[:, t * th:t * th + th + 2] for t in range(n_tiles)],
                      axis=1).reshape(nt, th + 2, wo + 2, cp)

    out_t = conv2_res_fused(h1p_t, scale2, shift2, w2, res, th, wo, cp)
    out = out_t.reshape(n, ho, wo, cp)[..., :cout]       # drop lane padding
    return jnp.transpose(out, (0, 3, 1, 2))              # NHWC -> NCHW


# --------------------------- pure-JAX reference ----------------------------- #

def ref_block_down(x_nchw, params):
    def bn(x, gamma, beta):
        mean = jnp.mean(x, axis=(0, 2, 3), keepdims=True)
        var = jnp.var(x, axis=(0, 2, 3), keepdims=True)
        return ((x - mean) / jnp.sqrt(var + EPS_BN)
                * gamma.reshape(1, -1, 1, 1) + beta.reshape(1, -1, 1, 1))

    def conv(x, w, stride):
        return jax.lax.conv_general_dilated(
            x, w, window_strides=(stride, stride), padding=((1, 1), (1, 1)),
            dimension_numbers=("NCHW", "OIHW", "NCHW"),
            precision=jax.lax.Precision.HIGHEST)

    w1 = spectral_normalize(params["w1"], params["u1"])
    w2 = spectral_normalize(params["w2"], params["u2"])
    wr = spectral_normalize(params["wr"], params["ur"])
    h = conv(jax.nn.relu(bn(x_nchw, params["gamma1"], params["beta1"])), w1, 2)
    h = conv(jax.nn.relu(bn(h, params["gamma2"], params["beta2"])), w2, 1)
    return h + conv(x_nchw, wr, 2)


# ---------------------------------- main ------------------------------------ #

if __name__ == "__main__":
    key = jax.random.PRNGKey(0)
    kx, *kp = jax.random.split(key, 11)
    Cin, Cout = 4, 8
    N, H, W = 2, 16, 16

    params = dict(
        gamma1=jax.random.uniform(kp[0], (Cin,), minval=0.5, maxval=1.5, dtype=jnp.float32),
        beta1=jax.random.normal(kp[1], (Cin,), dtype=jnp.float32) * 0.1,
        gamma2=jax.random.uniform(kp[2], (Cout,), minval=0.5, maxval=1.5, dtype=jnp.float32),
        beta2=jax.random.normal(kp[3], (Cout,), dtype=jnp.float32) * 0.1,
        w1=jax.random.normal(kp[4], (Cout, Cin, 3, 3), dtype=jnp.float32) * 0.1,
        u1=jax.random.normal(kp[5], (Cout,), dtype=jnp.float32),
        w2=jax.random.normal(kp[6], (Cout, Cout, 3, 3), dtype=jnp.float32) * 0.1,
        u2=jax.random.normal(kp[7], (Cout,), dtype=jnp.float32),
        wr=jax.random.normal(kp[8], (Cout, Cin, 3, 3), dtype=jnp.float32) * 0.1,
        ur=jax.random.normal(kp[9], (Cout,), dtype=jnp.float32),
    )

    x = jax.random.normal(kx, (N, Cin, H, W), dtype=jnp.float32)   # NCHW like PyTorch

    out = jax.block_until_ready(jax.jit(block_down)(x, params))
    ref = ref_block_down(x, params)

    assert out.shape == (N, Cout, H // 2, W // 2), out.shape
    # kernel path: bf16 intermediates + default-precision MXU vs an f32 HIGHEST-precision
    # reference -> compare at a correspondingly loose tolerance.
    err = float(jnp.max(jnp.abs(out - ref)))
    assert jnp.allclose(out, ref, rtol=2e-2, atol=2e-2), err
    print("KERNEL_OK")
</pallas_src>

<mosaic_0001>
module attributes {stable_mosaic.version = 11 : i64} {
  func.func @_moments_kernel(%arg0: i32, %arg1: memref<16x128xf32, #tpu.memory_space<vmem>>, %arg2: memref<1x2x128xf32, #tpu.memory_space<vmem>>) attributes {dimension_semantics = [#tpu.dimension_semantics<parallel>], iteration_bounds = array<i64: 1>, scalar_prefetch = 0 : i64, scratch_operands = 0 : i64, tpu.core_type = #tpu.core_type<tc>, window_params = [{transform_indices = @transform_0, window_bounds = array<i64: 16, 128>}, {transform_indices = @transform_1, window_bounds = array<i64: 1, 2, 128>}]} {
    %c0 = arith.constant 0 : index
    %c0_0 = arith.constant 0 : index
    %0 = vector.load %arg1[%c0, %c0_0] : memref<16x128xf32, #tpu.memory_space<vmem>>, vector<16x128xf32>
    %cst = arith.constant dense<0.000000e+00> : vector<128xf32>
    %1 = vector.multi_reduction <add>, %0, %cst [0] : vector<16x128xf32> to vector<128xf32>
    %2 = vector.shape_cast %1 : vector<128xf32> to vector<1x128xf32>
    %c0_1 = arith.constant 0 : index
    %c0_2 = arith.constant 0 : index
    %c0_3 = arith.constant 0 : index
    %3 = vector.load %arg2[%c0_1, %c0_2, %c0_3] : memref<1x2x128xf32, #tpu.memory_space<vmem>>, vector<1x1x128xf32>
    %4 = vector.shape_cast %3 : vector<1x1x128xf32> to vector<1x128xf32>
    %5 = vector.shape_cast %2 : vector<1x128xf32> to vector<1x1x128xf32>
    tpu.vector_store %arg2[%c0_1, %c0_2, %c0_3], %5 {strides = array<i32>} : memref<1x2x128xf32, #tpu.memory_space<vmem>>, vector<1x1x128xf32>,
    %6 = arith.mulf %0, %0 : vector<16x128xf32>
    %cst_4 = arith.constant dense<0.000000e+00> : vector<128xf32>
    %7 = vector.multi_reduction <add>, %6, %cst_4 [0] : vector<16x128xf32> to vector<128xf32>
    %8 = vector.shape_cast %7 : vector<128xf32> to vector<1x128xf32>
    %c0_5 = arith.constant 0 : index
    %c1 = arith.constant 1 : index
    %c0_6 = arith.constant 0 : index
    %9 = vector.load %arg2[%c0_5, %c1, %c0_6] : memref<1x2x128xf32, #tpu.memory_space<vmem>>, vector<1x1x128xf32>
    %10 = vector.shape_cast %9 : vector<1x1x128xf32> to vector<1x128xf32>
    %11 = vector.shape_cast %8 : vector<1x128xf32> to vector<1x1x128xf32>
    tpu.vector_store %arg2[%c0_5, %c1, %c0_6], %11 {strides = array<i32>} : memref<1x2x128xf32, #tpu.memory_space<vmem>>, vector<1x1x128xf32>,
    return
  }
  func.func @transform_0(%arg0: i32) -> (i32, i32) {
    %c0_i32 = arith.constant 0 : i32
    %c0_i32_0 = arith.constant 0 : i32
    return %arg0, %c0_i32 : i32, i32
  }
  func.func @transform_1(%arg0: i32) -> (i32, i32, i32) {
    %c0_i32 = arith.constant 0 : i32
    %c0_i32_0 = arith.constant 0 : i32
    %c0_i32_1 = arith.constant 0 : i32
    return %arg0, %c0_i32, %c0_i32_0 : i32, i32, i32
  }
}

module attributes {stable_mosaic.version = 11 : i64} {
  func.func @_down_kernel(%arg0: i32, %arg1: memref<1x9x9x4xbf16, #tpu.memory_space<vmem>>, %arg2: memref<1x9x9x4xbf16, #tpu.memory_space<vmem>>, %arg3: memref<1x8x9x4xbf16, #tpu.memory_space<vmem>>, %arg4: memref<1x8x9x4xbf16, #tpu.memory_space<vmem>>, %arg5: memref<1x4xf32, #tpu.memory_space<vmem>>, %arg6: memref<1x4xf32, #tpu.memory_space<vmem>>, %arg7: memref<36x128xbf16, #tpu.memory_space<vmem>>, %arg8: memref<36x128xbf16, #tpu.memory_space<vmem>>, %arg9: memref<1x8x8x128xbf16, #tpu.memory_space<vmem>>, %arg10: memref<1x8x8x128xbf16, #tpu.memory_space<vmem>>, %arg11: memref<1x2x128xf32, #tpu.memory_space<vmem>>, %arg12: memref<64x36xbf16, #tpu.memory_space<vmem>>, %arg13: memref<64x36xbf16, #tpu.memory_space<vmem>>) attributes {dimension_semantics = [#tpu.dimension_semantics<parallel>], iteration_bounds = array<i64: 2>, scalar_prefetch = 0 : i64, scratch_operands = 2 : i64, tpu.core_type = #tpu.core_type<tc>, window_params = [{transform_indices = @transform_0, window_bounds = array<i64: 1, 9, 9, 4>}, {transform_indices = @transform_1, window_bounds = array<i64: 1, 9, 9, 4>}, {transform_indices = @transform_2, window_bounds = array<i64: 1, 8, 9, 4>}, {transform_indices = @transform_3, window_bounds = array<i64: 1, 8, 9, 4>}, {pipeline_mode = #tpu.pipeline_mode<synchronous>, transform_indices = @transform_4, window_bounds = array<i64: 1, 4>}, {pipeline_mode = #tpu.pipeline_mode<synchronous>, transform_indices = @transform_5, window_bounds = array<i64: 1, 4>}, {pipeline_mode = #tpu.pipeline_mode<synchronous>, transform_indices = @transform_6, window_bounds = array<i64: 36, 128>}, {pipeline_mode = #tpu.pipeline_mode<synchronous>, transform_indices = @transform_7, window_bounds = array<i64: 36, 128>}, {transform_indices = @transform_8, window_bounds = array<i64: 1, 8, 8, 128>}, {transform_indices = @transform_9, window_bounds = array<i64: 1, 8, 8, 128>}, {transform_indices = @transform_10, window_bounds = array<i64: 1, 2, 128>}]} {
    %c0 = arith.constant 0 : index
    %c0_0 = arith.constant 0 : index
    %0 = vector.load %arg5[%c0, %c0_0] : memref<1x4xf32, #tpu.memory_space<vmem>>, vector<1x4xf32>
    %1 = vector.shape_cast %0 : vector<1x4xf32> to vector<1x1x1x4xf32>
    %c0_1 = arith.constant 0 : index
    %c0_2 = arith.constant 0 : index
    %2 = vector.load %arg6[%c0_1, %c0_2] : memref<1x4xf32, #tpu.memory_space<vmem>>, vector<1x4xf32>
    %3 = vector.shape_cast %2 : vector<1x4xf32> to vector<1x1x1x4xf32>
    %c0_3 = arith.constant 0 : index
    %c0_4 = arith.constant 0 : index
    %c0_5 = arith.constant 0 : index
    %c0_6 = arith.constant 0 : index
    %4 = vector.load %arg1[%c0_3, %c0_4, %c0_5, %c0_6] : memref<1x9x9x4xbf16, #tpu.memory_space<vmem>>, vector<1x9x9x4xbf16>
    %5 = arith.extf %4 : vector<1x9x9x4xbf16> to vector<1x9x9x4xf32>
    %cst = arith.constant -5.000000e+29 : f32
    %6 = vector.broadcast %cst : f32 to vector<1x9x9x4xf32>
    %7 = arith.cmpf ole, %5, %6 : vector<1x9x9x4xf32>
    %cst_7 = arith.constant 0.000000e+00 : f32
    %8 = vector.broadcast %cst_7 : f32 to vector<1x9x9x4xf32>
    %9 = arith.select %7, %8, %5 : vector<1x9x9x4xi1>, vector<1x9x9x4xf32>
    %10 = vector.broadcast %1 : vector<1x1x1x4xf32> to vector<1x9x9x4xf32>
    %11 = arith.mulf %5, %10 : vector<1x9x9x4xf32>
    %12 = vector.broadcast %3 : vector<1x1x1x4xf32> to vector<1x9x9x4xf32>
    %13 = arith.addf %11, %12 : vector<1x9x9x4xf32>
    %cst_8 = arith.constant 0.000000e+00 : f32
    %14 = vector.broadcast %cst_8 : f32 to vector<1x9x9x4xf32>
    %15 = arith.maximumf %13, %14 : vector<1x9x9x4xf32>
    %cst_9 = arith.constant 0.000000e+00 : f32
    %16 = vector.broadcast %cst_9 : f32 to vector<1x9x9x4xf32>
    %17 = arith.select %7, %16, %15 : vector<1x9x9x4xi1>, vector<1x9x9x4xf32>
    %c0_10 = arith.constant 0 : index
    %c0_11 = arith.constant 0 : index
    %c0_12 = arith.constant 0 : index
    %c0_13 = arith.constant 0 : index
    %18 = vector.load %arg2[%c0_10, %c0_11, %c0_12, %c0_13] : memref<1x9x9x4xbf16, #tpu.memory_space<vmem>>, vector<1x9x9x4xbf16>
    %19 = arith.extf %18 : vector<1x9x9x4xbf16> to vector<1x9x9x4xf32>
    %cst_14 = arith.constant -5.000000e+29 : f32
    %20 = vector.broadcast %cst_14 : f32 to vector<1x9x9x4xf32>
    %21 = arith.cmpf ole, %19, %20 : vector<1x9x9x4xf32>
    %cst_15 = arith.constant 0.000000e+00 : f32
    %22 = vector.broadcast %cst_15 : f32 to vector<1x9x9x4xf32>
    %23 = arith.select %21, %22, %19 : vector<1x9x9x4xi1>, vector<1x9x9x4xf32>
    %24 = vector.broadcast %1 : vector<1x1x1x4xf32> to vector<1x9x9x4xf32>
    %25 = arith.mulf %19, %24 : vector<1x9x9x4xf32>
    %26 = vector.broadcast %3 : vector<1x1x1x4xf32> to vector<1x9x9x4xf32>
    %27 = arith.addf %25, %26 : vector<1x9x9x4xf32>
    %cst_16 = arith.constant 0.000000e+00 : f32
    %28 = vector.broadcast %cst_16 : f32 to vector<1x9x9x4xf32>
    %29 = arith.maximumf %27, %28 : vector<1x9x9x4xf32>
    %cst_17 = arith.constant 0.000000e+00 : f32
    %30 = vector.broadcast %cst_17 : f32 to vector<1x9x9x4xf32>
    %31 = arith.select %21, %30, %29 : vector<1x9x9x4xi1>, vector<1x9x9x4xf32>
    %c0_18 = arith.constant 0 : index
    %c0_19 = arith.constant 0 : index
    %c0_20 = arith.constant 0 : index
    %c0_21 = arith.constant 0 : index
    %32 = vector.load %arg3[%c0_18, %c0_19, %c0_20, %c0_21] : memref<1x8x9x4xbf16, #tpu.memory_space<vmem>>, vector<1x8x9x4xbf16>
    %33 = arith.extf %32 : vector<1x8x9x4xbf16> to vector<1x8x9x4xf32>
    %cst_22 = arith.constant -5.000000e+29 : f32
    %34 = vector.broadcast %cst_22 : f32 to vector<1x8x9x4xf32>
    %35 = arith.cmpf ole, %33, %34 : vector<1x8x9x4xf32>
    %cst_23 = arith.constant 0.000000e+00 : f32
    %36 = vector.broadcast %cst_23 : f32 to vector<1x8x9x4xf32>
    %37 = arith.select %35, %36, %33 : vector<1x8x9x4xi1>, vector<1x8x9x4xf32>
    %38 = vector.broadcast %1 : vector<1x1x1x4xf32> to vector<1x8x9x4xf32>
    %39 = arith.mulf %33, %38 : vector<1x8x9x4xf32>
    %40 = vector.broadcast %3 : vector<1x1x1x4xf32> to vector<1x8x9x4xf32>
    %41 = arith.addf %39, %40 : vector<1x8x9x4xf32>
    %cst_24 = arith.constant 0.000000e+00 : f32
    %42 = vector.broadcast %cst_24 : f32 to vector<1x8x9x4xf32>
    %43 = arith.maximumf %41, %42 : vector<1x8x9x4xf32>
    %cst_25 = arith.constant 0.000000e+00 : f32
    %44 = vector.broadcast %cst_25 : f32 to vector<1x8x9x4xf32>
    %45 = arith.select %35, %44, %43 : vector<1x8x9x4xi1>, vector<1x8x9x4xf32>
    %c0_26 = arith.constant 0 : index
    %c0_27 = arith.constant 0 : index
    %c0_28 = arith.constant 0 : index
    %c0_29 = arith.constant 0 : index
    %46 = vector.load %arg4[%c0_26, %c0_27, %c0_28, %c0_29] : memref<1x8x9x4xbf16, #tpu.memory_space<vmem>>, vector<1x8x9x4xbf16>
    %47 = arith.extf %46 : vector<1x8x9x4xbf16> to vector<1x8x9x4xf32>
    %cst_30 = arith.constant -5.000000e+29 : f32
    %48 = vector.broadcast %cst_30 : f32 to vector<1x8x9x4xf32>
    %49 = arith.cmpf ole, %47, %48 : vector<1x8x9x4xf32>
    %cst_31 = arith.constant 0.000000e+00 : f32
    %50 = vector.broadcast %cst_31 : f32 to vector<1x8x9x4xf32>
    %51 = arith.select %49, %50, %47 : vector<1x8x9x4xi1>, vector<1x8x9x4xf32>
    %52 = vector.broadcast %1 : vector<1x1x1x4xf32> to vector<1x8x9x4xf32>
    %53 = arith.mulf %47, %52 : vector<1x8x9x4xf32>
    %54 = vector.broadcast %3 : vector<1x1x1x4xf32> to vector<1x8x9x4xf32>
    %55 = arith.addf %53, %54 : vector<1x8x9x4xf32>
    %cst_32 = arith.constant 0.000000e+00 : f32
    %56 = vector.broadcast %cst_32 : f32 to vector<1x8x9x4xf32>
    %57 = arith.maximumf %55, %56 : vector<1x8x9x4xf32>
    %cst_33 = arith.constant 0.000000e+00 : f32
    %58 = vector.broadcast %cst_33 : f32 to vector<1x8x9x4xf32>
    %59 = arith.select %49, %58, %57 : vector<1x8x9x4xi1>, vector<1x8x9x4xf32>
    %60 = vector.extract_strided_slice %9 {offsets = [0, 0, 0, 0], sizes = [1, 8, 8, 4], strides = [1, 1, 1, 1]} : vector<1x9x9x4xf32> to vector<1x8x8x4xf32>
    %61 = vector.shape_cast %60 : vector<1x8x8x4xf32> to vector<8x8x4xf32>
    %62 = vector.shape_cast %61 : vector<8x8x4xf32> to vector<64x4xf32>
    %63 = arith.truncf %62 : vector<64x4xf32> to vector<64x4xbf16>
    %c0_34 = arith.constant 0 : index
    %c0_35 = arith.constant 0 : index
    %64 = vector.load %arg13[%c0_34, %c0_35] : memref<64x36xbf16, #tpu.memory_space<vmem>>, vector<64x4xbf16>
    tpu.vector_store %arg13[%c0_34, %c0_35], %63 {strides = array<i32>} : memref<64x36xbf16, #tpu.memory_space<vmem>>, vector<64x4xbf16>,
    %65 = vector.extract_strided_slice %17 {offsets = [0, 0, 0, 0], sizes = [1, 8, 8, 4], strides = [1, 1, 1, 1]} : vector<1x9x9x4xf32> to vector<1x8x8x4xf32>
    %66 = vector.shape_cast %65 : vector<1x8x8x4xf32> to vector<8x8x4xf32>
    %67 = vector.shape_cast %66 : vector<8x8x4xf32> to vector<64x4xf32>
    %68 = arith.truncf %67 : vector<64x4xf32> to vector<64x4xbf16>
    %c0_36 = arith.constant 0 : index
    %c0_37 = arith.constant 0 : index
    %69 = vector.load %arg12[%c0_36, %c0_37] : memref<64x36xbf16, #tpu.memory_space<vmem>>, vector<64x4xbf16>
    tpu.vector_store %arg12[%c0_36, %c0_37], %68 {strides = array<i32>} : memref<64x36xbf16, #tpu.memory_space<vmem>>, vector<64x4xbf16>,
    %70 = vector.extract_strided_slice %23 {offsets = [0, 0, 0, 0], sizes = [1, 8, 8, 4], strides = [1, 1, 1, 1]} : vector<1x9x9x4xf32> to vector<1x8x8x4xf32>
    %71 = vector.shape_cast %70 : vector<1x8x8x4xf32> to vector<8x8x4xf32>
    %72 = vector.shape_cast %71 : vector<8x8x4xf32> to vector<64x4xf32>
    %73 = arith.truncf %72 : vector<64x4xf32> to vector<64x4xbf16>
    %c0_38 = arith.constant 0 : index
    %c4 = arith.constant 4 : index
    %74 = vector.load %arg13[%c0_38, %c4] : memref<64x36xbf16, #tpu.memory_space<vmem>>, vector<64x4xbf16>
    tpu.vector_store %arg13[%c0_38, %c4], %73 {strides = array<i32>} : memref<64x36xbf16, #tpu.memory_space<vmem>>, vector<64x4xbf16>,
    %75 = vector.extract_strided_slice %31 {offsets = [0, 0, 0, 0], sizes = [1, 8, 8, 4], strides = [1, 1, 1, 1]} : vector<1x9x9x4xf32> to vector<1x8x8x4xf32>
    %76 = vector.shape_cast %75 : vector<1x8x8x4xf32> to vector<8x8x4xf32>
    %77 = vector.shape_cast %76 : vector<8x8x4xf32> to vector<64x4xf32>
    %78 = arith.truncf %77 : vector<64x4xf32> to vector<64x4xbf16>
    %c0_39 = arith.constant 0 : index
    %c4_40 = arith.constant 4 : index
    %79 = vector.load %arg12[%c0_39, %c4_40] : memref<64x36xbf16, #tpu.memory_space<vmem>>, vector<64x4xbf16>
    tpu.vector_store %arg12[%c0_39, %c4_40], %78 {strides = array<i32>} : memref<64x36xbf16, #tpu.memory_space<vmem>>, vector<64x4xbf16>,
    %80 = vector.extract_strided_slice %9 {offsets = [0, 0, 1, 0], sizes = [1, 8, 8, 4], strides = [1, 1, 1, 1]} : vector<1x9x9x4xf32> to vector<1x8x8x4xf32>
    %81 = vector.shape_cast %80 : vector<1x8x8x4xf32> to vector<8x8x4xf32>
    %82 = vector.shape_cast %81 : vector<8x8x4xf32> to vector<64x4xf32>
    %83 = arith.truncf %82 : vector<64x4xf32> to vector<64x4xbf16>
    %c0_41 = arith.constant 0 : index
    %c8 = arith.constant 8 : index
    %84 = vector.load %arg13[%c0_41, %c8] : memref<64x36xbf16, #tpu.memory_space<vmem>>, vector<64x4xbf16>
    tpu.vector_store %arg13[%c0_41, %c8], %83 {strides = array<i32>} : memref<64x36xbf16, #tpu.memory_space<vmem>>, vector<64x4xbf16>,
    %85 = vector.extract_strided_slice %17 {offsets = [0, 0, 1, 0], sizes = [1, 8, 8, 4], strides = [1, 1, 1, 1]} : vector<1x9x9x4xf32> to vector<1x8x8x4xf32>
    %86 = vector.shape_cast %85 : vector<1x8x8x4xf32> to vector<8x8x4xf32>
    %87 = vector.shape_cast %86 : vector<8x8x4xf32> to vector<64x4xf32>
    %88 = arith.truncf %87 : vector<64x4xf32> to vector<64x4xbf16>
    %c0_42 = arith.constant 0 : index
    %c8_43 = arith.constant 8 : index
    %89 = vector.load %arg12[%c0_42, %c8_43] : memref<64x36xbf16, #tpu.memory_space<vmem>>, vector<64x4xbf16>
    tpu.vector_store %arg12[%c0_42, %c8_43], %88 {strides = array<i32>} : memref<64x36xbf16, #tpu.memory_space<vmem>>, vector<64x4xbf16>,
    %90 = vector.extract_strided_slice %37 {offsets = [0, 0, 0, 0], sizes = [1, 8, 8, 4], strides = [1, 1, 1, 1]} : vector<1x8x9x4xf32> to vector<1x8x8x4xf32>
    %91 = vector.shape_cast %90 : vector<1x8x8x4xf32> to vector<8x8x4xf32>
    %92 = vector.shape_cast %91 : vector<8x8x4xf32> to vector<64x4xf32>
    %93 = arith.truncf %92 : vector<64x4xf32> to vector<64x4xbf16>
    %c0_44 = arith.constant 0 : index
    %c12 = arith.constant 12 : index
    %94 = vector.load %arg13[%c0_44, %c12] : memref<64x36xbf16, #tpu.memory_space<vmem>>, vector<64x4xbf16>
    tpu.vector_store %arg13[%c0_44, %c12], %93 {strides = array<i32>} : memref<64x36xbf16, #tpu.memory_space<vmem>>, vector<64x4xbf16>,
    %95 = vector.extract_strided_slice %45 {offsets = [0, 0, 0, 0], sizes = [1, 8, 8, 4], strides = [1, 1, 1, 1]} : vector<1x8x9x4xf32> to vector<1x8x8x4xf32>
    %96 = vector.shape_cast %95 : vector<1x8x8x4xf32> to vector<8x8x4xf32>
    %97 = vector.shape_cast %96 : vector<8x8x4xf32> to vector<64x4xf32>
    %98 = arith.truncf %97 : vector<64x4xf32> to vector<64x4xbf16>
    %c0_45 = arith.constant 0 : index
    %c12_46 = arith.constant 12 : index
    %99 = vector.load %arg12[%c0_45, %c12_46] : memref<64x36xbf16, #tpu.memory_space<vmem>>, vector<64x4xbf16>
    tpu.vector_store %arg12[%c0_45, %c12_46], %98 {strides = array<i32>} : memref<64x36xbf16, #tpu.memory_space<vmem>>, vector<64x4xbf16>,
    %100 = vector.extract_strided_slice %51 {offsets = [0, 0, 0, 0], sizes = [1, 8, 8, 4], strides = [1, 1, 1, 1]} : vector<1x8x9x4xf32> to vector<1x8x8x4xf32>
    %101 = vector.shape_cast %100 : vector<1x8x8x4xf32> to vector<8x8x4xf32>
    %102 = vector.shape_cast %101 : vector<8x8x4xf32> to vector<64x4xf32>
    %103 = arith.truncf %102 : vector<64x4xf32> to vector<64x4xbf16>
    %c0_47 = arith.constant 0 : index
    %c16 = arith.constant 16 : index
    %104 = vector.load %arg13[%c0_47, %c16] : memref<64x36xbf16, #tpu.memory_space<vmem>>, vector<64x4xbf16>
    tpu.vector_store %arg13[%c0_47, %c16], %103 {strides = array<i32>} : memref<64x36xbf16, #tpu.memory_space<vmem>>, vector<64x4xbf16>,
    %105 = vector.extract_strided_slice %59 {offsets = [0, 0, 0, 0], sizes = [1, 8, 8, 4], strides = [1, 1, 1, 1]} : vector<1x8x9x4xf32> to vector<1x8x8x4xf32>
    %106 = vector.shape_cast %105 : vector<1x8x8x4xf32> to vector<8x8x4xf32>
    %107 = vector.shape_cast %106 : vector<8x8x4xf32> to vector<64x4xf32>
    %108 = arith.truncf %107 : vector<64x4xf32> to vector<64x4xbf16>
    %c0_48 = arith.constant 0 : index
    %c16_49 = arith.constant 16 : index
    %109 = vector.load %arg12[%c0_48, %c16_49] : memref<64x36xbf16, #tpu.memory_space<vmem>>, vector<64x4xbf16>
    tpu.vector_store %arg12[%c0_48, %c16_49], %108 {strides = array<i32>} : memref<64x36xbf16, #tpu.memory_space<vmem>>, vector<64x4xbf16>,
    %110 = vector.extract_strided_slice %37 {offsets = [0, 0, 1, 0], sizes = [1, 8, 8, 4], strides = [1, 1, 1, 1]} : vector<1x8x9x4xf32> to vector<1x8x8x4xf32>
    %111 = vector.shape_cast %110 : vector<1x8x8x4xf32> to vector<8x8x4xf32>
    %112 = vector.shape_cast %111 : vector<8x8x4xf32> to vector<64x4xf32>
    %113 = arith.truncf %112 : vector<64x4xf32> to vector<64x4xbf16>
    %c0_50 = arith.constant 0 : index
    %c20 = arith.constant 20 : index
    %114 = vector.load %arg13[%c0_50, %c20] : memref<64x36xbf16, #tpu.memory_space<vmem>>, vector<64x4xbf16>
    tpu.vector_store %arg13[%c0_50, %c20], %113 {strides = array<i32>} : memref<64x36xbf16, #tpu.memory_space<vmem>>, vector<64x4xbf16>,
    %115 = vector.extract_strided_slice %45 {offsets = [0, 0, 1, 0], sizes = [1, 8, 8, 4], strides = [1, 1, 1, 1]} : vector<1x8x9x4xf32> to vector<1x8x8x4xf32>
    %116 = vector.shape_cast %115 : vector<1x8x8x4xf32> to vector<8x8x4xf32>
    %117 = vector.shape_cast %116 : vector<8x8x4xf32> to vector<64x4xf32>
    %118 = arith.truncf %117 : vector<64x4xf32> to vector<64x4xbf16>
    %c0_51 = arith.constant 0 : index
    %c20_52 = arith.constant 20 : index
    %119 = vector.load %arg12[%c0_51, %c20_52] : memref<64x36xbf16, #tpu.memory_space<vmem>>, vector<64x4xbf16>
    tpu.vector_store %arg12[%c0_51, %c20_52], %118 {strides = array<i32>} : memref<64x36xbf16, #tpu.memory_space<vmem>>, vector<64x4xbf16>,
    %120 = vector.extract_strided_slice %9 {offsets = [0, 1, 0, 0], sizes = [1, 8, 8, 4], strides = [1, 1, 1, 1]} : vector<1x9x9x4xf32> to vector<1x8x8x4xf32>
    %121 = vector.shape_cast %120 : vector<1x8x8x4xf32> to vector<8x8x4xf32>
    %122 = vector.shape_cast %121 : vector<8x8x4xf32> to vector<64x4xf32>
    %123 = arith.truncf %122 : vector<64x4xf32> to vector<64x4xbf16>
    %c0_53 = arith.constant 0 : index
    %c24 = arith.constant 24 : index
    %124 = vector.load %arg13[%c0_53, %c24] : memref<64x36xbf16, #tpu.memory_space<vmem>>, vector<64x4xbf16>
    tpu.vector_store %arg13[%c0_53, %c24], %123 {strides = array<i32>} : memref<64x36xbf16, #tpu.memory_space<vmem>>, vector<64x4xbf16>,
    %125 = vector.extract_strided_slice %17 {offsets = [0, 1, 0, 0], sizes = [1, 8, 8, 4], strides = [1, 1, 1, 1]} : vector<1x9x9x4xf32> to vector<1x8x8x4xf32>
    %126 = vector.shape_cast %125 : vector<1x8x8x4xf32> to vector<8x8x4xf32>
    %127 = vector.shape_cast %126 : vector<8x8x4xf32> to vector<64x4xf32>
    %128 = arith.truncf %127 : vector<64x4xf32> to vector<64x4xbf16>
    %c0_54 = arith.constant 0 : index
    %c24_55 = arith.constant 24 : index
    %129 = vector.load %arg12[%c0_54, %c24_55] : memref<64x36xbf16, #tpu.memory_space<vmem>>, vector<64x4xbf16>
    tpu.vector_store %arg12[%c0_54, %c24_55], %128 {strides = array<i32>} : memref<64x36xbf16, #tpu.memory_space<vmem>>, vector<64x4xbf16>,
    %130 = vector.extract_strided_slice %23 {offsets = [0, 1, 0, 0], sizes = [1, 8, 8, 4], strides = [1, 1, 1, 1]} : vector<1x9x9x4xf32> to vector<1x8x8x4xf32>
    %131 = vector.shape_cast %130 : vector<1x8x8x4xf32> to vector<8x8x4xf32>
    %132 = vector.shape_cast %131 : vector<8x8x4xf32> to vector<64x4xf32>
    %133 = arith.truncf %132 : vector<64x4xf32> to vector<64x4xbf16>
    %c0_56 = arith.constant 0 : index
    %c28 = arith.constant 28 : index
    %134 = vector.load %arg13[%c0_56, %c28] : memref<64x36xbf16, #tpu.memory_space<vmem>>, vector<64x4xbf16>
    tpu.vector_store %arg13[%c0_56, %c28], %133 {strides = array<i32>} : memref<64x36xbf16, #tpu.memory_space<vmem>>, vector<64x4xbf16>,
    %135 = vector.extract_strided_slice %31 {offsets = [0, 1, 0, 0], sizes = [1, 8, 8, 4], strides = [1, 1, 1, 1]} : vector<1x9x9x4xf32> to vector<1x8x8x4xf32>
    %136 = vector.shape_cast %135 : vector<1x8x8x4xf32> to vector<8x8x4xf32>
    %137 = vector.shape_cast %136 : vector<8x8x4xf32> to vector<64x4xf32>
    %138 = arith.truncf %137 : vector<64x4xf32> to vector<64x4xbf16>
    %c0_57 = arith.constant 0 : index
    %c28_58 = arith.constant 28 : index
    %139 = vector.load %arg12[%c0_57, %c28_58] : memref<64x36xbf16, #tpu.memory_space<vmem>>, vector<64x4xbf16>
    tpu.vector_store %arg12[%c0_57, %c28_58], %138 {strides = array<i32>} : memref<64x36xbf16, #tpu.memory_space<vmem>>, vector<64x4xbf16>,
    %140 = vector.extract_strided_slice %9 {offsets = [0, 1, 1, 0], sizes = [1, 8, 8, 4], strides = [1, 1, 1, 1]} : vector<1x9x9x4xf32> to vector<1x8x8x4xf32>
    %141 = vector.shape_cast %140 : vector<1x8x8x4xf32> to vector<8x8x4xf32>
    %142 = vector.shape_cast %141 : vector<8x8x4xf32> to vector<64x4xf32>
    %143 = arith.truncf %142 : vector<64x4xf32> to vector<64x4xbf16>
    %c0_59 = arith.constant 0 : index
    %c32 = arith.constant 32 : index
    %144 = vector.load %arg13[%c0_59, %c32] : memref<64x36xbf16, #tpu.memory_space<vmem>>, vector<64x4xbf16>
    tpu.vector_store %arg13[%c0_59, %c32], %143 {strides = array<i32>} : memref<64x36xbf16, #tpu.memory_space<vmem>>, vector<64x4xbf16>,
    %145 = vector.extract_strided_slice %17 {offsets = [0, 1, 1, 0], sizes = [1, 8, 8, 4], strides = [1, 1, 1, 1]} : vector<1x9x9x4xf32> to vector<1x8x8x4xf32>
    %146 = vector.shape_cast %145 : vector<1x8x8x4xf32> to vector<8x8x4xf32>
    %147 = vector.shape_cast %146 : vector<8x8x4xf32> to vector<64x4xf32>
    %148 = arith.truncf %147 : vector<64x4xf32> to vector<64x4xbf16>
    %c0_60 = arith.constant 0 : index
    %c32_61 = arith.constant 32 : index
    %149 = vector.load %arg12[%c0_60, %c32_61] : memref<64x36xbf16, #tpu.memory_space<vmem>>, vector<64x4xbf16>
    tpu.vector_store %arg12[%c0_60, %c32_61], %148 {strides = array<i32>} : memref<64x36xbf16, #tpu.memory_space<vmem>>, vector<64x4xbf16>,
    %c0_62 = arith.constant 0 : index
    %c0_63 = arith.constant 0 : index
    %150 = vector.load %arg12[%c0_62, %c0_63] : memref<64x36xbf16, #tpu.memory_space<vmem>>, vector<64x36xbf16>
    %c0_64 = arith.constant 0 : index
    %c0_65 = arith.constant 0 : index
    %151 = vector.load %arg7[%c0_64, %c0_65] : memref<36x128xbf16, #tpu.memory_space<vmem>>, vector<36x128xbf16>
    %cst_66 = arith.constant dense<0.000000e+00> : vector<64x128xf32>
    %152 = tpu.matmul %150, %151, %cst_66 {dimension_numbers = #tpu.dot_dimension_numbers<[1], [0], [0], [1], [0, 0, 1, 1], [], []>} : vector<64x36xbf16>, vector<36x128xbf16>, vector<64x128xf32> -> vector<64x128xf32>
    %c0_67 = arith.constant 0 : index
    %c0_68 = arith.constant 0 : index
    %153 = vector.load %arg13[%c0_67, %c0_68] : memref<64x36xbf16, #tpu.memory_space<vmem>>, vector<64x36xbf16>
    %c0_69 = arith.constant 0 : index
    %c0_70 = arith.constant 0 : index
    %154 = vector.load %arg8[%c0_69, %c0_70] : memref<36x128xbf16, #tpu.memory_space<vmem>>, vector<36x128xbf16>
    %cst_71 = arith.constant dense<0.000000e+00> : vector<64x128xf32>
    %155 = tpu.matmul %153, %154, %cst_71 {dimension_numbers = #tpu.dot_dimension_numbers<[1], [0], [0], [1], [0, 0, 1, 1], [], []>} : vector<64x36xbf16>, vector<36x128xbf16>, vector<64x128xf32> -> vector<64x128xf32>
    %cst_72 = arith.constant dense<0.000000e+00> : vector<128xf32>
    %156 = vector.multi_reduction <add>, %152, %cst_72 [0] : vector<64x128xf32> to vector<128xf32>
    %157 = vector.shape_cast %156 : vector<128xf32> to vector<1x128xf32>
    %c0_73 = arith.constant 0 : index
    %c0_74 = arith.constant 0 : index
    %c0_75 = arith.constant 0 : index
    %158 = vector.load %arg11[%c0_73, %c0_74, %c0_75] : memref<1x2x128xf32, #tpu.memory_space<vmem>>, vector<1x1x128xf32>
    %159 = vector.shape_cast %158 : vector<1x1x128xf32> to vector<1x128xf32>
    %160 = vector.shape_cast %157 : vector<1x128xf32> to vector<1x1x128xf32>
    tpu.vector_store %arg11[%c0_73, %c0_74, %c0_75], %160 {strides = array<i32>} : memref<1x2x128xf32, #tpu.memory_space<vmem>>, vector<1x1x128xf32>,
    %161 = arith.mulf %152, %152 : vector<64x128xf32>
    %cst_76 = arith.constant dense<0.000000e+00> : vector<128xf32>
    %162 = vector.multi_reduction <add>, %161, %cst_76 [0] : vector<64x128xf32> to vector<128xf32>
    %163 = vector.shape_cast %162 : vector<128xf32> to vector<1x128xf32>
    %c0_77 = arith.constant 0 : index
    %c1 = arith.constant 1 : index
    %c0_78 = arith.constant 0 : index
    %164 = vector.load %arg11[%c0_77, %c1, %c0_78] : memref<1x2x128xf32, #tpu.memory_space<vmem>>, vector<1x1x128xf32>
    %165 = vector.shape_cast %164 : vector<1x1x128xf32> to vector<1x128xf32>
    %166 = vector.shape_cast %163 : vector<1x128xf32> to vector<1x1x128xf32>
    tpu.vector_store %arg11[%c0_77, %c1, %c0_78], %166 {strides = array<i32>} : memref<1x2x128xf32, #tpu.memory_space<vmem>>, vector<1x1x128xf32>,
    %167 = vector.shape_cast %152 : vector<64x128xf32> to vector<1x8x8x128xf32>
    %168 = arith.truncf %167 : vector<1x8x8x128xf32> to vector<1x8x8x128xbf16>
    %c0_79 = arith.constant 0 : index
    %c0_80 = arith.constant 0 : index
    %c0_81 = arith.constant 0 : index
    %c0_82 = arith.constant 0 : index
    %169 = vector.load %arg9[%c0_79, %c0_80, %c0_81, %c0_82] : memref<1x8x8x128xbf16, #tpu.memory_space<vmem>>, vector<1x8x8x128xbf16>
    tpu.vector_store %arg9[%c0_79, %c0_80, %c0_81, %c0_82], %168 {strides = array<i32>} : memref<1x8x8x128xbf16, #tpu.memory_space<vmem>>, vector<1x8x8x128xbf16>,
    %170 = vector.shape_cast %155 : vector<64x128xf32> to vector<1x8x8x128xf32>
    %171 = arith.truncf %170 : vector<1x8x8x128xf32> to vector<1x8x8x128xbf16>
    %c0_83 = arith.constant 0 : index
    %c0_84 = arith.constant 0 : index
    %c0_85 = arith.constant 0 : index
    %c0_86 = arith.constant 0 : index
    %172 = vector.load %arg10[%c0_83, %c0_84, %c0_85, %c0_86] : memref<1x8x8x128xbf16, #tpu.memory_space<vmem>>, vector<1x8x8x128xbf16>
    tpu.vector_store %arg10[%c0_83, %c0_84, %c0_85, %c0_86], %171 {strides = array<i32>} : memref<1x8x8x128xbf16, #tpu.memory_space<vmem>>, vector<1x8x8x128xbf16>,
    return
  }
  func.func @transform_0(%arg0: i32) -> (i32, i32, i32, i32) {
    %c0_i32 = arith.constant 0 : i32
    %c0_i32_0 = arith.constant 0 : i32
    %c0_i32_1 = arith.constant 0 : i32
    %c0_i32_2 = arith.constant 0 : i32
    return %arg0, %c0_i32, %c0_i32_0, %c0_i32_1 : i32, i32, i32, i32
  }
  func.func @transform_1(%arg0: i32) -> (i32, i32, i32, i32) {
    %c0_i32 = arith.constant 0 : i32
    %c0_i32_0 = arith.constant 0 : i32
    %c0_i32_1 = arith.constant 0 : i32
    %c0_i32_2 = arith.constant 0 : i32
    return %arg0, %c0_i32, %c0_i32_0, %c0_i32_1 : i32, i32, i32, i32
  }
  func.func @transform_2(%arg0: i32) -> (i32, i32, i32, i32) {
    %c0_i32 = arith.constant 0 : i32
    %c0_i32_0 = arith.constant 0 : i32
    %c0_i32_1 = arith.constant 0 : i32
    %c0_i32_2 = arith.constant 0 : i32
    return %arg0, %c0_i32, %c0_i32_0, %c0_i32_1 : i32, i32, i32, i32
  }
  func.func @transform_3(%arg0: i32) -> (i32, i32, i32, i32) {
    %c0_i32 = arith.constant 0 : i32
    %c0_i32_0 = arith.constant 0 : i32
    %c0_i32_1 = arith.constant 0 : i32
    %c0_i32_2 = arith.constant 0 : i32
    return %arg0, %c0_i32, %c0_i32_0, %c0_i32_1 : i32, i32, i32, i32
  }
  func.func @transform_4(%arg0: i32) -> (i32, i32) {
    %c0_i32 = arith.constant 0 : i32
    %c0_i32_0 = arith.constant 0 : i32
    %c0_i32_1 = arith.constant 0 : i32
    return %c0_i32, %c0_i32_0 : i32, i32
  }
  func.func @transform_5(%arg0: i32) -> (i32, i32) {
    %c0_i32 = arith.constant 0 : i32
    %c0_i32_0 = arith.constant 0 : i32
    %c0_i32_1 = arith.constant 0 : i32
    return %c0_i32, %c0_i32_0 : i32, i32
  }
  func.func @transform_6(%arg0: i32) -> (i32, i32) {
    %c0_i32 = arith.constant 0 : i32
    %c0_i32_0 = arith.constant 0 : i32
    %c0_i32_1 = arith.constant 0 : i32
    return %c0_i32, %c0_i32_0 : i32, i32
  }
  func.func @transform_7(%arg0: i32) -> (i32, i32) {
    %c0_i32 = arith.constant 0 : i32
    %c0_i32_0 = arith.constant 0 : i32
    %c0_i32_1 = arith.constant 0 : i32
    return %c0_i32, %c0_i32_0 : i32, i32
  }
  func.func @transform_8(%arg0: i32) -> (i32, i32, i32, i32) {
    %c0_i32 = arith.constant 0 : i32
    %c0_i32_0 = arith.constant 0 : i32
    %c0_i32_1 = arith.constant 0 : i32
    %c0_i32_2 = arith.constant 0 : i32
    return %arg0, %c0_i32, %c0_i32_0, %c0_i32_1 : i32, i32, i32, i32
  }
  func.func @transform_9(%arg0: i32) -> (i32, i32, i32, i32) {
    %c0_i32 = arith.constant 0 : i32
    %c0_i32_0 = arith.constant 0 : i32
    %c0_i32_1 = arith.constant 0 : i32
    %c0_i32_2 = arith.constant 0 : i32
    return %arg0, %c0_i32, %c0_i32_0, %c0_i32_1 : i32, i32, i32, i32
  }
  func.func @transform_10(%arg0: i32) -> (i32, i32, i32) {
    %c0_i32 = arith.constant 0 : i32
    %c0_i32_0 = arith.constant 0 : i32
    %c0_i32_1 = arith.constant 0 : i32
    return %arg0, %c0_i32, %c0_i32_0 : i32, i32, i32
  }
}

module attributes {stable_mosaic.version = 11 : i64} {
  func.func @_conv2_res_kernel(%arg0: i32, %arg1: memref<1x10x10x128xbf16, #tpu.memory_space<vmem>>, %arg2: memref<1x128xf32, #tpu.memory_space<vmem>>, %arg3: memref<1x128xf32, #tpu.memory_space<vmem>>, %arg4: memref<1152x128xbf16, #tpu.memory_space<vmem>>, %arg5: memref<1x8x8x128xbf16, #tpu.memory_space<vmem>>, %arg6: memref<1x8x8x128xf32, #tpu.memory_space<vmem>>, %arg7: memref<64x1152xbf16, #tpu.memory_space<vmem>>) attributes {dimension_semantics = [#tpu.dimension_semantics<parallel>], iteration_bounds = array<i64: 2>, scalar_prefetch = 0 : i64, scratch_operands = 1 : i64, tpu.core_type = #tpu.core_type<tc>, window_params = [{transform_indices = @transform_0, window_bounds = array<i64: 1, 10, 10, 128>}, {pipeline_mode = #tpu.pipeline_mode<synchronous>, transform_indices = @transform_1, window_bounds = array<i64: 1, 128>}, {pipeline_mode = #tpu.pipeline_mode<synchronous>, transform_indices = @transform_2, window_bounds = array<i64: 1, 128>}, {pipeline_mode = #tpu.pipeline_mode<synchronous>, transform_indices = @transform_3, window_bounds = array<i64: 1152, 128>}, {transform_indices = @transform_4, window_bounds = array<i64: 1, 8, 8, 128>}, {transform_indices = @transform_5, window_bounds = array<i64: 1, 8, 8, 128>}]} {
    %c0 = arith.constant 0 : index
    %c0_0 = arith.constant 0 : index
    %c0_1 = arith.constant 0 : index
    %c0_2 = arith.constant 0 : index
    %0 = vector.load %arg1[%c0, %c0_0, %c0_1, %c0_2] : memref<1x10x10x128xbf16, #tpu.memory_space<vmem>>, vector<1x10x10x128xbf16>
    %1 = arith.extf %0 : vector<1x10x10x128xbf16> to vector<1x10x10x128xf32>
    %c0_3 = arith.constant 0 : index
    %c0_4 = arith.constant 0 : index
    %2 = vector.load %arg2[%c0_3, %c0_4] : memref<1x128xf32, #tpu.memory_space<vmem>>, vector<1x128xf32>
    %3 = vector.shape_cast %2 : vector<1x128xf32> to vector<1x1x1x128xf32>
    %c0_5 = arith.constant 0 : index
    %c0_6 = arith.constant 0 : index
    %4 = vector.load %arg3[%c0_5, %c0_6] : memref<1x128xf32, #tpu.memory_space<vmem>>, vector<1x128xf32>
    %5 = vector.shape_cast %4 : vector<1x128xf32> to vector<1x1x1x128xf32>
    %cst = arith.constant -5.000000e+29 : f32
    %6 = vector.broadcast %cst : f32 to vector<1x10x10x128xf32>
    %7 = arith.cmpf ole, %1, %6 : vector<1x10x10x128xf32>
    %8 = vector.broadcast %3 : vector<1x1x1x128xf32> to vector<1x10x10x128xf32>
    %9 = arith.mulf %1, %8 : vector<1x10x10x128xf32>
    %10 = vector.broadcast %5 : vector<1x1x1x128xf32> to vector<1x10x10x128xf32>
    %11 = arith.addf %9, %10 : vector<1x10x10x128xf32>
    %cst_7 = arith.constant 0.000000e+00 : f32
    %12 = vector.broadcast %cst_7 : f32 to vector<1x10x10x128xf32>
    %13 = arith.maximumf %11, %12 : vector<1x10x10x128xf32>
    %cst_8 = arith.constant 0.000000e+00 : f32
    %14 = vector.broadcast %cst_8 : f32 to vector<1x10x10x128xf32>
    %15 = arith.select %7, %14, %13 : vector<1x10x10x128xi1>, vector<1x10x10x128xf32>
    %16 = vector.extract_strided_slice %15 {offsets = [0, 0, 0, 0], sizes = [1, 8, 8, 128], strides = [1, 1, 1, 1]} : vector<1x10x10x128xf32> to vector<1x8x8x128xf32>
    %17 = vector.shape_cast %16 : vector<1x8x8x128xf32> to vector<8x8x128xf32>
    %18 = vector.shape_cast %17 : vector<8x8x128xf32> to vector<64x128xf32>
    %19 = arith.truncf %18 : vector<64x128xf32> to vector<64x128xbf16>
    %c0_9 = arith.constant 0 : index
    %c0_10 = arith.constant 0 : index
    %20 = vector.load %arg7[%c0_9, %c0_10] : memref<64x1152xbf16, #tpu.memory_space<vmem>>, vector<64x128xbf16>
    tpu.vector_store %arg7[%c0_9, %c0_10], %19 {strides = array<i32>} : memref<64x1152xbf16, #tpu.memory_space<vmem>>, vector<64x128xbf16>,
    %21 = vector.extract_strided_slice %15 {offsets = [0, 0, 1, 0], sizes = [1, 8, 8, 128], strides = [1, 1, 1, 1]} : vector<1x10x10x128xf32> to vector<1x8x8x128xf32>
    %22 = vector.shape_cast %21 : vector<1x8x8x128xf32> to vector<8x8x128xf32>
    %23 = vector.shape_cast %22 : vector<8x8x128xf32> to vector<64x128xf32>
    %24 = arith.truncf %23 : vector<64x128xf32> to vector<64x128xbf16>
    %c0_11 = arith.constant 0 : index
    %c128 = arith.constant 128 : index
    %25 = vector.load %arg7[%c0_11, %c128] : memref<64x1152xbf16, #tpu.memory_space<vmem>>, vector<64x128xbf16>
    tpu.vector_store %arg7[%c0_11, %c128], %24 {strides = array<i32>} : memref<64x1152xbf16, #tpu.memory_space<vmem>>, vector<64x128xbf16>,
    %26 = vector.extract_strided_slice %15 {offsets = [0, 0, 2, 0], sizes = [1, 8, 8, 128], strides = [1, 1, 1, 1]} : vector<1x10x10x128xf32> to vector<1x8x8x128xf32>
    %27 = vector.shape_cast %26 : vector<1x8x8x128xf32> to vector<8x8x128xf32>
    %28 = vector.shape_cast %27 : vector<8x8x128xf32> to vector<64x128xf32>
    %29 = arith.truncf %28 : vector<64x128xf32> to vector<64x128xbf16>
    %c0_12 = arith.constant 0 : index
    %c256 = arith.constant 256 : index
    %30 = vector.load %arg7[%c0_12, %c256] : memref<64x1152xbf16, #tpu.memory_space<vmem>>, vector<64x128xbf16>
    tpu.vector_store %arg7[%c0_12, %c256], %29 {strides = array<i32>} : memref<64x1152xbf16, #tpu.memory_space<vmem>>, vector<64x128xbf16>,
    %31 = vector.extract_strided_slice %15 {offsets = [0, 1, 0, 0], sizes = [1, 8, 8, 128], strides = [1, 1, 1, 1]} : vector<1x10x10x128xf32> to vector<1x8x8x128xf32>
    %32 = vector.shape_cast %31 : vector<1x8x8x128xf32> to vector<8x8x128xf32>
    %33 = vector.shape_cast %32 : vector<8x8x128xf32> to vector<64x128xf32>
    %34 = arith.truncf %33 : vector<64x128xf32> to vector<64x128xbf16>
    %c0_13 = arith.constant 0 : index
    %c384 = arith.constant 384 : index
    %35 = vector.load %arg7[%c0_13, %c384] : memref<64x1152xbf16, #tpu.memory_space<vmem>>, vector<64x128xbf16>
    tpu.vector_store %arg7[%c0_13, %c384], %34 {strides = array<i32>} : memref<64x1152xbf16, #tpu.memory_space<vmem>>, vector<64x128xbf16>,
    %36 = vector.extract_strided_slice %15 {offsets = [0, 1, 1, 0], sizes = [1, 8, 8, 128], strides = [1, 1, 1, 1]} : vector<1x10x10x128xf32> to vector<1x8x8x128xf32>
    %37 = vector.shape_cast %36 : vector<1x8x8x128xf32> to vector<8x8x128xf32>
    %38 = vector.shape_cast %37 : vector<8x8x128xf32> to vector<64x128xf32>
    %39 = arith.truncf %38 : vector<64x128xf32> to vector<64x128xbf16>
    %c0_14 = arith.constant 0 : index
    %c512 = arith.constant 512 : index
    %40 = vector.load %arg7[%c0_14, %c512] : memref<64x1152xbf16, #tpu.memory_space<vmem>>, vector<64x128xbf16>
    tpu.vector_store %arg7[%c0_14, %c512], %39 {strides = array<i32>} : memref<64x1152xbf16, #tpu.memory_space<vmem>>, vector<64x128xbf16>,
    %41 = vector.extract_strided_slice %15 {offsets = [0, 1, 2, 0], sizes = [1, 8, 8, 128], strides = [1, 1, 1, 1]} : vector<1x10x10x128xf32> to vector<1x8x8x128xf32>
    %42 = vector.shape_cast %41 : vector<1x8x8x128xf32> to vector<8x8x128xf32>
    %43 = vector.shape_cast %42 : vector<8x8x128xf32> to vector<64x128xf32>
    %44 = arith.truncf %43 : vector<64x128xf32> to vector<64x128xbf16>
    %c0_15 = arith.constant 0 : index
    %c640 = arith.constant 640 : index
    %45 = vector.load %arg7[%c0_15, %c640] : memref<64x1152xbf16, #tpu.memory_space<vmem>>, vector<64x128xbf16>
    tpu.vector_store %arg7[%c0_15, %c640], %44 {strides = array<i32>} : memref<64x1152xbf16, #tpu.memory_space<vmem>>, vector<64x128xbf16>,
    %46 = vector.extract_strided_slice %15 {offsets = [0, 2, 0, 0], sizes = [1, 8, 8, 128], strides = [1, 1, 1, 1]} : vector<1x10x10x128xf32> to vector<1x8x8x128xf32>
    %47 = vector.shape_cast %46 : vector<1x8x8x128xf32> to vector<8x8x128xf32>
    %48 = vector.shape_cast %47 : vector<8x8x128xf32> to vector<64x128xf32>
    %49 = arith.truncf %48 : vector<64x128xf32> to vector<64x128xbf16>
    %c0_16 = arith.constant 0 : index
    %c768 = arith.constant 768 : index
    %50 = vector.load %arg7[%c0_16, %c768] : memref<64x1152xbf16, #tpu.memory_space<vmem>>, vector<64x128xbf16>
    tpu.vector_store %arg7[%c0_16, %c768], %49 {strides = array<i32>} : memref<64x1152xbf16, #tpu.memory_space<vmem>>, vector<64x128xbf16>,
    %51 = vector.extract_strided_slice %15 {offsets = [0, 2, 1, 0], sizes = [1, 8, 8, 128], strides = [1, 1, 1, 1]} : vector<1x10x10x128xf32> to vector<1x8x8x128xf32>
    %52 = vector.shape_cast %51 : vector<1x8x8x128xf32> to vector<8x8x128xf32>
    %53 = vector.shape_cast %52 : vector<8x8x128xf32> to vector<64x128xf32>
    %54 = arith.truncf %53 : vector<64x128xf32> to vector<64x128xbf16>
    %c0_17 = arith.constant 0 : index
    %c896 = arith.constant 896 : index
    %55 = vector.load %arg7[%c0_17, %c896] : memref<64x1152xbf16, #tpu.memory_space<vmem>>, vector<64x128xbf16>
    tpu.vector_store %arg7[%c0_17, %c896], %54 {strides = array<i32>} : memref<64x1152xbf16, #tpu.memory_space<vmem>>, vector<64x128xbf16>,
    %56 = vector.extract_strided_slice %15 {offsets = [0, 2, 2, 0], sizes = [1, 8, 8, 128], strides = [1, 1, 1, 1]} : vector<1x10x10x128xf32> to vector<1x8x8x128xf32>
    %57 = vector.shape_cast %56 : vector<1x8x8x128xf32> to vector<8x8x128xf32>
    %58 = vector.shape_cast %57 : vector<8x8x128xf32> to vector<64x128xf32>
    %59 = arith.truncf %58 : vector<64x128xf32> to vector<64x128xbf16>
    %c0_18 = arith.constant 0 : index
    %c1024 = arith.constant 1024 : index
    %60 = vector.load %arg7[%c0_18, %c1024] : memref<64x1152xbf16, #tpu.memory_space<vmem>>, vector<64x128xbf16>
    tpu.vector_store %arg7[%c0_18, %c1024], %59 {strides = array<i32>} : memref<64x1152xbf16, #tpu.memory_space<vmem>>, vector<64x128xbf16>,
    %c0_19 = arith.constant 0 : index
    %c0_20 = arith.constant 0 : index
    %61 = vector.load %arg7[%c0_19, %c0_20] : memref<64x1152xbf16, #tpu.memory_space<vmem>>, vector<64x1152xbf16>
    %c0_21 = arith.constant 0 : index
    %c0_22 = arith.constant 0 : index
    %62 = vector.load %arg4[%c0_21, %c0_22] : memref<1152x128xbf16, #tpu.memory_space<vmem>>, vector<1152x128xbf16>
    %cst_23 = arith.constant dense<0.000000e+00> : vector<64x128xf32>
    %63 = tpu.matmul %61, %62, %cst_23 {dimension_numbers = #tpu.dot_dimension_numbers<[1], [0], [0], [1], [0, 0, 1, 1], [], []>} : vector<64x1152xbf16>, vector<1152x128xbf16>, vector<64x128xf32> -> vector<64x128xf32>
    %64 = vector.shape_cast %63 : vector<64x128xf32> to vector<1x8x8x128xf32>
    %c0_24 = arith.constant 0 : index
    %c0_25 = arith.constant 0 : index
    %c0_26 = arith.constant 0 : index
    %c0_27 = arith.constant 0 : index
    %65 = vector.load %arg5[%c0_24, %c0_25, %c0_26, %c0_27] : memref<1x8x8x128xbf16, #tpu.memory_space<vmem>>, vector<1x8x8x128xbf16>
    %66 = arith.extf %65 : vector<1x8x8x128xbf16> to vector<1x8x8x128xf32>
    %67 = arith.addf %64, %66 : vector<1x8x8x128xf32>
    %c0_28 = arith.constant 0 : index
    %c0_29 = arith.constant 0 : index
    %c0_30 = arith.constant 0 : index
    %c0_31 = arith.constant 0 : index
    %68 = vector.load %arg6[%c0_28, %c0_29, %c0_30, %c0_31] : memref<1x8x8x128xf32, #tpu.memory_space<vmem>>, vector<1x8x8x128xf32>
    tpu.vector_store %arg6[%c0_28, %c0_29, %c0_30, %c0_31], %67 {strides = array<i32>} : memref<1x8x8x128xf32, #tpu.memory_space<vmem>>, vector<1x8x8x128xf32>,
    return
  }
  func.func @transform_0(%arg0: i32) -> (i32, i32, i32, i32) {
    %c0_i32 = arith.constant 0 : i32
    %c0_i32_0 = arith.constant 0 : i32
    %c0_i32_1 = arith.constant 0 : i32
    %c0_i32_2 = arith.constant 0 : i32
    return %arg0, %c0_i32, %c0_i32_0, %c0_i32_1 : i32, i32, i32, i32
  }
  func.func @transform_1(%arg0: i32) -> (i32, i32) {
    %c0_i32 = arith.constant 0 : i32
    %c0_i32_0 = arith.constant 0 : i32
    %c0_i32_1 = arith.constant 0 : i32
    return %c0_i32, %c0_i32_0 : i32, i32
  }
  func.func @transform_2(%arg0: i32) -> (i32, i32) {
    %c0_i32 = arith.constant 0 : i32
    %c0_i32_0 = arith.constant 0 : i32
    %c0_i32_1 = arith.constant 0 : i32
    return %c0_i32, %c0_i32_0 : i32, i32
  }
  func.func @transform_3(%arg0: i32) -> (i32, i32) {
    %c0_i32 = arith.constant 0 : i32
    %c0_i32_0 = arith.constant 0 : i32
    %c0_i32_1 = arith.constant 0 : i32
    return %c0_i32, %c0_i32_0 : i32, i32
  }
  func.func @transform_4(%arg0: i32) -> (i32, i32, i32, i32) {
    %c0_i32 = arith.constant 0 : i32
    %c0_i32_0 = arith.constant 0 : i32
    %c0_i32_1 = arith.constant 0 : i32
    %c0_i32_2 = arith.constant 0 : i32
    return %arg0, %c0_i32, %c0_i32_0, %c0_i32_1 : i32, i32, i32, i32
  }
  func.func @transform_5(%arg0: i32) -> (i32, i32, i32, i32) {
    %c0_i32 = arith.constant 0 : i32
    %c0_i32_0 = arith.constant 0 : i32
    %c0_i32_1 = arith.constant 0 : i32
    %c0_i32_2 = arith.constant 0 : i32
    return %arg0, %c0_i32, %c0_i32_0, %c0_i32_1 : i32, i32, i32, i32
  }
}

</mosaic_0001>

<bundles_post_ra>
// kernel: block_down.3
= control target key start
LH: loop header
LB: loop body
LE: loop exit
PB: predicated region body
PF: predicated region fallthrough
CT: control target
= control target key end

     0   :  { %s54_s0 = inlined_call_operand.vmem [shape: f32[16,128], index: 0, kind: input, shape index: {}]   ;;  %s55_s1 = inlined_call_operand.vmem [shape: f32[1,2,128], index: 1, kind: output, shape index: {}]  }
   0x1   :  { %v8_v0 = vld [vmem:[%s54_s0] sm:$0xff]  ;;  %v9_v1 = vld [vmem:[%s54_s0 + $0x8] sm:$0xff] }
   0x2   :  { %v10_v2 = vadd.f32 %v9_v1, %v8_v0  ;;  %v18_v3 = vmul.f32 %v8_v0, %v8_v0  ;;  %v19_v4 = vmul.f32 %v9_v1, %v9_v1 }
   0x4   :  { %v11_v5 = vrot.slane %v10_v2, 4  ;;  %v20_v6 = vadd.f32 %v19_v4, %v18_v3 }
   0x6   :  { %v12_v7 = vadd.f32 %v11_v5, %v10_v2  ;;  %v21_v8 = vrot.slane %v20_v6, 4 }
   0x8   :  { %v13_v9 = vrot.slane %v12_v7, 2  ;;  %v22_v10 = vadd.f32 %v21_v8, %v20_v6 }
   0xa   :  { %v14_v11 = vadd.f32 %v13_v9, %v12_v7  ;;  %v23_v12 = vrot.slane %v22_v10, 2 }
   0xc   :  { %v15_v13 = vrot.slane %v14_v11, 1  ;;  %v24_v14 = vadd.f32 %v23_v12, %v22_v10 }
   0xe   :  { %v16_v15 = vadd.f32 %v15_v13, %v14_v11  ;;  %v25_v16 = vrot.slane %v24_v14, 1 }
  0x10   :  { %17 = vst [vmem:[%s55_s1] sm:$0x1] %v16_v15  ;;  %v26_v17 = vadd.f32 %v25_v16, %v24_v14 }
  0x12   :  { %27 = vst [vmem:[%s55_s1 + $0x1] sm:$0x1] %v26_v17 }

// kernel: block_down.4
= control target key start
LH: loop header
LB: loop body
LE: loop exit
PB: predicated region body
PF: predicated region fallthrough
CT: control target
= control target key end

     0   :  { %s2135_s13 = smov 0   ;;  %s3351_s0 = inlined_call_operand.vmem [shape: bf16[2,9,9,4], index: 0, kind: input, shape index: {}]   ;;  %s3352_s1 = inlined_call_operand.vmem [shape: bf16[2,9,9,4], index: 1, kind: input, shape index: {}]   ;;  %s3353_s2 = inlined_call_operand.vmem [shape: bf16[2,8,9,4], index: 2, kind: input, shape index: {}]   ;;  %s3354_s3 = inlined_call_operand.vmem [shape: bf16[2,8,9,4], index: 3, kind: input, shape index: {}]   ;;  %s3355_s4 = inlined_call_operand.vmem [shape: f32[1,4], index: 4, kind: input, shape index: {}]   ;;  %s3356_s5 = inlined_call_operand.vmem [shape: f32[1,4], index: 5, kind: input, shape index: {}]   ;;  %s3357_s6 = inlined_call_operand.vmem [shape: bf16[36,128], index: 6, kind: input, shape index: {}]   ;;  %s3358_s7 = inlined_call_operand.vmem [shape: bf16[36,128], index: 7, kind: input, shape index: {}]   ;;  %s3359_s8 = inlined_call_operand.vmem [shape: bf16[2,8,8,128], index: 8, kind: output, shape index: {0}]   ;;  %s3360_s9 = inlined_call_operand.vmem [shape: bf16[2,8,8,128], index: 9, kind: output, shape index: {1}]   ;;  %s3361_s10 = inlined_call_operand.vmem [shape: f32[2,2,128], index: 10, kind: output, shape index: {2}]  }
   0x1 LB: > { %s1913_s14 = sadd.s32 4294967295, %s2070_s13   ;;  %p1917_p0 = scmp.ge.s32.totalorder %s2070_s13, 1  ;;  %s2070_s13 = sphi %s2135_s13, %s21_s13  }
   0x2   : > { %p347_p1 = scmp.lt.s32.totalorder %s2070_s13, 3 }
   0x4   : > { %p348_p2 = pnand %p1917_p0, %p347_p1 }
   0x6   : > { %351 = sbr.rel (%p348_p2) target bundleno = 538 (0x21a), region = 52 }
   0xd   : > { %p409_p3 = scmp.lt.s32.totalorder %s1913_s14, 1  ;;  %v2149_v0 = vld [vmem:[%s3355_s4] ss:$0 sm:$0xff]  ;;  %s2073_s16 = smov 16   ;;  %vm948_vm12 = vcmask 1046528  }
   0xe   : > { %v2168_v7 = vld [vmem:[%s3356_s5] ss:$0 sm:$0xff]  ;;  %s2074_s17 = smov 4   ;;  %s2075_s18 = smov 24  }
   0xf   : > { %s3511_s14 = smov (!%p409_p3, %s1913_s14), 1  ;;  %s2076_s19 = smov 20  }
  0x10   : > { %s1947_s15 = sshll.u32 %s3511_s14, 6  ;;  %s2041_s26 = smul.u32 72, %s3511_s14 }
  0x11   : > { %s2154_s20 = scalar_lea.vmem %s3353_s2, %s1947_s15  ;;  %s2159_s23 = scalar_lea.vmem %s3354_s3, %s1947_s15 }
  0x12   : > { %v678_v1 = vld [vmem:[%s2154_s20 + $0x10] ss:$8 sps:$4 sm:$0xff]   ;;  %v674_v2 = vld [vmem:[%s2154_s20] ss:$8 sps:$4 sm:$0xff]   ;;  %s2215_s29 = scalar_lea.vmem %s3352_s1, %s2041_s26  ;;  %s2220_s12 = scalar_lea.vmem %s3351_s0, %s2041_s26 }
  0x13   : > { %v804_v3 = vld [vmem:[%s2159_s23 + $0x10] ss:$8 sps:$4 sm:$0xff]   ;;  %v694_v4 = vunpack.c.l.bf16 %v678_v1  ;;  %v696_v5 = vunpack.c.h.bf16 %v678_v1  ;;  %v802_v6 = vld [vmem:[%s2159_s23] ss:$8 sps:$4 sm:$0xff]   ;;  %v690_v8 = vunpack.c.l.bf16 %v674_v2  ;;  %v692_v9 = vunpack.c.h.bf16 %v674_v2  ;;  %s2072_s15 = smov 12   ;;  %s2077_s21 = smov 8  }
  0x14   : > { %v2170_v10 = vunpack.c.l.bf16 %v804_v3  ;;  %v2180_v15 = vunpack.c.h.bf16 %v804_v3  ;;  %v2182_v16 = vunpack.c.l.bf16 %v802_v6  ;;  %v2196_v26 = vunpack.c.h.bf16 %v802_v6  ;;  %v602_v45 = vld [vmem:[%s2215_s29] ss:$8 sps:$4 sm:$0xff]   ;;  %v604_v1 = vld [vmem:[%s2215_s29 + $0x10] ss:$8 sps:$4 sm:$0xff]   ;;  %s2078_s27 = smov 28   ;;  %s2079_s28 = smov 32  }
  0x15   : > { %vm710_vm0 = vcmp.le.f32.partialorder %v694_v4, -5e+29  ;;  %vm712_vm1 = vcmp.le.f32.partialorder %v696_v5, -5e+29  ;;  %v742_v11 = vmul.f32 %v2149_v0, %v694_v4  ;;  %v744_v12 = vmul.f32 %v2149_v0, %v696_v5  ;;  %v452_v46 = vld [vmem:[%s2220_s12 + $0x18] ss:$8 sps:$4 sm:$0xff]  }
  0x16   : > { %v2175_v13 = vsel %vm712_vm1, 0.0, %v696_v5  ;;  %v2178_v14 = vsel %vm710_vm0, 0.0, %v694_v4  ;;  %vm706_vm2 = vcmp.le.f32.partialorder %v690_v8, -5e+29  ;;  %vm708_vm3 = vcmp.le.f32.partialorder %v692_v9, -5e+29 }
  0x17   : > { %v758_v17 = vadd.f32 %v2168_v7, %v742_v11  ;;  %v760_v18 = vadd.f32 %v2168_v7, %v744_v12  ;;  %v2188_v19 = vsel %vm708_vm3, 0.0, %v692_v9  ;;  %v738_v20 = vmul.f32 %v2149_v0, %v690_v8  ;;  %v679_v11 = vld [vmem:[%s2154_s20 + $0x14] sm:$0x1] }
  0x18   : > { %v740_v21 = vmul.f32 %v2149_v0, %v692_v9  ;;  %v2193_v22 = vsel %vm706_vm2, 0.0, %v690_v8  ;;  %v836_v33 = vmul.f32 %v2149_v0, %v2170_v10  ;;  %v837_v34 = vmul.f32 %v2149_v0, %v2180_v15 }
  0x19   : > { %v774_v23 = vmax.f32 %v758_v17, 0.0  ;;  %v776_v24 = vmax.f32 %v760_v18, 0.0  ;;  %v754_v28 = vadd.f32 %v2168_v7, %v738_v20  ;;  %vm3370_vm4 = vcmp.le.f32.partialorder %v2170_v10, -5e+29 }
  0x1a   : > { %v756_v29 = vadd.f32 %v2168_v7, %v740_v21  ;;  %vm3367_vm5 = vcmp.le.f32.partialorder %v2180_v15, -5e+29  ;;  %v844_v39 = vadd.f32 %v2168_v7, %v836_v33  ;;  %v845_v40 = vadd.f32 %v2168_v7, %v837_v34  ;;  %v681_v34 = vld [vmem:[%s2154_s20 + $0x1c] sm:$0x1] }
  0x1b   : > { %v2203_v31 = vsel %vm710_vm0, 0.0, %v774_v23  ;;  %v2206_v32 = vsel %vm712_vm1, 0.0, %v776_v24  ;;  %v770_v36 = vmax.f32 %v754_v28, 0.0  ;;  %v834_v43 = vmul.f32 %v2149_v0, %v2182_v16 }
  0x1c   : > { %v1104_v35 = vpack.c.bf16 %v2206_v32, %v2203_v31  ;;  %v1271_v37 = vrot.slane %v2203_v31, 1  ;;  %v772_v38 = vmax.f32 %v756_v29, 0.0  ;;  %v1274_v41 = vrot.slane %v2206_v32, 1 }
  0x1d   : > { %v2232_v42 = vsel %vm706_vm2, 0.0, %v770_v36  ;;  %v835_v44 = vmul.f32 %v2149_v0, %v2196_v26  ;;  %v852_v48 = vmax.f32 %v844_v39, 0.0  ;;  %v853_v49 = vmax.f32 %v845_v40, 0.0 }
  0x1e   : > { %1113 = vrot.lane.b32.xlu1 %v1104_v35, %s2072_s15  ;;  %v2241_v47 = vsel %vm708_vm3, 0.0, %v772_v38  ;;  %vm818_vm6 = vcmp.le.f32.partialorder %v2182_v16, -5e+29  ;;  %vm3371_vm7 = vcmp.le.f32.partialorder %v2196_v26, -5e+29  ;;  %v842_v51 = vadd.f32 %v2168_v7, %v834_v43 }
  0x1f   : > { %v1103_v50 = vpack.c.bf16 %v2241_v47, %v2232_v42  ;;  %v843_v52 = vadd.f32 %v2168_v7, %v835_v44  ;;  %v860_v53 = vsel %vm3370_vm4, 0.0, %v852_v48  ;;  %v861_v54 = vsel %vm3367_vm5, 0.0, %v853_v49 }
  0x20   : > { %v2253_v55 = vunpack.c.l.bf16 %v602_v45  ;;  %v2255_v56 = vunpack.c.h.bf16 %v602_v45  ;;  %v1153_v57 = vpack.c.bf16 %v861_v54, %v860_v53  ;;  %v850_v58 = vmax.f32 %v842_v51, 0.0  ;;  %v2316_v51 = vld [vmem:[%s2220_s12] ss:$40 sps:$4 sm:$0xff]  }
  0x21   : > { %1111 = vrot.lane.b32.xlu0 %v1103_v50, %s2072_s15  ;;  %v851_v59 = vmax.f32 %v843_v52, 0.0  ;;  %v470_v60 = vunpack.c.l.bf16 %v452_v46  ;;  %v1265_v61 = vrot.slane %v2232_v42, 1  ;;  %v2270_v4 = vunpack.c.h.bf16 %v452_v46  ;;  %v448_v46 = vld [vmem:[%s2220_s12 + $0x8] ss:$8 sps:$4 sm:$0xff]  }
  0x22   : > { %vm620_vm8 = vcmp.le.f32.partialorder %v2253_v55, -5e+29  ;;  %v638_v62 = vmul.f32 %v2149_v0, %v2253_v55  ;;  %v639_v63 = vmul.f32 %v2149_v0, %v2255_v56  ;;  %1162 = vrot.lane.b32.xlu1 %v1153_v57, %s2073_s16  ;;  %v858_v2 = vsel %vm818_vm6, 0.0, %v850_v58  ;;  %v447_v57 = vld [vmem:[%s2220_s12 + $0x4] sm:$0x1] }
  0x23   : > { %v859_v3 = vsel %vm3371_vm7, 0.0, %v851_v59  ;;  %3426 = vst [vmem:[#allocation4_spill] sm:$0xff] %v2270_v4  ;;  %vm488_vm9 = vcmp.le.f32.partialorder %v470_v60, -5e+29  ;;  %v530_v9 = vmul.f32 %v2149_v0, %v470_v60  ;;  %vm621_vm10 = vcmp.le.f32.partialorder %v2255_v56, -5e+29 }
  0x24   : > { %v1152_v5 = vpack.c.bf16 %v859_v3, %v858_v2  ;;  %v647_v6 = vadd.f32 %v2168_v7, %v638_v62  ;;  %v648_v8 = vadd.f32 %v2168_v7, %v639_v63  ;;  %v532_v12 = vmul.f32 %v2149_v0, %v2270_v4 }
  0x25   : > { %v2280_v17 = vsel %vm488_vm9, 0.0, %v470_v60  ;;  %v2282_v18 = vunpack.c.l.bf16 %v604_v1  ;;  %v554_v23 = vadd.f32 %v2168_v7, %v530_v9  ;;  %v2286_v24 = vunpack.c.h.bf16 %v604_v1 }
  0x26   : > { %1160 = vrot.lane.b32.xlu0 %v1152_v5, %s2073_s16  ;;  %v656_v20 = vmax.f32 %v647_v6, 0.0  ;;  %v657_v21 = vmax.f32 %v648_v8, 0.0  ;;  %v1268_v28 = vrot.slane %v2241_v47, 1  ;;  %v556_v29 = vadd.f32 %v2168_v7, %v532_v12  ;;  %v449_v12 = vld [vmem:[%s2220_s12 + $0xc] sm:$0x1] }
  0x27   : > { %v640_v33 = vmul.f32 %v2149_v0, %v2282_v18  ;;  %v2293_v35 = vunpack.c.l.bf16 %v679_v11  ;;  %vm3362_vm11 = vcmp.le.f32.partialorder %v2270_v4, -5e+29  ;;  %v572_v39 = vmax.f32 %v554_v23, 0.0 }
  0x28   : > { %v665_v36 = vsel %vm620_vm8, 0.0, %v656_v20  ;;  %v2299_v38 = vsel %vm621_vm10, 0.0, %v657_v21  ;;  %v574_v43 = vmax.f32 %v556_v29, 0.0  ;;  %v641_v44 = vmul.f32 %v2149_v0, %v2286_v24 }
  0x29   : > { %v908_v40 = vpack.c.bf16 %v2299_v38, %v665_v36  ;;  %v649_v45 = vadd.f32 %v2168_v7, %v640_v33  ;;  %v2308_v48 = vsel %vm488_vm9, 0.0, %v572_v39  ;;  %vm622_vm13 = vcmp.le.f32.partialorder %v2282_v18, -5e+29 }
  0x2a   : > { %3427 = vst [vmem:[#allocation5_spill] sm:$0xff] %v2308_v48  ;;  %v2311_v49 = vunpack.c.l.bf16 %v681_v34  ;;  %v743_v50 = vmul.f32 %v2149_v0, %v2293_v35  ;;  %v2321_v52 = vsel %vm3362_vm11, 0.0, %v574_v43  ;;  %vm623_vm14 = vcmp.le.f32.partialorder %v2286_v24, -5e+29 }
  0x2b   : > { %916 = vrot.lane.b32.xlu0 %v908_v40, %s2074_s17  ;;  %3428 = vst [vmem:[#allocation6_spill] sm:$0xff] %v2321_v52  ;;  %v650_v53 = vadd.f32 %v2168_v7, %v641_v44  ;;  %v658_v54 = vmax.f32 %v649_v45, 0.0  ;;  %v1347_v58 = vpack.c.bf16 %v2321_v52, %v2308_v48  ;;  %vm3364_vm15 = vcmp.le.f32.partialorder %v2293_v35, -5e+29 }
  0x2c   : > { %vm3363_vm0 = vcmp.le.f32.partialorder %v2311_v49, -5e+29  ;;  %v745_v59 = vmul.f32 %v2149_v0, %v2311_v49  ;;  %v759_v63 = vadd.f32 %v2168_v7, %v743_v50  ;;  %v466_v1 = vunpack.c.l.bf16 %v448_v46 }
  0x2d   : > { %v659_v60 = vmax.f32 %v650_v53, 0.0  ;;  %v2334_v62 = vsel %vm622_vm13, 0.0, %v658_v54  ;;  %1356 = vrot.lane.b32.xlu1 %v1347_v58, %s2075_s18  ;;  %v468_v3 = vunpack.c.h.bf16 %v448_v46  ;;  %v2340_v5 = vunpack.c.l.bf16 %v2316_v51 }
  0x2e   : > { %v761_v2 = vadd.f32 %v2168_v7, %v745_v59  ;;  %v2342_v6 = vunpack.c.l.bf16 %v447_v57  ;;  %v775_v9 = vmax.f32 %v759_v63, 0.0  ;;  %vm484_vm1 = vcmp.le.f32.partialorder %v466_v1, -5e+29  ;;  %v675_v59 = vld [vmem:[%s2154_s20 + $0x4] sm:$0x1] }
  0x2f   : > { %v2346_v8 = vsel %vm623_vm14, 0.0, %v659_v60  ;;  %v526_v11 = vmul.f32 %v2149_v0, %v466_v1  ;;  %vm486_vm2 = vcmp.le.f32.partialorder %v468_v3, -5e+29  ;;  %v528_v23 = vmul.f32 %v2149_v0, %v468_v3 }
  0x30   : > { %v909_v20 = vpack.c.bf16 %v2346_v8, %v2334_v62  ;;  %v777_v21 = vmax.f32 %v761_v2, 0.0  ;;  %v791_v29 = vsel %vm3364_vm15, 0.0, %v775_v9  ;;  %v2356_v33 = vsel %vm486_vm2, 0.0, %v468_v3  ;;  %v677_v2 = vld [vmem:[%s2154_s20 + $0xc] sm:$0x1] }
  0x31   : > { %v550_v34 = vadd.f32 %v2168_v7, %v526_v11  ;;  %v2360_v36 = vsel %vm484_vm1, 0.0, %v466_v1  ;;  %v1272_v40 = vrot.slane %v791_v29, 1  ;;  %v552_v43 = vadd.f32 %v2168_v7, %v528_v23  ;;  %v451_v9 = vld [vmem:[%s2220_s12 + $0x14] sm:$0x1] }
  0x32   : > { %918 = vrot.lane.b32.xlu0 %v909_v20, %s2074_s17  ;;  %v793_v39 = vsel %vm3363_vm0, 0.0, %v777_v21  ;;  %v2366_v44 = vunpack.c.l.bf16 %v449_v12  ;;  %v1034_v45 = vrot.slane %v2321_v52, 1  ;;  %v1031_v46 = vrot.slane %v2308_v48, 1 }
  0x33   : > { %v1275_v50 = vrot.slane %v793_v39, 1  ;;  %v568_v53 = vmax.f32 %v550_v34, 0.0  ;;  %v1273_v54 = vsel %vm948_vm12, %v1271_v37, %v1272_v40  ;;  %v570_v57 = vmax.f32 %v552_v43, 0.0 }
  0x34   : > { %vm482_vm3 = vcmp.le.f32.partialorder %v2340_v5, -5e+29  ;;  %v524_v58 = vmul.f32 %v2149_v0, %v2340_v5  ;;  %v525_v31 = vmul.f32 %v2149_v0, %v2342_v6  ;;  %v527_v37 = vmul.f32 %v2149_v0, %v2366_v44 }
  0x35   : > { %v1276_v60 = vsel %vm948_vm12, %v1274_v41, %v1275_v50  ;;  %v2381_v63 = vsel %vm484_vm1, 0.0, %v568_v53  ;;  %v2390_v12 = vsel %vm486_vm2, 0.0, %v570_v57  ;;  %vm483_vm9 = vcmp.le.f32.partialorder %v2342_v6, -5e+29  ;;  %v453_v41 = vld [vmem:[%s2220_s12 + $0x1c] sm:$0x1] }
  0x36   : > { %3429 = vst [vmem:[#allocation7_spill] sm:$0xff] %v2381_v63  ;;  %v1298_v11 = vpack.c.bf16 %v1276_v60, %v1273_v54  ;;  %3430 = vst [vmem:[#allocation8_spill] sm:$0xff] %v2390_v12  ;;  %v548_v32 = vadd.f32 %v2168_v7, %v524_v58  ;;  %v1346_v1 = vpack.c.bf16 %v2390_v12, %v2381_v63  ;;  %vm485_vm1 = vcmp.le.f32.partialorder %v2366_v44, -5e+29 }
  0x37   : > { %v549_v20 = vadd.f32 %v2168_v7, %v525_v31  ;;  %v551_v21 = vadd.f32 %v2168_v7, %v527_v37  ;;  %v1025_v3 = vrot.slane %v2381_v63, 1  ;;  %v2402_v29 = vunpack.c.l.bf16 %v675_v59  ;;  %v606_v37 = vld [vmem:[%s2215_s29 + $0x20] ss:$8 sps:$4 sm:$0xff]  }
  0x38   : > { %1307 = vrot.lane.b32.xlu1 %v1298_v11, %s2076_s19  ;;  %v566_v23 = vmax.f32 %v548_v32, 0.0  ;;  %v2404_v34 = vunpack.c.l.bf16 %v677_v2  ;;  %1354 = vrot.lane.b32.xlu0 %v1346_v1, %s2075_s18  ;;  %v2407_v43 = vunpack.c.l.bf16 %v451_v9  ;;  %v2409_v50 = vunpack.c.l.bf16 %v453_v41 }
  0x39   : > { %v567_v39 = vmax.f32 %v549_v20, 0.0  ;;  %v569_v40 = vmax.f32 %v551_v21, 0.0  ;;  %v1028_v53 = vrot.slane %v2390_v12, 1  ;;  %vm3365_vm2 = vcmp.le.f32.partialorder %v2402_v29, -5e+29 }
  0x3a   : > { %v2414_v54 = vsel %vm482_vm3, 0.0, %v566_v23  ;;  %v739_v57 = vmul.f32 %v2149_v0, %v2402_v29  ;;  %v741_v31 = vmul.f32 %v2149_v0, %v2404_v34  ;;  %vm3366_vm11 = vcmp.le.f32.partialorder %v2404_v34, -5e+29 }
  0x3b   : > { %3431 = vst [vmem:[#allocation9_spill] sm:$0xff] %v2414_v54  ;;  %v585_v58 = vsel %vm483_vm9, 0.0, %v567_v39  ;;  %v587_v59 = vsel %vm485_vm1, 0.0, %v569_v40  ;;  %v1022_v60 = vrot.slane %v2414_v54, 1  ;;  %vm487_vm0 = vcmp.le.f32.partialorder %v2407_v43, -5e+29 }
  0x3c   : > { %v1023_v2 = vrot.slane %v585_v58, 1  ;;  %v1026_v9 = vrot.slane %v587_v59, 1  ;;  %v755_v11 = vadd.f32 %v2168_v7, %v739_v57  ;;  %v757_v32 = vadd.f32 %v2168_v7, %v741_v31 }
  0x3d   : > { %v529_v41 = vmul.f32 %v2149_v0, %v2407_v43  ;;  %v531_v1 = vmul.f32 %v2149_v0, %v2409_v50  ;;  %v2439_v39 = vunpack.c.l.bf16 %v606_v37  ;;  %vm489_vm15 = vcmp.le.f32.partialorder %v2409_v50, -5e+29 }
  0x3e   : > { %v1024_v20 = vsel %vm948_vm12, %v1022_v60, %v1023_v2  ;;  %v2437_v21 = vsel %vm948_vm12, %v1025_v3, %v1026_v9  ;;  %v771_v23 = vmax.f32 %v755_v11, 0.0  ;;  %v773_v57 = vmax.f32 %v757_v32, 0.0  ;;  %v455_v2 = vld [vmem:[%s2220_s12 + $0x24] sm:$0x1] }
  0x3f   : > { %3432 = vst [vmem:[#allocation10_spill] sm:$0xff] %v2439_v39  ;;  %v1054_v40 = vpack.c.bf16 %v2437_v21, %v1024_v20  ;;  %v553_v58 = vadd.f32 %v2168_v7, %v529_v41  ;;  %v555_v59 = vadd.f32 %v2168_v7, %v531_v1  ;;  %v642_v60 = vmul.f32 %v2149_v0, %v2439_v39 }
  0x40   : > { %v787_v31 = vsel %vm3365_vm2, 0.0, %v771_v23  ;;  %v2449_v3 = vunpack.c.h.bf16 %v606_v37  ;;  %v789_v9 = vsel %vm3366_vm11, 0.0, %v773_v57  ;;  %vm3368_vm2 = vcmp.le.f32.partialorder %v2439_v39, -5e+29  ;;  %v2058_v23 = vld [vmem:[%s3357_s6] sm:$0xff]  }
  0x41   : > { %1062 = vrot.lane.b32.xlu1 %v1054_v40, %s2077_s21  ;;  %v1266_v11 = vrot.slane %v787_v31, 1  ;;  %v571_v32 = vmax.f32 %v553_v58, 0.0  ;;  %v573_v41 = vmax.f32 %v555_v59, 0.0  ;;  %v1269_v1 = vrot.slane %v789_v9, 1  ;;  %v608_v31 = vld [vmem:[%s2215_s29 + $0x30] ss:$8 sps:$4 sm:$0xff]   ;;  %2011 = vmatprep.subr.bf16.mxu0 %v2058_v23 }
  0x42   : > { %3433 = vst [vmem:[#allocation11_spill] sm:$0xff] %v2449_v3  ;;  %v651_v20 = vadd.f32 %v2168_v7, %v642_v60  ;;  %v643_v37 = vmul.f32 %v2149_v0, %v2449_v3  ;;  %v2469_v59 = vunpack.c.l.bf16 %v455_v2  ;;  %vm3369_vm11 = vcmp.le.f32.partialorder %v2449_v3, -5e+29  ;;  %2012 = vmatpush3.bf16.msra.mxu0 %v2058_v23  ;;  %v462_v3 = vld [vmem:[%s2220_s12 + $0x40] sm:$0xf] }
  0x43   : > { %v1267_v40 = vsel %vm948_vm12, %v1265_v61, %v1266_v11  ;;  %v589_v57 = vsel %vm487_vm0, 0.0, %v571_v32  ;;  %v591_v58 = vsel %vm489_vm15, 0.0, %v573_v41  ;;  %v1270_v60 = vsel %vm948_vm12, %v1268_v28, %v1269_v1  ;;  %v457_v41 = vld [vmem:[%s2220_s12 + $0x2c] sm:$0x1] }
  0x44   : > { %3434 = vst [vmem:[#allocation12_spill] sm:$0xff] %v2469_v59  ;;  %v1029_v9 = vrot.slane %v589_v57, 1  ;;  %v1032_v25 = vrot.slane %v591_v58, 1  ;;  %v660_v27 = vmax.f32 %v651_v20, 0.0  ;;  %v1297_v42 = vpack.c.bf16 %v1270_v60, %v1267_v40  ;;  %v2059_v1 = vld [vmem:[%s3357_s6 + $0x8] sm:$0xff]  }
  0x45   : > { %v652_v61 = vadd.f32 %v2168_v7, %v643_v37  ;;  %v533_v2 = vmul.f32 %v2149_v0, %v2469_v59  ;;  %v2487_v32 = vunpack.c.l.bf16 %v608_v31  ;;  %vm3372_vm5 = vcmp.le.f32.partialorder %v2469_v59, -5e+29  ;;  %2013 = vmatprep.subr.bf16.mxu0 %v2059_v1 }
  0x46   : > { %v1030_v11 = vsel %vm948_vm12, %v1028_v53, %v1029_v9  ;;  %v2483_v47 = vsel %vm948_vm12, %v1031_v46, %v1032_v25  ;;  %v669_v28 = vsel %vm3368_vm2, 0.0, %v660_v27  ;;  %1305 = vrot.lane.b32.xlu0 %v1297_v42, %s2076_s19  ;;  %v1395_v53 = vpack.c.bf16 %v2334_v62, %v2299_v38  ;;  %v458_v25 = vld [vmem:[%s2220_s12 + $0x30] ss:$8 sps:$4 sm:$0xff]   ;;  %2014 = vmatpush3.bf16.msra.mxu0 %v2059_v1  ;;  %v459_v42 = vld [vmem:[%s2220_s12 + $0x34] sm:$0x1] }
  0x47   : > { %3435 = vst [vmem:[#allocation13_spill] sm:$0xff] %v2487_v32  ;;  %v1055_v20 = vpack.c.bf16 %v2483_v47, %v1030_v11  ;;  %v661_v37 = vmax.f32 %v652_v61, 0.0  ;;  %v1396_v27 = vpack.c.bf16 %v669_v28, %v2346_v8  ;;  %v557_v46 = vadd.f32 %v2168_v7, %v533_v2 }
  0x48   : > { %v2501_v23 = vunpack.c.h.bf16 %v608_v31  ;;  %v644_v40 = vmul.f32 %v2149_v0, %v2487_v32  ;;  %v1456_v57 = vpack.c.bf16 %v1030_v11, %v2437_v21  ;;  %v2512_v62 = vunpack.c.h.bf16 %v2316_v51 }
  0x49   : > { %1064 = vrot.lane.b32.xlu1 %v1055_v20, %s2077_s21  ;;  %v2509_v38 = vsel %vm3369_vm11, 0.0, %v661_v37  ;;  %v2514_v8 = vunpack.c.l.bf16 %v457_v41  ;;  %v575_v58 = vmax.f32 %v557_v46, 0.0  ;;  %vm3373_vm2 = vcmp.le.f32.partialorder %v2487_v32, -5e+29  ;;  %v461_v41 = vld [vmem:[%s2220_s12 + $0x3c] sm:$0x1] }
  0x4a   : > { %3436 = vst [vmem:[#allocation14_spill] sm:$0xff] %v2501_v23  ;;  %3437 = vst [vmem:[#allocation15_spill] sm:$0xff] %v2512_v62  ;;  %v645_v31 = vmul.f32 %v2149_v0, %v2501_v23  ;;  %v2519_v60 = vunpack.c.l.bf16 %v458_v25  ;;  %1403 = vrot.lane.b32.xlu0 %v1395_v53, %s2078_s27  ;;  %v910_v21 = vpack.c.bf16 %v2509_v38, %v669_v28  ;;  %vm3422_vm11 = vcmp.le.f32.partialorder %v2501_v23, -5e+29 }
  0x4b   : > { %3438 = vst [vmem:[#allocation16_spill] sm:$0xff] %v2514_v8  ;;  %v653_v51 = vadd.f32 %v2168_v7, %v644_v40  ;;  %v534_v9 = vmul.f32 %v2149_v0, %v2512_v62  ;;  %v593_v61 = vsel %vm3372_vm5, 0.0, %v575_v58  ;;  %vm3375_vm4 = vcmp.le.f32.partialorder %v2512_v62, -5e+29 }
  0x4c   : > { %3439 = vst [vmem:[#allocation17_spill] sm:$0xff] %v2519_v60  ;;  %v654_v2 = vadd.f32 %v2168_v7, %v645_v31  ;;  %v535_v11 = vmul.f32 %v2149_v0, %v2514_v8  ;;  %v1035_v28 = vrot.slane %v593_v61, 1  ;;  %vm3374_vm7 = vcmp.le.f32.partialorder %v2514_v8, -5e+29 }
  0x4d   : > { %1405 = vrot.lane.b32.xlu1 %v1396_v27, %s2078_s27  ;;  %v662_v1 = vmax.f32 %v653_v51, 0.0  ;;  %v558_v20 = vadd.f32 %v2168_v7, %v534_v9  ;;  %v2539_v46 = vunpack.c.l.bf16 %v459_v42  ;;  %v2541_v40 = vunpack.c.h.bf16 %v458_v25 }
  0x4e   : > { %v663_v53 = vmax.f32 %v654_v2, 0.0  ;;  %v559_v37 = vadd.f32 %v2168_v7, %v535_v11  ;;  %1464 = vrot.lane.b32.xlu0 %v1456_v57, %s2079_s28  ;;  %v1036_v27 = vsel %vm948_vm12, %v1034_v45, %v1035_v28  ;;  %v2551_v51 = vunpack.c.l.bf16 %v461_v41  ;;  %v682_v57 = vld [vmem:[%s2154_s20 + $0x20] ss:$8 sps:$4 sm:$0xff]  }
  0x4f   : > { %3440 = vst [vmem:[#allocation18_spill] sm:$0xff] %v2539_v46  ;;  %3441 = vst [vmem:[#allocation19_spill] sm:$0xff] %v2541_v40  ;;  %v2549_v58 = vsel %vm3373_vm2, 0.0, %v662_v1  ;;  %v576_v31 = vmax.f32 %v558_v20, 0.0  ;;  %v1457_v9 = vpack.c.bf16 %v1036_v27, %v2483_v47  ;;  %vm3390_vm5 = vcmp.le.f32.partialorder %v2519_v60, -5e+29 }
  0x50   : > { %3442 = vst [vmem:[#allocation20_spill] sm:$0xff] %v2551_v51  ;;  %v2556_v25 = vsel %vm3422_vm11, 0.0, %v663_v53  ;;  %v577_v42 = vmax.f32 %v559_v37, 0.0  ;;  %vm3380_vm2 = vcmp.le.f32.partialorder %v2539_v46, -5e+29  ;;  %v536_v47 = vmul.f32 %v2149_v0, %v2519_v60 }
  0x51   : > { %920 = vrot.lane.b32.xlu1 %v910_v21, %s2074_s17  ;;  %v911_v45 = vpack.c.bf16 %v2556_v25, %v2549_v58  ;;  %v2565_v61 = vsel %vm3375_vm4, 0.0, %v576_v31  ;;  %v537_v21 = vmul.f32 %v2149_v0, %v2539_v46  ;;  %v538_v41 = vmul.f32 %v2149_v0, %v2541_v40  ;;  %v686_v37 = vld [vmem:[%s2154_s20 + $0x30] ss:$8 sps:$4 sm:$0xff]   ;;  %v683_v46 = vld [vmem:[%s2154_s20 + $0x24] sm:$0x1] }
  0x52   : > { %v595_v2 = vsel %vm3374_vm7, 0.0, %v577_v42  ;;  %v1037_v11 = vrot.slane %v2565_v61, 1  ;;  %1466 = vrot.lane.b32.xlu0 %v1457_v9, %s2079_s28  ;;  %v539_v1 = vmul.f32 %v2149_v0, %v2551_v51  ;;  %v560_v20 = vadd.f32 %v2168_v7, %v536_v47 }
  0x53   : > { %v1038_v28 = vrot.slane %v595_v2, 1  ;;  %v2581_v53 = vunpack.c.l.bf16 %v682_v57  ;;  %vm3381_vm7 = vcmp.le.f32.partialorder %v2541_v40, -5e+29  ;;  %v561_v31 = vadd.f32 %v2168_v7, %v537_v21  ;;  %v808_v40 = vld [vmem:[%s2159_s23 + $0x30] ss:$8 sps:$4 sm:$0xff]  }
  0x54   : > { %v562_v42 = vadd.f32 %v2168_v7, %v538_v41  ;;  %v2587_v30 = vunpack.c.h.bf16 %v682_v57  ;;  %vm3389_vm4 = vcmp.le.f32.partialorder %v2551_v51, -5e+29  ;;  %v563_v47 = vadd.f32 %v2168_v7, %v539_v1 }
  0x55   : > { %3443 = vst [vmem:[#allocation21_spill] sm:$0xff] %v2581_v53  ;;  %922 = vrot.lane.b32.xlu1 %v911_v45, %s2074_s17  ;;  %v2591_v9 = vsel %vm948_vm12, %v1037_v11, %v1038_v28  ;;  %v578_v2 = vmax.f32 %v560_v20, 0.0  ;;  %v579_v48 = vmax.f32 %v561_v31, 0.0  ;;  %v2596_v21 = vunpack.c.l.bf16 %v686_v37 }
  0x56   : > { %3444 = vst [vmem:[#allocation22_spill] sm:$0xff] %v2587_v30  ;;  %v1056_v52 = vpack.c.bf16 %v2591_v9, %v1036_v27  ;;  %v580_v12 = vmax.f32 %v562_v42, 0.0  ;;  %v581_v41 = vmax.f32 %v563_v47, 0.0  ;;  %v746_v45 = vmul.f32 %v2149_v0, %v2581_v53 }
  0x57   : > { %3445 = vst [vmem:[#allocation23_spill] sm:$0xff] %v2596_v21  ;;  %v2600_v57 = vsel %vm3390_vm5, 0.0, %v578_v2  ;;  %v748_v11 = vmul.f32 %v2149_v0, %v2587_v30  ;;  %v597_v27 = vsel %vm3380_vm2, 0.0, %v579_v48  ;;  %v2614_v20 = vunpack.c.h.bf16 %v686_v37  ;;  %v806_v2 = vld [vmem:[%s2159_s23 + $0x20] ss:$8 sps:$4 sm:$0xff]  }
  0x58   : > { %1066 = vrot.lane.b32.xlu0 %v1056_v52, %s2077_s21  ;;  %v2611_v28 = vsel %vm3381_vm7, 0.0, %v580_v12  ;;  %v1040_v1 = vrot.slane %v2600_v57, 1  ;;  %v599_v31 = vsel %vm3389_vm4, 0.0, %v581_v41  ;;  %v1041_v42 = vrot.slane %v597_v27, 1 }
  0x59   : > { %3446 = vst [vmem:[#allocation24_spill] sm:$0xff] %v2614_v20  ;;  %v1043_v47 = vrot.slane %v2611_v28, 1  ;;  %v762_v52 = vadd.f32 %v2168_v7, %v746_v45  ;;  %v1044_v63 = vrot.slane %v599_v31, 1  ;;  %vm3398_vm2 = vcmp.le.f32.partialorder %v2581_v53, -5e+29 }
  0x5a   : > { %vm3397_vm7 = vcmp.le.f32.partialorder %v2587_v30, -5e+29  ;;  %v764_v48 = vadd.f32 %v2168_v7, %v748_v11  ;;  %v2625_v12 = vsel %vm948_vm12, %v1040_v1, %v1041_v42  ;;  %v750_v41 = vmul.f32 %v2149_v0, %v2596_v21 }
  0x5b   : > { %v778_v37 = vmax.f32 %v762_v52, 0.0  ;;  %v752_v45 = vmul.f32 %v2149_v0, %v2614_v20  ;;  %v2632_v27 = vsel %vm948_vm12, %v1043_v47, %v1044_v63  ;;  %v2634_v54 = vunpack.c.l.bf16 %v806_v2  ;;  %v685_v63 = vld [vmem:[%s2154_s20 + $0x2c] sm:$0x1] }
  0x5c   : > { %v780_v31 = vmax.f32 %v764_v48, 0.0  ;;  %v2636_v51 = vunpack.c.h.bf16 %v806_v2  ;;  %v1057_v11 = vpack.c.bf16 %v2632_v27, %v2625_v12  ;;  %v766_v42 = vadd.f32 %v2168_v7, %v750_v41 }
  0x5d   : > { %v2643_v1 = vsel %vm3398_vm2, 0.0, %v778_v37  ;;  %v768_v52 = vadd.f32 %v2168_v7, %v752_v45  ;;  %vm3404_vm4 = vcmp.le.f32.partialorder %v2596_v21, -5e+29  ;;  %vm3403_vm5 = vcmp.le.f32.partialorder %v2614_v20, -5e+29 }
  0x5e   : > { %v2652_v2 = vsel %vm3397_vm7, 0.0, %v780_v31  ;;  %1068 = vrot.lane.b32.xlu1 %v1057_v11, %s2077_s21  ;;  %v782_v41 = vmax.f32 %v766_v42, 0.0  ;;  %v838_v47 = vmul.f32 %v2149_v0, %v2634_v54  ;;  %v839_v31 = vmul.f32 %v2149_v0, %v2636_v51  ;;  %v689_v20 = vld [vmem:[%s2154_s20 + $0x3c] sm:$0x1] }
  0x5f   : > { %v1105_v48 = vpack.c.bf16 %v2652_v2, %v2643_v1  ;;  %v784_v45 = vmax.f32 %v768_v52, 0.0  ;;  %v2664_v30 = vunpack.c.l.bf16 %v808_v40  ;;  %v2666_v53 = vunpack.c.h.bf16 %v808_v40 }
  0x60   : > { %v2671_v11 = vsel %vm3404_vm4, 0.0, %v782_v41  ;;  %v2677_v52 = vunpack.c.l.bf16 %v683_v46  ;;  %v2679_v37 = vunpack.c.l.bf16 %v685_v63  ;;  %vm3421_vm7 = vcmp.le.f32.partialorder %v2634_v54, -5e+29  ;;  %v687_v63 = vld [vmem:[%s2154_s20 + $0x34] sm:$0x1] }
  0x61   : > { %1115 = vrot.lane.b32.xlu0 %v1105_v48, %s2072_s15  ;;  %v2675_v42 = vsel %vm3403_vm5, 0.0, %v784_v45  ;;  %vm823_vm2 = vcmp.le.f32.partialorder %v2636_v51, -5e+29  ;;  %v846_v40 = vadd.f32 %v2168_v7, %v838_v47  ;;  %v1280_v48 = vrot.slane %v2652_v2, 1 }
  0x62   : > { %v1106_v60 = vpack.c.bf16 %v2675_v42, %v2671_v11  ;;  %v847_v45 = vadd.f32 %v2168_v7, %v839_v31  ;;  %v840_v46 = vmul.f32 %v2149_v0, %v2664_v30  ;;  %vm3424_vm5 = vcmp.le.f32.partialorder %v2664_v30, -5e+29 }
  0x63   : > { %v854_v21 = vmax.f32 %v846_v40, 0.0  ;;  %vm3423_vm4 = vcmp.le.f32.partialorder %v2666_v53, -5e+29  ;;  %v841_v47 = vmul.f32 %v2149_v0, %v2666_v53  ;;  %v747_v31 = vmul.f32 %v2149_v0, %v2677_v52 }
  0x64   : > { %1117 = vrot.lane.b32.xlu1 %v1106_v60, %s2072_s15  ;;  %v855_v2 = vmax.f32 %v847_v45, 0.0  ;;  %v848_v41 = vadd.f32 %v2168_v7, %v840_v46  ;;  %v749_v8 = vmul.f32 %v2149_v0, %v2679_v37  ;;  %v2706_v62 = vunpack.c.l.bf16 %v687_v63 }
  0x65   : > { %v862_v60 = vsel %vm3421_vm7, 0.0, %v854_v21  ;;  %v849_v40 = vadd.f32 %v2168_v7, %v841_v47  ;;  %v2708_v23 = vunpack.c.l.bf16 %v689_v20  ;;  %v763_v46 = vadd.f32 %v2168_v7, %v747_v31 }
  0x66   : > { %v863_v45 = vsel %vm823_vm2, 0.0, %v855_v2  ;;  %v856_v32 = vmax.f32 %v848_v41, 0.0  ;;  %v765_v59 = vadd.f32 %v2168_v7, %v749_v8  ;;  %vm715_vm7 = vcmp.le.f32.partialorder %v2677_v52, -5e+29 }
  0x67   : > { %v1154_v39 = vpack.c.bf16 %v863_v45, %v862_v60  ;;  %v857_v4 = vmax.f32 %v849_v40, 0.0  ;;  %vm3425_vm11 = vcmp.le.f32.partialorder %v2679_v37, -5e+29  ;;  %v779_v20 = vmax.f32 %v763_v46, 0.0  ;;  %v610_v60 = vld [vmem:[%s2215_s29 + $0x40] sm:$0xf] }
  0x68   : > { %v864_v21 = vsel %vm3424_vm5, 0.0, %v856_v32  ;;  %v781_v63 = vmax.f32 %v765_v59, 0.0  ;;  %v751_v41 = vmul.f32 %v2149_v0, %v2706_v62  ;;  %v1286_v47 = vrot.slane %v2675_v42, 1 }
  0x69   : > { %1164 = vrot.lane.b32.xlu0 %v1154_v39, %s2073_s16  ;;  %v865_v8 = vsel %vm3423_vm4, 0.0, %v857_v4  ;;  %v753_v2 = vmul.f32 %v2149_v0, %v2708_v23  ;;  %v2727_v31 = vunpack.c.l.bf16 %v462_v3  ;;  %v795_v59 = vsel %vm715_vm7, 0.0, %v779_v20  ;;  %v463_v20 = vld [vmem:[%s2220_s12 + $0x44] sm:$0x1] }
  0x6a   : > { %v1155_v32 = vpack.c.bf16 %v865_v8, %v864_v21  ;;  %v797_v40 = vsel %vm3425_vm11, 0.0, %v781_v63  ;;  %v767_v42 = vadd.f32 %v2168_v7, %v751_v41  ;;  %v1278_v39 = vrot.slane %v795_v59, 1 }
  0x6b   : > { %v1281_v45 = vrot.slane %v797_v40, 1  ;;  %vm719_vm4 = vcmp.le.f32.partialorder %v2706_v62, -5e+29  ;;  %v769_v4 = vadd.f32 %v2168_v7, %v753_v2  ;;  %vm721_vm5 = vcmp.le.f32.partialorder %v2708_v23, -5e+29 }
  0x6c   : > { %1166 = vrot.lane.b32.xlu1 %v1155_v32, %s2073_s16  ;;  %v783_v3 = vmax.f32 %v767_v42, 0.0  ;;  %v540_v46 = vmul.f32 %v2149_v0, %v2727_v31  ;;  %v2741_v21 = vunpack.c.l.bf16 %v610_v60  ;;  %v3447_v63 = vrot.slane %v2643_v1, 1 }
  0x6d   : > { %v1282_v8 = vsel %vm948_vm12, %v1280_v48, %v1281_v45  ;;  %v785_v59 = vmax.f32 %v769_v4, 0.0  ;;  %v1348_v2 = vpack.c.bf16 %v2600_v57, %v2565_v61  ;;  %vm498_vm11 = vcmp.le.f32.partialorder %v2727_v31, -5e+29 }
  0x6e   : > { %v1279_v41 = vsel %vm948_vm12, %v3447_v63, %v1278_v39  ;;  %v799_v40 = vsel %vm719_vm4, 0.0, %v783_v3  ;;  %v564_v60 = vadd.f32 %v2168_v7, %v540_v46  ;;  %v646_v39 = vmul.f32 %v2149_v0, %v2741_v21 }
  0x6f   : > { %v1299_v32 = vpack.c.bf16 %v1282_v8, %v1279_v41  ;;  %v801_v42 = vsel %vm721_vm5, 0.0, %v785_v59  ;;  %v1284_v1 = vrot.slane %v799_v40, 1  ;;  %v2758_v48 = vunpack.c.l.bf16 %v463_v20 }
  0x70   : > { %v1287_v45 = vrot.slane %v801_v42, 1  ;;  %v582_v4 = vmax.f32 %v564_v60, 0.0  ;;  %v2764_v3 = vsel %vm620_vm8, 0.0, %v2253_v55  ;;  %v2769_v46 = vsel %vm621_vm10, 0.0, %v2255_v56 }
  0x71   : > { %1309 = vrot.lane.b32.xlu0 %v1299_v32, %s2076_s19  ;;  %v3448_v63 = vrot.slane %v2671_v11, 1  ;;  %v1397_v20 = vpack.c.bf16 %v2549_v58, %v2509_v38  ;;  %v655_v8 = vadd.f32 %v2168_v7, %v646_v39  ;;  %v541_v59 = vmul.f32 %v2149_v0, %v2758_v48 }
  0x72   : > { %v1288_v55 = vsel %vm948_vm12, %v1286_v47, %v1287_v45  ;;  %v600_v32 = vsel %vm498_vm11, 0.0, %v582_v4  ;;  %vm628_vm8 = vcmp.le.f32.partialorder %v2741_v21, -5e+29  ;;  %v1458_v56 = vpack.c.bf16 %v2625_v12, %v2591_v9 }
  0x73   : > { %v1285_v41 = vsel %vm948_vm12, %v3448_v63, %v1284_v1  ;;  %v664_v40 = vmax.f32 %v655_v8, 0.0  ;;  %vm499_vm10 = vcmp.le.f32.partialorder %v2758_v48, -5e+29  ;;  %v883_v38 = vpack.c.bf16 %v2769_v46, %v2764_v3 }
  0x74   : > { %v1300_v11 = vpack.c.bf16 %v1288_v55, %v1285_v41  ;;  %v1349_v0 = vpack.c.bf16 %v600_v32, %v2611_v28  ;;  %v565_v58 = vadd.f32 %v2168_v7, %v541_v59  ;;  %v2794_v47 = vsel %vm482_vm3, 0.0, %v2340_v5 }
  0x75   : > { %1358 = vrot.lane.b32.xlu0 %v1348_v2, %s2075_s18  ;;  %v501_v9 = vsel %vm483_vm9, 0.0, %v2342_v6  ;;  %v1452_v12 = vrot.slane %v600_v32, 1  ;;  %v673_v60 = vsel %vm628_vm8, 0.0, %v664_v40  ;;  %v503_v2 = vsel %vm485_vm1, 0.0, %v2366_v44 }
  0x76   : > { %1311 = vrot.lane.b32.xlu1 %v1300_v11, %s2076_s19  ;;  %v949_v7 = vrot.slane %v2794_v47, 1  ;;  %v1398_v42 = vpack.c.bf16 %v673_v60, %v2556_v25  ;;  %v583_v5 = vmax.f32 %v565_v58, 0.0  ;;  %v950_v1 = vrot.slane %v501_v9, 1 }
  0x77   : > { %v952_v39 = vrot.slane %v2360_v36, 1  ;;  %v953_v45 = vrot.slane %v503_v2, 1  ;;  %v505_v6 = vsel %vm487_vm0, 0.0, %v2407_v43  ;;  %v507_v4 = vsel %vm489_vm15, 0.0, %v2409_v50 }
  0x78   : > { %v955_v3 = vrot.slane %v2356_v33, 1  ;;  %v601_v44 = vsel %vm499_vm10, 0.0, %v583_v5  ;;  %v951_v25 = vsel %vm948_vm12, %v949_v7, %v950_v1  ;;  %v956_v63 = vrot.slane %v505_v6, 1 }
  0x79   : > { %1407 = vrot.lane.b32.xlu0 %v1397_v20, %s2078_s27  ;;  %v958_v41 = vrot.slane %v2280_v17, 1  ;;  %v1453_v8 = vrot.slane %v601_v44, 1  ;;  %v2822_v43 = vsel %vm948_vm12, %v952_v39, %v953_v45  ;;  %v959_v59 = vrot.slane %v507_v4, 1  ;;  %v3459_v4 = vld [vmem:[#allocation4_spill] sm:$0xff] }
  0x7a   : > { %1360 = vrot.lane.b32.xlu1 %v1349_v0, %s2075_s18  ;;  %v1078_v50 = vpack.c.bf16 %v2188_v19, %v2193_v22  ;;  %v2829_v20 = vsel %vm622_vm13, 0.0, %v2282_v18  ;;  %v981_v55 = vpack.c.bf16 %v2822_v43, %v951_v25  ;;  %v2833_v32 = vsel %vm948_vm12, %v955_v3, %v956_v63 }
  0x7b   : > { %v1079_v11 = vpack.c.bf16 %v2175_v13, %v2178_v14  ;;  %v1454_v40 = vsel %vm948_vm12, %v1452_v12, %v1453_v8  ;;  %v2841_v0 = vsel %vm623_vm14, 0.0, %v2286_v24  ;;  %v2844_v58 = vsel %vm948_vm12, %v958_v41, %v959_v59  ;;  %v3462_v41 = vld [vmem:[#allocation10_spill] sm:$0xff] }
  0x7c   : > { %v2849_v18 = vsel %vm818_vm6, 0.0, %v2182_v16  ;;  %v1459_v9 = vpack.c.bf16 %v1454_v40, %v2632_v27  ;;  %v982_v12 = vpack.c.bf16 %v2844_v58, %v2833_v32  ;;  %vm3449_vm13 = vcmp.le.f32.partialorder %v2196_v26, -5e+29  ;;  %v3464_v40 = vld [vmem:[#allocation11_spill] sm:$0xff] }
  0x7d   : > { %1468 = vrot.lane.b32.xlu0 %v1458_v56, %s2079_s28  ;;  %v2858_v24 = vsel %vm3449_vm13, 0.0, %v2196_v26  ;;  %vm3450_vm14 = vcmp.le.f32.partialorder %v2170_v10, -5e+29  ;;  %vm3451_vm6 = vcmp.le.f32.partialorder %v2180_v15, -5e+29  ;;  %v3458_v45 = vrot.slane %v2178_v14, 1 }
  0x7e   : > { %v2863_v60 = vsel %vm3450_vm14, 0.0, %v2170_v10  ;;  %1409 = vrot.lane.b32.xlu1 %v1398_v42, %s2078_s27  ;;  %v2869_v16 = vsel %vm3451_vm6, 0.0, %v2180_v15  ;;  %vm3452_vm15 = vcmp.le.f32.partialorder %v2402_v29, -5e+29  ;;  %vm3453_vm0 = vcmp.le.f32.partialorder %v2404_v34, -5e+29 }
  0x7f   : > { %v723_v27 = vsel %vm3452_vm15, 0.0, %v2402_v29  ;;  %v725_v26 = vsel %vm3453_vm0, 0.0, %v2404_v34  ;;  %vm3454_vm3 = vcmp.le.f32.partialorder %v2293_v35, -5e+29  ;;  %vm3455_vm9 = vcmp.le.f32.partialorder %v2311_v49, -5e+29 }
  0x80   : > { %v727_v10 = vsel %vm3454_vm3, 0.0, %v2293_v35  ;;  %v1193_v56 = vrot.slane %v723_v27, 1  ;;  %v1196_v2 = vrot.slane %v725_v26, 1  ;;  %v729_v7 = vsel %vm3455_vm9, 0.0, %v2311_v49  ;;  %v3468_v26 = vld [vmem:[#allocation13_spill] sm:$0xff] }
  0x81   : > { %v1199_v15 = vrot.slane %v727_v10, 1  ;;  %v884_v42 = vpack.c.bf16 %v2841_v0, %v2829_v20  ;;  %v1127_v29 = vpack.c.bf16 %v2858_v24, %v2849_v18  ;;  %v1202_v5 = vrot.slane %v729_v7, 1  ;;  %891 = vrot.lane.b32.xlu0 %v883_v38, %s2074_s17  ;;  %v3466_v24 = vld [vmem:[#allocation12_spill] sm:$0xff] }
  0x82   : > { %v1321_v34 = vpack.c.bf16 %v2356_v33, %v2360_v36  ;;  %v3456_v35 = vrot.slane %v2193_v22, 1  ;;  %v3457_v49 = vrot.slane %v2188_v19, 1  ;;  %vm3460_vm1 = vcmp.le.f32.partialorder %v3459_v4, -5e+29  ;;  %1470 = vrot.lane.b32.xlu1 %v1459_v9, %s2079_s28  ;;  %v3486_v9 = vld [vmem:[#allocation22_spill] sm:$0xff] }
  0x83   : > { %v2903_v6 = vsel %vm948_vm12, %v3458_v45, %v1199_v15  ;;  %v2908_v3 = vsel %vm3460_vm1, 0.0, %v3459_v4  ;;  %v1128_v22 = vpack.c.bf16 %v2869_v16, %v2863_v60  ;;  %v3461_v38 = vrot.slane %v2175_v13, 1  ;;  %v3484_v15 = vld [vmem:[#allocation21_spill] sm:$0xff] }
  0x84   : > { %v2893_v1 = vsel %vm948_vm12, %v3456_v35, %v1193_v56  ;;  %v2898_v39 = vsel %vm948_vm12, %v3457_v49, %v1196_v2  ;;  %v961_v25 = vrot.slane %v2908_v3, 1  ;;  %vm3463_vm13 = vcmp.le.f32.partialorder %v3462_v41, -5e+29  ;;  %v3470_v56 = vld [vmem:[#allocation14_spill] sm:$0xff]  ;;  %v3474_v49 = vld [vmem:[#allocation16_spill] sm:$0xff] }
  0x85   : > { %v1224_v19 = vpack.c.bf16 %v2898_v39, %v2893_v1  ;;  %v2918_v44 = vsel %vm948_vm12, %v3461_v38, %v1202_v5  ;;  %v2926_v8 = vsel %vm3463_vm13, 0.0, %v3462_v41  ;;  %v1425_v59 = vpack.c.bf16 %v2833_v32, %v2822_v43  ;;  %989 = vrot.lane.b32.xlu0 %v981_v55, %s2077_s21  ;;  %v3472_v5 = vld [vmem:[#allocation15_spill] sm:$0xff]  ;;  %v3476_v41 = vld [vmem:[#allocation17_spill] sm:$0xff] }
  0x86   : > { %v1225_v63 = vpack.c.bf16 %v2918_v44, %v2903_v6  ;;  %vm3465_vm14 = vcmp.le.f32.partialorder %v3464_v40, -5e+29  ;;  %vm3467_vm6 = vcmp.le.f32.partialorder %v3466_v24, -5e+29  ;;  %vm3469_vm15 = vcmp.le.f32.partialorder %v3468_v26, -5e+29  ;;  %893 = vrot.lane.b32.xlu1 %v884_v42, %s2074_s17 }
  0x87   : > { %v2933_v18 = vsel %vm3465_vm14, 0.0, %v3464_v40  ;;  %v509_v27 = vsel %vm3467_vm6, 0.0, %v3466_v24  ;;  %v2943_v10 = vsel %vm3469_vm15, 0.0, %v3468_v26  ;;  %vm3471_vm0 = vcmp.le.f32.partialorder %v3470_v56, -5e+29  ;;  %v3478_v40 = vld [vmem:[#allocation18_spill] sm:$0xff] }
  0x88   : > { %v2948_v2 = vsel %vm3471_vm0, 0.0, %v3470_v56  ;;  %v962_v7 = vrot.slane %v509_v27, 1  ;;  %vm3473_vm3 = vcmp.le.f32.partialorder %v3472_v5, -5e+29  ;;  %vm3475_vm9 = vcmp.le.f32.partialorder %v3474_v49, -5e+29 }
  0x89   : > { %v2956_v35 = vsel %vm3473_vm3, 0.0, %v3472_v5  ;;  %v511_v45 = vsel %vm3475_vm9, 0.0, %v3474_v49  ;;  %vm3477_vm1 = vcmp.le.f32.partialorder %v3476_v41, -5e+29  ;;  %vm3479_vm13 = vcmp.le.f32.partialorder %v3478_v40, -5e+29  ;;  %1086 = vrot.lane.b32.xlu0 %v1078_v50, %s2072_s15 }
  0x8a   : > { %v964_v4 = vrot.slane %v2956_v35, 1  ;;  %v965_v38 = vrot.slane %v511_v45, 1  ;;  %v2966_v55 = vsel %vm3477_vm1, 0.0, %v3476_v41  ;;  %v513_v24 = vsel %vm3479_vm13, 0.0, %v3478_v40  ;;  %v3480_v26 = vld [vmem:[#allocation19_spill] sm:$0xff]  ;;  %v3482_v42 = vld [vmem:[#allocation20_spill] sm:$0xff]  ;;  %991 = vrot.lane.b32.xlu1 %v982_v12, %s2077_s21 }
  0x8b   : > { %v2972_v27 = vsel %vm948_vm12, %v961_v25, %v962_v7  ;;  %vm3481_vm14 = vcmp.le.f32.partialorder %v3480_v26, -5e+29  ;;  %vm3483_vm6 = vcmp.le.f32.partialorder %v3482_v42, -5e+29  ;;  %v967_v49 = vrot.slane %v2966_v55, 1  ;;  %v3490_v7 = vld [vmem:[#allocation24_spill] sm:$0xff] }
  0x8c   : > { %v2977_v56 = vsel %vm3481_vm14, 0.0, %v3480_v26  ;;  %v515_v5 = vsel %vm3483_vm6, 0.0, %v3482_v42  ;;  %v2986_v41 = vsel %vm948_vm12, %v964_v4, %v965_v38  ;;  %v968_v40 = vrot.slane %v513_v24, 1 }
  0x8d   : > { %v970_v25 = vrot.slane %v2977_v56, 1  ;;  %v971_v26 = vrot.slane %v515_v5, 1  ;;  %vm3485_vm15 = vcmp.le.f32.partialorder %v3484_v15, -5e+29  ;;  %vm3487_vm0 = vcmp.le.f32.partialorder %v3486_v9, -5e+29  ;;  %1135 = vrot.lane.b32.xlu0 %v1127_v29, %s2073_s16 }
  0x8e   : > { %v2995_v42 = vsel %vm3485_vm15, 0.0, %v3484_v15  ;;  %v3000_v45 = vsel %vm3487_vm0, 0.0, %v3486_v9  ;;  %v3004_v4 = vsel %vm948_vm12, %v967_v49, %v968_v40  ;;  %v3488_v5 = vld [vmem:[#allocation23_spill] sm:$0xff]  ;;  %vm3491_vm9 = vcmp.le.f32.partialorder %v3490_v7, -5e+29  ;;  %1088 = vrot.lane.b32.xlu1 %v1079_v11, %s2072_s15 }
  0x8f   : > { %v1204_v38 = vrot.slane %v2995_v42, 1  ;;  %v1207_v24 = vrot.slane %v3000_v45, 1  ;;  %v3011_v15 = vsel %vm948_vm12, %v970_v25, %v971_v26  ;;  %vm3489_vm3 = vcmp.le.f32.partialorder %v3488_v5, -5e+29 }
  0x90   : > { %v3016_v9 = vsel %vm3489_vm3, 0.0, %v3488_v5  ;;  %v3021_v12 = vsel %vm3491_vm9, 0.0, %v3490_v7  ;;  %vm3492_vm1 = vcmp.le.f32.partialorder %v2634_v54, -5e+29  ;;  %v3038_v7 = vsel %vm823_vm2, 0.0, %v2636_v51 }
  0x91   : > { %v3026_v49 = vsel %vm3492_vm1, 0.0, %v2634_v54  ;;  %v1210_v26 = vrot.slane %v3016_v9, 1  ;;  %v1213_v5 = vrot.slane %v3021_v12, 1  ;;  %vm3493_vm13 = vcmp.le.f32.partialorder %v2664_v30, -5e+29  ;;  %1232 = vrot.lane.b32.xlu0 %v1224_v19, %s2076_s19 }
  0x92   : > { %v3043_v54 = vsel %vm3493_vm13, 0.0, %v2664_v30  ;;  %vm3494_vm14 = vcmp.le.f32.partialorder %v2666_v53, -5e+29  ;;  %v731_v40 = vsel %vm715_vm7, 0.0, %v2677_v52  ;;  %vm3495_vm2 = vcmp.le.f32.partialorder %v2679_v37, -5e+29  ;;  %1137 = vrot.lane.b32.xlu1 %v1128_v22, %s2073_s16 }
  0x93   : > { %v3048_v25 = vsel %vm3494_vm14, 0.0, %v2666_v53  ;;  %v733_v53 = vsel %vm3495_vm2, 0.0, %v2679_v37  ;;  %v1205_v29 = vrot.slane %v731_v40, 1  ;;  %v735_v52 = vsel %vm719_vm4, 0.0, %v2706_v62  ;;  %v2061_v40 = vld [vmem:[%s3358_s7] sm:$0xff]   ;;  %v3496_v22 = vld [vmem:[#allocation9_spill] sm:$0xff] }
  0x94   : > { %v1208_v50 = vrot.slane %v733_v53, 1  ;;  %v737_v13 = vsel %vm721_vm5, 0.0, %v2708_v23  ;;  %v1323_v14 = vpack.c.bf16 %v2966_v55, %v2956_v35  ;;  %v1211_v30 = vrot.slane %v735_v52, 1  ;;  %2025 = vmatprep.subr.bf16.mxu1 %v2061_v40  ;;  %v3499_v53 = vld [vmem:[#allocation5_spill] sm:$0xff] }
  0x95   : > { %v3073_v11 = vsel %vm948_vm12, %v1204_v38, %v1205_v29  ;;  %v1214_v51 = vrot.slane %v737_v13, 1  ;;  %v3078_v37 = vsel %vm498_vm11, 0.0, %v2727_v31  ;;  %v1372_v38 = vpack.c.bf16 %v2943_v10, %v2933_v18  ;;  %v2060_v52 = vld [vmem:[%s3357_s6 + $0x10] ss:$0 sps:$4 sm:$0x33]   ;;  %2026 = vmatpush3.bf16.msra.mxu1 %v2061_v40  ;;  %1329 = vrot.lane.b32.xlu0 %v1321_v34, %s2075_s18 }
  0x96   : > { %v3085_v23 = vsel %vm948_vm12, %v1207_v24, %v1208_v50  ;;  %v1324_v62 = vpack.c.bf16 %v3078_v37, %v2977_v56  ;;  %v3101_v1 = vsel %vm948_vm12, %v1210_v26, %v1211_v30  ;;  %v3109_v19 = vsel %vm628_vm8, 0.0, %v2741_v21  ;;  %v3113_v24 = vpop.permute.xlu0 %1111  ;;  %v3497_v26 = vld [vmem:[#allocation7_spill] sm:$0xff]  ;;  %v3498_v30 = vld [vmem:[#allocation8_spill] sm:$0xff]  ;;  %1234 = vrot.lane.b32.xlu1 %v1225_v63, %s2076_s19 }
  0x97   : > { %v1226_v31 = vpack.c.bf16 %v3085_v23, %v3073_v11  ;;  %v3104_v39 = vsel %vm948_vm12, %v1213_v5, %v1214_v51  ;;  %v1421_v60 = vrot.slane %v3078_v37, 1  ;;  %v1373_v16 = vpack.c.bf16 %v3109_v19, %v2948_v2 }
  0x98   : > { %v1227_v50 = vpack.c.bf16 %v3104_v39, %v3101_v1  ;;  %vm870_vm4 = vcmask 31744   ;;  %v875_v5 = vpack.c.bf16 %v3497_v26, %v3496_v22  ;;  %v1427_v51 = vpack.c.bf16 %v3004_v4, %v2986_v41 }
  0x99   : > { %v517_v21 = vsel %vm499_vm10, 0.0, %v2758_v48  ;;  %v876_v29 = vpack.c.bf16 %v3499_v53, %v3498_v30  ;;  %v1370_v13 = vpack.c.bf16 %v2829_v20, %v2769_v46  ;;  %v2062_v48 = vld [vmem:[%s3358_s7 + $0x8] sm:$0xff]   ;;  %v1322_v40 = vpack.c.bf16 %v2908_v3, %v2280_v17  ;;  %v3500_v46 = vld [vmem:[#allocation6_spill] sm:$0xff] }
  0x9a   : > { %v1422_v22 = vrot.slane %v517_v21, 1  ;;  %879 = vst.msk [vmem:[#allocation2] sm:$0xff] %vm870_vm4, %v875_v5  ;;  %v877_v20 = vpack.c.bf16 %v2565_v61, %v3500_v46  ;;  %v878_v26 = vpack.c.bf16 %v2611_v28, %v2600_v57  ;;  %vm1517_vm5 = vcmask 1041408   ;;  %2027 = vmatprep.subr.bf16.mxu1 %v2062_v48  ;;  %v1161_v6 = vpop.permute.xlu0 %1160  ;;  %v1114_v5 = vpop.permute.xlu1 %1113 }
  0x9b   : > { %880 = vst.msk [vmem:[#allocation2 + $0x8] sm:$0xff] %vm870_vm4, %v876_v29  ;;  %2039 = vmatprep.subr.msk.bf16.mxu0 %vm1517_vm5, %v2060_v52  ;;  %v1519_v63 = vsel %vm1517_vm5, %v2060_v52, 0  ;;  %2028 = vmatpush3.bf16.msra.mxu1 %v2062_v48  ;;  %v867_v61 = vpack.c.bf16 %v2280_v17, %v2356_v33  ;;  %v868_v57 = vpack.c.bf16 %v2956_v35, %v2908_v3  ;;  %vm903_vm7 = vcmask 64544  }
  0x9c   : > { %v3148_v34 = vsel %vm948_vm12, %v1421_v60, %v1422_v22  ;;  %v866_v60 = vpack.c.bf16 %v2360_v36, %v2794_v47  ;;  %1378 = vrot.lane.b32.xlu0 %v1370_v13, %s2078_s27  ;;  %881 = vst.msk [vmem:[#allocation2 + $0x10] sm:$0xff] %vm870_vm4, %v877_v20  ;;  %882 = vst.msk [vmem:[#allocation2 + $0x18] sm:$0xff] %vm870_vm4, %v878_v26  ;;  %2016 = vmatpush3.bf16.msra.mxu0 %v1519_v63  ;;  %v2063_v36 = vld [vmem:[%s3358_s7 + $0x10] ss:$0 sps:$4 sm:$0x33]   ;;  %vm1001_vm11 = vcmask 97344  }
  0x9d   : > { %v1428_v44 = vpack.c.bf16 %v3148_v34, %v3011_v15  ;;  %v869_v28 = vpack.c.bf16 %v2977_v56, %v2966_v55  ;;  %1331 = vrot.lane.b32.xlu1 %v1322_v40, %s2075_s18  ;;  %v1371_v47 = vpack.c.bf16 %v2926_v8, %v2841_v0  ;;  %872 = vst.msk [vmem:[#allocation3 + $0x8] sm:$0xff] %vm870_vm4, %v867_v61  ;;  %873 = vst.msk [vmem:[#allocation3 + $0x10] sm:$0xff] %vm870_vm4, %v868_v57  ;;  %vm1098_vm12 = vcmask 130144  }
  0x9e   : > { %871 = vst.msk [vmem:[#allocation3] sm:$0xff] %vm870_vm4, %v866_v60  ;;  %2040 = vmatprep.subr.msk.bf16.mxu1 %vm1517_vm5, %v2063_v36  ;;  %v1623_v17 = vsel %vm1517_vm5, %v2063_v36, 0  ;;  %v917_v33 = vpop.permute.xlu0 %916  ;;  %v3501_v0 = vpack.c.bf16 %v2972_v27, %v2844_v58  ;;  %v1163_v3 = vpop.permute.xlu1 %1162  ;;  %v3502_v21 = vpack.c.bf16 %v2933_v18, %v2926_v8  ;;  %v3503_v43 = vpack.c.bf16 %v2986_v41, %v2972_v27 }
  0x9f   : > { %874 = vst.msk [vmem:[#allocation3 + $0x18] sm:$0xff] %vm870_vm4, %v869_v28  ;;  %2030 = vmatpush3.bf16.msra.mxu1 %v1623_v17  ;;  %v3504_v32 = vpack.c.bf16 %v2948_v2, %v2943_v10  ;;  %v3506_v8 = vpack.c.bf16 %v3011_v15, %v3004_v4  ;;  %v3507_v27 = vpack.c.bf16 %v3038_v7, %v3026_v49  ;;  %vm1147_vm8 = vcmask 162944  }
  0xa0   : > { %1433 = vrot.lane.b32.xlu0 %v1425_v59, %s2079_s28  ;;  %928 = vst.msk [vmem:[#allocation2] sm:$0xff] %vm903_vm7, %v917_v33  ;;  %v3505_v59 = vpack.c.bf16 %v3000_v45, %v2995_v42  ;;  %v3508_v29 = vpack.c.bf16 %v3021_v12, %v3016_v9  ;;  %v3509_v45 = vpack.c.bf16 %v3048_v25, %v3043_v54  ;;  %vm1244_vm10 = vcmask 195744  }
  0xa1   : > { %1380 = vrot.lane.b32.xlu1 %v1371_v47, %s2078_s27  ;;  %vm1341_vm6 = vcmask 228544   ;;  %vm1390_vm15 = vcmask 261344   ;;  %vm1445_vm0 = vcmask 294144   ;;  %vm1504_vm3 = vcmask 293888  }
  0xa2   : > { %v1357_v58 = vpop.permute.xlu1 %1356 }
  0xa4   : > { %1435 = vrot.lane.b32.xlu0 %v3501_v0, %s2079_s28  ;;  %v919_v30 = vpop.permute.xlu0 %918 }
  0xa5   : > { %895 = vrot.lane.b32.xlu1 %v3502_v21, %s2074_s17  ;;  %929 = vst.msk [vmem:[#allocation2 + $0x8] sm:$0xff] %vm903_vm7, %v919_v30 }
  0xa8   : > { %993 = vrot.lane.b32.xlu0 %v3503_v43, %s2077_s21 }
  0xa9   : > { %897 = vrot.lane.b32.xlu1 %v3504_v32, %s2074_s17 }
  0xaa   : > { %v1308_v53 = vpop.permute.xlu1 %1307  ;;  %v1355_v42 = vpop.permute.xlu0 %1354 }
  0xac   : > { %1090 = vrot.lane.b32.xlu0 %v3505_v59, %s2072_s15 }
  0xad   : > { %995 = vrot.lane.b32.xlu1 %v3506_v8, %s2077_s21 }
  0xb0   : > { %1139 = vrot.lane.b32.xlu0 %v3507_v27, %s2073_s16 }
  0xb1   : > { %1092 = vrot.lane.b32.xlu1 %v3508_v29, %s2072_s15  ;;  %s1949_s15 = sshll.u32 %s3511_s14, 5 }
  0xb2   : > { %s438_s20 = scalar_lea.vmem %s3360_s9, %s1949_s15 }
  0xb3   : > { %v1063_v49 = vpop.permute.xlu1 %1062 }
  0xb4   : > { %1236 = vrot.lane.b32.xlu0 %v1226_v31, %s2076_s19  ;;  %1074 = vst.msk [vmem:[#allocation2] sm:$0xff] %vm1001_vm11, %v1063_v49 }
  0xb5   : > { %1141 = vrot.lane.b32.xlu1 %v3509_v45, %s2073_s16  ;;  %1123 = vst.msk [vmem:[#allocation2] sm:$0xff] %vm1098_vm12, %v3113_v24 }
  0xb6   : > { %1172 = vst.msk [vmem:[#allocation2] sm:$0xff] %vm1147_vm8, %v1161_v6 }
  0xb8   : > { %1333 = vrot.lane.b32.xlu0 %v1323_v14, %s2075_s18  ;;  %v1306_v9 = vpop.permute.xlu0 %1305 }
  0xb9   : > { %1238 = vrot.lane.b32.xlu1 %v1227_v50, %s2076_s19  ;;  %1317 = vst.msk [vmem:[#allocation2] sm:$0xff] %vm1244_vm10, %v1306_v9  ;;  %s1928_s19 = sshll.u32 %s3511_s14, 1 }
  0xba   : > { %1366 = vst.msk [vmem:[#allocation2] sm:$0xff] %vm1341_vm6, %v1355_v42  ;;  %s442_s26 = scalar_lea.vmem %s3361_s10, %s1928_s19 }
  0xbb   : > { %v1065_v35 = vpop.permute.xlu1 %1064 }
  0xbc   : > { %1382 = vrot.lane.b32.xlu0 %v1372_v38, %s2078_s27  ;;  %1075 = vst.msk [vmem:[#allocation2 + $0x8] sm:$0xff] %vm1001_vm11, %v1065_v35  ;;  %v1404_v18 = vpop.permute.xlu0 %1403 }
  0xbd   : > { %1335 = vrot.lane.b32.xlu1 %v1324_v62, %s2075_s18  ;;  %1124 = vst.msk [vmem:[#allocation2 + $0x8] sm:$0xff] %vm1098_vm12, %v1114_v5  ;;  %s3333_s18 = scalar_lea.vmem %s3359_s8, %s1949_s15 }
  0xbe   : > { %1173 = vst.msk [vmem:[#allocation2 + $0x8] sm:$0xff] %vm1147_vm8, %v1163_v3 }
  0xbf   : > { %1415 = vst.msk [vmem:[#allocation2] sm:$0xff] %vm1390_vm15, %v1404_v18  ;;  %v1406_v10 = vpop.permute.xlu1 %1405 }
  0xc0   : > { %1437 = vrot.lane.b32.xlu0 %v1427_v51, %s2079_s28  ;;  %1318 = vst.msk [vmem:[#allocation2 + $0x8] sm:$0xff] %vm1244_vm10, %v1308_v53  ;;  %v1465_v55 = vpop.permute.xlu0 %1464 }
  0xc1   : > { %1384 = vrot.lane.b32.xlu1 %v1373_v16, %s2078_s27  ;;  %1367 = vst.msk [vmem:[#allocation2 + $0x8] sm:$0xff] %vm1341_vm6, %v1357_v58 }
  0xc2   : > { %1416 = vst.msk [vmem:[#allocation2 + $0x8] sm:$0xff] %vm1390_vm15, %v1406_v10 }
  0xc3   : > { %1476 = vst.msk [vmem:[#allocation2] sm:$0xff] %vm1445_vm0, %v1465_v55  ;;  %v921_v2 = vpop.permute.xlu1 %920 }
  0xc4   : > { %930 = vst.msk [vmem:[#allocation2 + $0x10] sm:$0xff] %vm903_vm7, %v921_v2  ;;  %v1467_v56 = vpop.permute.xlu0 %1466 }
  0xc5   : > { %1439 = vrot.lane.b32.xlu1 %v1428_v44, %s2079_s28  ;;  %1477 = vst.msk [vmem:[#allocation2 + $0x8] sm:$0xff] %vm1445_vm0, %v1467_v56 }
  0xc7   : > { %v923_v41 = vpop.permute.xlu1 %922 }
  0xc8   : > { %931 = vst.msk [vmem:[#allocation2 + $0x18] sm:$0xff] %vm903_vm7, %v923_v41 }
  0xca   : > { %v1480_v4 = vld [vmem:[#allocation2] sm:$0xff]  ;;  %v1067_v12 = vpop.permute.xlu0 %1066 }
  0xcb   : > { %2017 = vmatprep.mubr.msk.bf16.mxu0 %vm1504_vm3, %v1480_v4  ;;  %1076 = vst.msk [vmem:[#allocation2 + $0x10] sm:$0xff] %vm1001_vm11, %v1067_v12 }
  0xcc   : > { %v1481_v15 = vld [vmem:[#allocation2 + $0x8] sm:$0xff] }
  0xcd   : > { %2018 = vmatmul.mubr.msk.bf16.vlgmr.msra.gmra.mrb[0].mxu0 %vm1504_vm3, %v1481_v15 }
  0xd0   : > { %v1069_v25 = vpop.permute.xlu1 %1068 }
  0xd1   : > { %1077 = vst.msk [vmem:[#allocation2 + $0x18] sm:$0xff] %vm1001_vm11, %v1069_v25 }
  0xd3   : > { %v1116_v7 = vpop.permute.xlu0 %1115 }
  0xd4   : > { %1125 = vst.msk [vmem:[#allocation2 + $0x10] sm:$0xff] %vm1098_vm12, %v1116_v7 }
  0xd6   : > { %v1118_v54 = vpop.permute.xlu1 %1117 }
  0xd7   : > { %1126 = vst.msk [vmem:[#allocation2 + $0x18] sm:$0xff] %vm1098_vm12, %v1118_v54 }
  0xdb   : > { %v1165_v14 = vpop.permute.xlu0 %1164 }
  0xdc   : > { %1174 = vst.msk [vmem:[#allocation2 + $0x10] sm:$0xff] %vm1147_vm8, %v1165_v14 }
  0xde   : > { %v1167_v11 = vpop.permute.xlu1 %1166 }
  0xdf   : > { %1175 = vst.msk [vmem:[#allocation2 + $0x18] sm:$0xff] %vm1147_vm8, %v1167_v11 }
  0xe3   : > { %v1310_v37 = vpop.permute.xlu0 %1309 }
  0xe4   : > { %1319 = vst.msk [vmem:[#allocation2 + $0x10] sm:$0xff] %vm1244_vm10, %v1310_v37 }
  0xe7   : > { %v1359_v23 = vpop.permute.xlu0 %1358 }
  0xe8   : > { %v1312_v62 = vpop.permute.xlu1 %1311  ;;  %1368 = vst.msk [vmem:[#allocation2 + $0x10] sm:$0xff] %vm1341_vm6, %v1359_v23 }
  0xe9   : > { %1320 = vst.msk [vmem:[#allocation2 + $0x18] sm:$0xff] %vm1244_vm10, %v1312_v62 }
  0xeb   : > { %v1408_v38 = vpop.permute.xlu0 %1407 }
  0xec   : > { %v1361_v31 = vpop.permute.xlu1 %1360  ;;  %1417 = vst.msk [vmem:[#allocation2 + $0x10] sm:$0xff] %vm1390_vm15, %v1408_v38 }
  0xed   : > { %1369 = vst.msk [vmem:[#allocation2 + $0x18] sm:$0xff] %vm1341_vm6, %v1361_v31 }
  0xef   : > { %v1469_v1 = vpop.permute.xlu0 %1468 }
  0xf0   : > { %v1410_v39 = vpop.permute.xlu1 %1409  ;;  %1478 = vst.msk [vmem:[#allocation2 + $0x10] sm:$0xff] %vm1445_vm0, %v1469_v1 }
  0xf1   : > { %1418 = vst.msk [vmem:[#allocation2 + $0x18] sm:$0xff] %vm1390_vm15, %v1410_v39 }
  0xf3   : > { %v892_v19 = vpop.permute.xlu0 %891 }
  0xf4   : > { %v1471_v50 = vpop.permute.xlu1 %1470  ;;  %904 = vst.msk [vmem:[#allocation3] sm:$0xff] %vm903_vm7, %v892_v19 }
  0xf5   : > { %1479 = vst.msk [vmem:[#allocation2 + $0x18] sm:$0xff] %vm1445_vm0, %v1471_v50 }
  0xf7   : > { %v990_v24 = vpop.permute.xlu0 %989  ;;  %v1482_v16 = vld [vmem:[#allocation2 + $0x10] sm:$0xff] }
  0xf8   : > { %v894_v51 = vpop.permute.xlu1 %893  ;;  %1002 = vst.msk [vmem:[#allocation3] sm:$0xff] %vm1001_vm11, %v990_v24  ;;  %2021 = vmatprep.mubr.msk.bf16.mxu0 %vm1504_vm3, %v1482_v16 }
  0xf9   : > { %905 = vst.msk [vmem:[#allocation3 + $0x8] sm:$0xff] %vm903_vm7, %v894_v51 }
  0xfb   : > { %v1087_v52 = vpop.permute.xlu0 %1086 }
  0xfc   : > { %v992_v13 = vpop.permute.xlu1 %991  ;;  %v1483_v22 = vld [vmem:[#allocation2 + $0x18] sm:$0xff]  ;;  %1099 = vst.msk [vmem:[#allocation3] sm:$0xff] %vm1098_vm12, %v1087_v52 }
  0xfd   : > { %1003 = vst.msk [vmem:[#allocation3 + $0x8] sm:$0xff] %vm1001_vm11, %v992_v13  ;;  %2022 = vmatmul.mubr.msk.bf16.gmra.mrb[4].mxu0 %vm1504_vm3, %v1483_v22 }
  0xff   : > { %v1136_v48 = vpop.permute.xlu0 %1135 }
 0x100   : > { %v1089_v40 = vpop.permute.xlu1 %1088  ;;  %1148 = vst.msk [vmem:[#allocation3] sm:$0xff] %vm1147_vm8, %v1136_v48 }
 0x101   : > { %1100 = vst.msk [vmem:[#allocation3 + $0x8] sm:$0xff] %vm1098_vm12, %v1089_v40 }
 0x103   : > { %v1233_v34 = vpop.permute.xlu0 %1232 }
 0x104   : > { %v1138_v46 = vpop.permute.xlu1 %1137  ;;  %1245 = vst.msk [vmem:[#allocation3] sm:$0xff] %vm1244_vm10, %v1233_v34 }
 0x105   : > { %1149 = vst.msk [vmem:[#allocation3 + $0x8] sm:$0xff] %vm1147_vm8, %v1138_v46 }
 0x107   : > { %v1330_v20 = vpop.permute.xlu0 %1329 }
 0x108   : > { %v1235_v26 = vpop.permute.xlu1 %1234  ;;  %1342 = vst.msk [vmem:[#allocation3] sm:$0xff] %vm1341_vm6, %v1330_v20 }
 0x109   : > { %1246 = vst.msk [vmem:[#allocation3 + $0x8] sm:$0xff] %vm1244_vm10, %v1235_v26 }
 0x10e   : > { %v1379_v6 = vpop.permute.xlu0 %1378 }
 0x10f   : > { %v1332_v44 = vpop.permute.xlu1 %1331  ;;  %1391 = vst.msk [vmem:[#allocation3] sm:$0xff] %vm1390_vm15, %v1379_v6 }
 0x110   : > { %1343 = vst.msk [vmem:[#allocation3 + $0x8] sm:$0xff] %vm1341_vm6, %v1332_v44 }
 0x112   : > { %v1434_v63 = vpop.permute.xlu0 %1433 }
 0x113   : > { %v1381_v60 = vpop.permute.xlu1 %1380  ;;  %1446 = vst.msk [vmem:[#allocation3] sm:$0xff] %vm1445_vm0, %v1434_v63 }
 0x114   : > { %1392 = vst.msk [vmem:[#allocation3 + $0x8] sm:$0xff] %vm1390_vm15, %v1381_v60 }
 0x116   : > { %v1436_v61 = vpop.permute.xlu0 %1435 }
 0x117   : > { %v896_v57 = vpop.permute.xlu1 %895  ;;  %1447 = vst.msk [vmem:[#allocation3 + $0x8] sm:$0xff] %vm1445_vm0, %v1436_v61 }
 0x118   : > { %906 = vst.msk [vmem:[#allocation3 + $0x10] sm:$0xff] %vm903_vm7, %v896_v57 }
 0x11a   : > { %v994_v28 = vpop.permute.xlu0 %993  ;;  %v1586_v36 = vld [vmem:[#allocation3] sm:$0xff] }
 0x11b   : > { %v898_v47 = vpop.permute.xlu1 %897  ;;  %1004 = vst.msk [vmem:[#allocation3 + $0x10] sm:$0xff] %vm1001_vm11, %v994_v28  ;;  %2031 = vmatprep.mubr.msk.bf16.mxu1 %vm1504_vm3, %v1586_v36 }
 0x11c   : > { %907 = vst.msk [vmem:[#allocation3 + $0x18] sm:$0xff] %vm903_vm7, %v898_v47 }
 0x11e   : > { %v1091_v5 = vpop.permute.xlu0 %1090  ;;  %v1587_v17 = vld [vmem:[#allocation3 + $0x8] sm:$0xff] }
 0x11f   : > { %v996_v33 = vpop.permute.xlu1 %995  ;;  %1101 = vst.msk [vmem:[#allocation3 + $0x10] sm:$0xff] %vm1098_vm12, %v1091_v5  ;;  %2032 = vmatmul.mubr.msk.bf16.vlgmr.msra.gmra.mrb[0].mxu1 %vm1504_vm3, %v1587_v17 }
 0x120   : > { %1005 = vst.msk [vmem:[#allocation3 + $0x18] sm:$0xff] %vm1001_vm11, %v996_v33 }
 0x122   : > { %v1140_v0 = vpop.permute.xlu0 %1139 }
 0x123   : > { %v1093_v3 = vpop.permute.xlu1 %1092  ;;  %1150 = vst.msk [vmem:[#allocation3 + $0x10] sm:$0xff] %vm1147_vm8, %v1140_v0 }
 0x124   : > { %1102 = vst.msk [vmem:[#allocation3 + $0x18] sm:$0xff] %vm1098_vm12, %v1093_v3 }
 0x126   : > { %v1237_v21 = vpop.permute.xlu0 %1236 }
 0x127   : > { %v1142_v30 = vpop.permute.xlu1 %1141  ;;  %1247 = vst.msk [vmem:[#allocation3 + $0x10] sm:$0xff] %vm1244_vm10, %v1237_v21 }
 0x128   : > { %1151 = vst.msk [vmem:[#allocation3 + $0x18] sm:$0xff] %vm1147_vm8, %v1142_v30 }
 0x12a   : > { %v1334_v43 = vpop.permute.xlu0 %1333 }
 0x12b   : > { %v1239_v32 = vpop.permute.xlu1 %1238  ;;  %1344 = vst.msk [vmem:[#allocation3 + $0x10] sm:$0xff] %vm1341_vm6, %v1334_v43 }
 0x12c   : > { %1248 = vst.msk [vmem:[#allocation3 + $0x18] sm:$0xff] %vm1244_vm10, %v1239_v32 }
 0x12e   : > { %v1383_v58 = vpop.permute.xlu0 %1382 }
 0x12f   : > { %v1336_v59 = vpop.permute.xlu1 %1335  ;;  %1393 = vst.msk [vmem:[#allocation3 + $0x10] sm:$0xff] %vm1390_vm15, %v1383_v58 }
 0x130   : > { %1345 = vst.msk [vmem:[#allocation3 + $0x18] sm:$0xff] %vm1341_vm6, %v1336_v59 }
 0x132   : > { %v1438_v8 = vpop.permute.xlu0 %1437 }
 0x133   : > { %v1385_v27 = vpop.permute.xlu1 %1384  ;;  %1448 = vst.msk [vmem:[#allocation3 + $0x10] sm:$0xff] %vm1445_vm0, %v1438_v8 }
 0x134   : > { %1394 = vst.msk [vmem:[#allocation3 + $0x18] sm:$0xff] %vm1390_vm15, %v1385_v27 }
 0x137   : > { %v1440_v53 = vpop.permute.xlu1 %1439 }
 0x138   : > { %1449 = vst.msk [vmem:[#allocation3 + $0x18] sm:$0xff] %vm1445_vm0, %v1440_v53 }
 0x13a   : > { %v1588_v29 = vld [vmem:[#allocation3 + $0x10] sm:$0xff] }
 0x13b   : > { %2035 = vmatprep.mubr.msk.bf16.mxu1 %vm1504_vm3, %v1588_v29 }
 0x13f   : > { %v1589_v45 = vld [vmem:[#allocation3 + $0x18] sm:$0xff] }
 0x140   : > { %2036 = vmatmul.mubr.msk.bf16.gmra.mrb[4].mxu1 %vm1504_vm3, %v1589_v45 }
 0x1a0   : > { %v2019_v42 = vpop.f32.mrb[0].mxu0 }
 0x1a1   : > { %v1555_v49 = vpop.f32.mrb[1].mxu0  ;;  %v1706_v41 = vmul.f32 %v2019_v42, %v2019_v42 }
 0x1a2   : > { %v2020_v9 = vpop.f32.mrb[2].mxu0  ;;  %v1704_v10 = vmul.f32 %v1555_v49, %v1555_v49 }
 0x1a3   : > { %v1959_v35 = vpack.c.bf16 %v2020_v9, %v2019_v42  ;;  %v1558_v18 = vpop.f32.mrb[3].mxu0  ;;  %v1707_v15 = vmul.f32 %v2020_v9, %v2020_v9 }
 0x1a4   : > { %v1690_v55 = vadd.f32 %v1558_v18, %v1555_v49  ;;  %v1705_v2 = vmul.f32 %v1558_v18, %v1558_v18  ;;  %v1954_v56 = vpack.c.bf16 %v1558_v18, %v1555_v49 }
 0x1a5   : > { %1991 = vst [vmem:[%s3333_s18 + $0x8] sm:$0xff] %v1959_v35  }
 0x1a6   : > { %v1691_v4 = vadd.f32 %v2019_v42, %v1690_v55  ;;  %v1712_v12 = vadd.f32 %v1705_v2, %v1704_v10  ;;  %1955 = vst [vmem:[%s3333_s18] sm:$0xff] %v1954_v56  }
 0x1a8   : > { %v1713_v25 = vadd.f32 %v1712_v12, %v1706_v41  ;;  %v1692_v7 = vadd.f32 %v2020_v9, %v1691_v4 }
 0x1aa   : > { %v1714_v54 = vadd.f32 %v1713_v25, %v1707_v15 }
 0x1d0   : > { %v2023_v14 = vpop.f32.mrb[4].mxu0 }
 0x1d1   : > { %v1571_v11 = vpop.f32.mrb[5].mxu0  ;;  %v1710_v24 = vmul.f32 %v2023_v14, %v2023_v14 }
 0x1d2   : > { %v1693_v37 = vadd.f32 %v1692_v7, %v1571_v11  ;;  %v1708_v23 = vmul.f32 %v1571_v11, %v1571_v11  ;;  %v2024_v62 = vpop.f32.mrb[6].mxu0 }
 0x1d3   : > { %v1969_v38 = vpack.c.bf16 %v2024_v62, %v2023_v14  ;;  %v1574_v31 = vpop.f32.mrb[7].mxu0  ;;  %v1711_v52 = vmul.f32 %v2024_v62, %v2024_v62 }
 0x1d4   : > { %v1715_v1 = vadd.f32 %v1714_v54, %v1708_v23  ;;  %v1694_v39 = vadd.f32 %v1693_v37, %v1574_v31  ;;  %v1709_v19 = vmul.f32 %v1574_v31, %v1574_v31  ;;  %v1964_v50 = vpack.c.bf16 %v1574_v31, %v1571_v11 }
 0x1d5   : > { %1993 = vst [vmem:[%s3333_s18 + $0x18] sm:$0xff] %v1969_v38  }
 0x1d6   : > { %v1695_v16 = vadd.f32 %v2023_v14, %v1694_v39  ;;  %v1716_v51 = vadd.f32 %v1715_v1, %v1709_v19  ;;  %1992 = vst [vmem:[%s3333_s18 + $0x10] sm:$0xff] %v1964_v50  }
 0x1d8   : > { %v1696_v13 = vadd.f32 %v2024_v62, %v1695_v16  ;;  %v1717_v22 = vadd.f32 %v1716_v51, %v1710_v24 }
 0x1da   : > { %v1697_v48 = vrot.slane %v1696_v13, 4  ;;  %v1718_v40 = vadd.f32 %v1717_v22, %v1711_v52 }
 0x1dc   : > { %v1698_v34 = vadd.f32 %v1697_v48, %v1696_v13  ;;  %v1719_v46 = vrot.slane %v1718_v40, 4 }
 0x1de   : > { %v1699_v20 = vrot.slane %v1698_v34, 2  ;;  %v1720_v26 = vadd.f32 %v1719_v46, %v1718_v40 }
 0x1e0   : > { %v1700_v6 = vadd.f32 %v1699_v20, %v1698_v34  ;;  %v1721_v44 = vrot.slane %v1720_v26, 2 }
 0x1e2   : > { %v1701_v63 = vrot.slane %v1700_v6, 1  ;;  %v1722_v60 = vadd.f32 %v1721_v44, %v1720_v26 }
 0x1e4   : > { %v1702_v61 = vadd.f32 %v1701_v63, %v1700_v6  ;;  %v1723_v57 = vrot.slane %v1722_v60, 1 }
 0x1e6   : > { %1703 = vst [vmem:[%s442_s26] sm:$0x1] %v1702_v61  ;;  %v1724_v28 = vadd.f32 %v1723_v57, %v1722_v60 }
 0x1e8   : > { %1725 = vst [vmem:[%s442_s26 + $0x1] sm:$0x1] %v1724_v28 }
 0x1f2   : > { %v2033_v36 = vpop.f32.mrb[0].mxu1 }
 0x1f3   : > { %v1659_v47 = vpop.f32.mrb[1].mxu1 }
 0x1f4   : > { %v2034_v5 = vpop.f32.mrb[2].mxu1 }
 0x1f5   : > { %v1979_v17 = vpack.c.bf16 %v2034_v5, %v2033_v36  ;;  %v1662_v33 = vpop.f32.mrb[3].mxu1 }
 0x1f6   : > { %v1974_v0 = vpack.c.bf16 %v1662_v33, %v1659_v47 }
 0x1f7   : > { %1994 = vst [vmem:[%s438_s20 + $0x8] sm:$0xff] %v1979_v17  }
 0x1f8   : > { %1975 = vst [vmem:[%s438_s20] sm:$0xff] %v1974_v0  }
 0x213   : > { %v2037_v3 = vpop.f32.mrb[4].mxu1 }
 0x214   : > { %v1675_v21 = vpop.f32.mrb[5].mxu1 }
 0x215   : > { %v2038_v30 = vpop.f32.mrb[6].mxu1 }
 0x216   : > { %v1989_v43 = vpack.c.bf16 %v2038_v30, %v2037_v3  ;;  %v1678_v32 = vpop.f32.mrb[7].mxu1 }
 0x217   : > { %v1984_v58 = vpack.c.bf16 %v1678_v32, %v1675_v21 }
 0x218   : > { %1996 = vst [vmem:[%s438_s20 + $0x18] sm:$0xff] %v1989_v43  }
 0x219   : > { %1995 = vst [vmem:[%s438_s20 + $0x10] sm:$0xff] %v1984_v58  }
 0x21a PF: > { %s21_s13 = sadd.s32 1, %s2070_s13  }
 0x21b   : > { %p18_p4 = scmp.ge.s32.totalorder %s21_s13, 4  }
 0x21d   :  { %20 = sbr.rel (!%p18_p4) target bundleno = 1 (0x1), region = 115 }

// kernel: block_down.5
= control target key start
LH: loop header
LB: loop body
LE: loop exit
PB: predicated region body
PF: predicated region fallthrough
CT: control target
= control target key end

     0   :  { %s2099_s18 = smov 0   ;;  %s2831_s0 = inlined_call_operand.vmem [shape: bf16[2,10,10,128], index: 0, kind: input, shape index: {}]   ;;  %s2832_s1 = inlined_call_operand.vmem [shape: f32[1,128], index: 1, kind: input, shape index: {}]   ;;  %s2833_s2 = inlined_call_operand.vmem [shape: f32[1,128], index: 2, kind: input, shape index: {}]   ;;  %s2834_s3 = inlined_call_operand.vmem [shape: bf16[1152,128], index: 3, kind: input, shape index: {}]   ;;  %s2835_s4 = inlined_call_operand.vmem [shape: bf16[2,8,8,128], index: 4, kind: input, shape index: {}]   ;;  %s2836_s5 = inlined_call_operand.vmem [shape: f32[2,8,8,128], index: 5, kind: output, shape index: {}]  }
   0x1 LB: > { %s1601_s19 = sadd.s32 4294967295, %s2067_s18   ;;  %p1605_p0 = scmp.ge.s32.totalorder %s2067_s18, 1  ;;  %s2067_s18 = sphi %s2099_s18, %s15_s18  }
   0x2   : > { %p197_p1 = scmp.lt.s32.totalorder %s2067_s18, 3 }
   0x4   : > { %p198_p2 = pnand %p1605_p0, %p197_p1 }
   0x5   : > { %v1989_v0 = vld [vmem:[%s2834_s3 + $0x40] sm:$0xff] (!%p198_p2)   ;;  %v1993_v4 = vld [vmem:[%s2834_s3 + $0x48] sm:$0xff] (!%p198_p2)   ;;  %v1997_v8 = vld [vmem:[%s2834_s3 + $0x50] sm:$0xff] (!%p198_p2)   ;;  %p230_p3 = scmp.lt.s32.totalorder (!%p198_p2), %s1601_s19, 1  ;;  %vm424_vm1 = vcmask (!%p198_p2), 1046528   ;;  %vm465_vm8 = vcmask (!%p198_p2), 1045504  }
   0x6   : > { %201 = sbr.rel (%p198_p2) target bundleno = 331 (0x14b), region = 40  ;;  %v1990_v1 = vld [vmem:[%s2834_s3 + $0xc0] sm:$0xff] (!%p198_p2)   ;;  %1768 = vmatprep.subr.bf16.mxu0 (!%p198_p2), %v1989_v0  ;;  %v1994_v5 = vld [vmem:[%s2834_s3 + $0xc8] sm:$0xff] (!%p198_p2)   ;;  %v1998_v9 = vld [vmem:[%s2834_s3 + $0xd0] sm:$0xff] (!%p198_p2)  }
   0x7   : > { %v1991_v2 = vld [vmem:[%s2834_s3] sm:$0xff] (!%p198_p2)   ;;  %1808 = vmatprep.subr.bf16.mxu1 (!%p198_p2), %v1990_v1  ;;  %v1995_v6 = vld [vmem:[%s2834_s3 + $0x8] sm:$0xff] (!%p198_p2)   ;;  %v1999_v10 = vld [vmem:[%s2834_s3 + $0x10] sm:$0xff] (!%p198_p2)  }
   0x8   : > { %v1992_v3 = vld [vmem:[%s2834_s3 + $0x80] sm:$0xff] (!%p198_p2)   ;;  %1769 = vmatpush3.bf16.msra.mxu0 (!%p198_p2), %v1991_v2  ;;  %v1996_v7 = vld [vmem:[%s2834_s3 + $0x88] sm:$0xff] (!%p198_p2)   ;;  %v2000_v11 = vld [vmem:[%s2834_s3 + $0x90] sm:$0xff] (!%p198_p2)  }
   0x9   : > { %1809 = vmatpush3.bf16.msra.mxu1 (!%p198_p2), %v1992_v3  ;;  %1770 = vmatprep.subr.bf16.mxu0 (!%p198_p2), %v1993_v4  ;;  %v2001_v12 = vld [vmem:[%s2834_s3 + $0x58] sm:$0xff] (!%p198_p2)   ;;  %v2005_v16 = vld [vmem:[%s2834_s3 + $0x60] sm:$0xff] (!%p198_p2)   ;;  %v2009_v20 = vld [vmem:[%s2834_s3 + $0x68] sm:$0xff] (!%p198_p2)  }
   0xa   : > { %1810 = vmatprep.subr.bf16.mxu1 (!%p198_p2), %v1994_v5  ;;  %v2002_v13 = vld [vmem:[%s2834_s3 + $0xd8] sm:$0xff] (!%p198_p2)   ;;  %v2006_v17 = vld [vmem:[%s2834_s3 + $0xe0] sm:$0xff] (!%p198_p2)   ;;  %v2010_v21 = vld [vmem:[%s2834_s3 + $0xe8] sm:$0xff] (!%p198_p2)  }
   0xb   : > { %v2003_v14 = vld [vmem:[%s2834_s3 + $0x18] sm:$0xff] (!%p198_p2)   ;;  %v2007_v18 = vld [vmem:[%s2834_s3 + $0x20] sm:$0xff] (!%p198_p2)   ;;  %v2011_v22 = vld [vmem:[%s2834_s3 + $0x28] sm:$0xff] (!%p198_p2)  }
   0xc   : > { %1771 = vmatpush3.bf16.msra.mxu0 (!%p198_p2), %v1995_v6  ;;  %v2004_v15 = vld [vmem:[%s2834_s3 + $0x98] sm:$0xff] (!%p198_p2)   ;;  %v2008_v19 = vld [vmem:[%s2834_s3 + $0xa0] sm:$0xff] (!%p198_p2)   ;;  %v2012_v23 = vld [vmem:[%s2834_s3 + $0xa8] sm:$0xff] (!%p198_p2)  }
   0xd   : > { %1811 = vmatpush3.bf16.msra.mxu1 %v1996_v7  ;;  %1772 = vmatprep.subr.bf16.mxu0 %v1997_v8  ;;  %s2888_s19 = smov (!%p230_p3, %s1601_s19), 1  ;;  %v2013_v24 = vld [vmem:[%s2834_s3 + $0x70] sm:$0xff]   ;;  %v2017_v28 = vld [vmem:[%s2834_s3 + $0x78] sm:$0xff]   ;;  %v2223_v41 = vld [vmem:[%s2832_s1] ss:$0 sm:$0xff] }
   0xe   : > { %1812 = vmatprep.subr.bf16.mxu1 %v1998_v9  ;;  %v2014_v25 = vld [vmem:[%s2834_s3 + $0xf0] sm:$0xff]   ;;  %s1980_s26 = smul.u32 80, %s2888_s19  ;;  %v2018_v29 = vld [vmem:[%s2834_s3 + $0xf8] sm:$0xff]   ;;  %v2228_v45 = vld [vmem:[%s2833_s2] ss:$0 sm:$0xff]  ;;  %s1687_s11 = sshll.u32 %s2888_s19, 5 }
   0xf   : > { %v2015_v26 = vld [vmem:[%s2834_s3 + $0x30] sm:$0xff]   ;;  %v2019_v30 = vld [vmem:[%s2834_s3 + $0x38] sm:$0xff]   ;;  %v2021_v56 = vld [vmem:[%s2834_s3 + $0x140] sm:$0xff]   ;;  %s239_s15 = scalar_lea.vmem %s2835_s4, %s1687_s11  ;;  %s1688_s16 = sshll.u32 %s2888_s19, 6 }
  0x10   : > { %1773 = vmatpush3.bf16.msra.mxu0 %v1999_v10  ;;  %v2016_v27 = vld [vmem:[%s2834_s3 + $0xb0] sm:$0xff]   ;;  %s2207_s12 = scalar_lea.vmem %s2831_s0, %s1980_s26  ;;  %v2020_v31 = vld [vmem:[%s2834_s3 + $0xb8] sm:$0xff]   ;;  %v2022_v61 = vld [vmem:[%s2834_s3 + $0x1c0] sm:$0xff]   ;;  %s244_s21 = scalar_lea.vmem %s2836_s5, %s1688_s16 }
  0x11   : > { %1813 = vmatpush3.bf16.msra.mxu1 %v2000_v11  ;;  %1774 = vmatprep.subr.bf16.mxu0 %v2001_v12  ;;  %v246_v32 = vld [vmem:[%s2207_s12] ss:$8 sps:$4 sm:$0xff]   ;;  %v247_v33 = vld [vmem:[%s2207_s12 + $0x4] sm:$0x1]  ;;  %v249_v34 = vld [vmem:[%s2207_s12 + $0xc] sm:$0x1] }
  0x12   : > { %1814 = vmatprep.subr.bf16.mxu1 %v2002_v13  ;;  %v250_v35 = vld [vmem:[%s2207_s12 + $0x10] ss:$8 sps:$4 sm:$0xff]   ;;  %v251_v36 = vld [vmem:[%s2207_s12 + $0x14] sm:$0x1]  ;;  %v266_v37 = vunpack.c.l.bf16 %v246_v32  ;;  %v267_v38 = vunpack.c.l.bf16 %v247_v33  ;;  %v268_v39 = vunpack.c.h.bf16 %v246_v32  ;;  %v269_v40 = vunpack.c.l.bf16 %v249_v34  ;;  %v2024_v33 = vld [vmem:[%s2834_s3 + $0x180] sm:$0xff]  }
  0x13   : > { %v270_v42 = vunpack.c.l.bf16 %v250_v35  ;;  %v271_v43 = vunpack.c.l.bf16 %v251_v36  ;;  %v272_v44 = vunpack.c.h.bf16 %v250_v35  ;;  %v2025_v35 = vld [vmem:[%s2834_s3 + $0x148] sm:$0xff]  }
  0x14   : > { %1775 = vmatpush3.bf16.msra.mxu0 %v2003_v14  ;;  %vm2230_vm0 = vcmp.le.f32.partialorder %v266_v37, -5e+29  ;;  %v314_v47 = vmul.f32 %v2223_v41, %v266_v37  ;;  %vm2235_vm2 = vcmp.le.f32.partialorder %v267_v38, -5e+29  ;;  %vm2239_vm3 = vcmp.le.f32.partialorder %v268_v39, -5e+29 }
  0x15   : > { %1815 = vmatpush3.bf16.msra.mxu1 %v2004_v15  ;;  %1776 = vmatprep.subr.bf16.mxu0 %v2005_v16  ;;  %vm2243_vm4 = vcmp.le.f32.partialorder %v269_v40, -5e+29  ;;  %v315_v51 = vmul.f32 %v2223_v41, %v267_v38  ;;  %v316_v52 = vmul.f32 %v2223_v41, %v268_v39  ;;  %v317_v53 = vmul.f32 %v2223_v41, %v269_v40  ;;  %vm1708_vm7 = vmneg %vm2239_vm3  ;;  %v2026_v36 = vld [vmem:[%s2834_s3 + $0x1c8] sm:$0xff]  }
  0x16   : > { %1816 = vmatprep.subr.bf16.mxu1 %v2006_v17  ;;  %v318_v54 = vmul.f32 %v2223_v41, %v270_v42  ;;  %v319_v55 = vmul.f32 %v2223_v41, %v271_v43  ;;  %vm2255_vm5 = vcmp.le.f32.partialorder %v270_v42, -5e+29  ;;  %v340_v58 = vadd.f32 %v2228_v45, %v314_v47  ;;  %vm1709_vm10 = vmneg %vm2230_vm0  ;;  %v253_v42 = vld [vmem:[%s2207_s12 + $0x1c] sm:$0x1]  ;;  %v2027_v47 = vld [vmem:[%s2834_s3 + $0x108] sm:$0xff]  }
  0x17   : > { %v341_v59 = vadd.f32 %v2228_v45, %v315_v51  ;;  %v320_v60 = vmul.f32 %v2223_v41, %v272_v44  ;;  %v342_v62 = vadd.f32 %v2228_v45, %v316_v52  ;;  %v343_v63 = vadd.f32 %v2228_v45, %v317_v53  ;;  %vm1714_vm11 = vmneg %vm2255_vm5  ;;  %v2028_v50 = vld [vmem:[%s2834_s3 + $0x188] sm:$0xff]  }
  0x18   : > { %1777 = vmatpush3.bf16.msra.mxu0 %v2007_v18  ;;  %v344_v0 = vadd.f32 %v2228_v45, %v318_v54  ;;  %v345_v1 = vadd.f32 %v2228_v45, %v319_v55  ;;  %vm2269_vm6 = vcmp.le.f32.partialorder %v271_v43, -5e+29  ;;  %v360_v3 = vmax.f32 %v340_v58, 0.0  ;;  %vm2308_vm12 = vmpackc.low %vm1708_vm7, %vm1709_vm10  ;;  %v254_v43 = vld [vmem:[%s2207_s12 + $0x20] ss:$8 sps:$4 sm:$0xff]   ;;  %v2029_v55 = vld [vmem:[%s2834_s3 + $0x150] sm:$0xff]  }
  0x19   : > { %1817 = vmatpush3.bf16.msra.mxu1 %v2008_v19  ;;  %1778 = vmatprep.subr.bf16.mxu0 %v2009_v20  ;;  %v361_v4 = vmax.f32 %v341_v59, 0.0  ;;  %v346_v5 = vadd.f32 %v2228_v45, %v320_v60  ;;  %v362_v6 = vmax.f32 %v342_v62, 0.0  ;;  %v363_v7 = vmax.f32 %v343_v63, 0.0  ;;  %vm1730_vm13 = vmpackc.low %vm1714_vm11, %vm1708_vm7  ;;  %v2031_v60 = vld [vmem:[%s2834_s3 + $0x110] sm:$0xff]  }
  0x1a   : > { %1818 = vmatprep.subr.bf16.mxu1 %v2010_v21  ;;  %v365_v8 = vmax.f32 %v345_v1, 0.0  ;;  %v380_v9 = vsel %vm2230_vm0, 0.0, %v360_v3  ;;  %vm2280_vm9 = vcmp.le.f32.partialorder %v272_v44, -5e+29  ;;  %v2286_v12 = vmax.f32 %v344_v0, 0.0 }
  0x1b   : > { %v381_v10 = vsel %vm2235_vm2, 0.0, %v361_v4  ;;  %v382_v13 = vsel %vm2239_vm3, 0.0, %v362_v6  ;;  %v383_v14 = vsel %vm2243_vm4, 0.0, %v363_v7  ;;  %v2292_v15 = vmax.f32 %v346_v5, 0.0  ;;  %vm1713_vm14 = vmneg %vm2280_vm9  ;;  %v2032_v4 = vld [vmem:[%s2834_s3 + $0x190] sm:$0xff]  }
  0x1c   : > { %1779 = vmatpush3.bf16.msra.mxu0 %v2011_v22  ;;  %v425_v16 = vrot.slane %v380_v9, 1  ;;  %v426_v17 = vrot.slane %v381_v10, 1  ;;  %v428_v18 = vrot.slane %v382_v13, 1  ;;  %v429_v19 = vrot.slane %v383_v14, 1 }
  0x1d   : > { %1819 = vmatpush3.bf16.msra.mxu1 %v2012_v23  ;;  %1780 = vmatprep.subr.bf16.mxu0 %v2013_v24  ;;  %v2299_v20 = vsel %vm2255_vm5, 0.0, %v2286_v12  ;;  %v2303_v21 = vsel %vm2269_vm6, 0.0, %v365_v8  ;;  %v466_v22 = vrot.slane %v380_v9, 2  ;;  %v467_v23 = vrot.slane %v381_v10, 2  ;;  %v2033_v8 = vld [vmem:[%s2834_s3 + $0x158] sm:$0xff]   ;;  %vm2471_vm6 = vmpackc.low %vm1713_vm14, %vm1714_vm11 }
  0x1e   : > { %1820 = vmatprep.subr.bf16.mxu1 %v2014_v25  ;;  %v2023_v25 = vld [vmem:[%s2834_s3 + $0x100] sm:$0xff]   ;;  %v1731_v32 = vpack.c.bf16 %v2286_v12, %v362_v6  ;;  %v1711_v34 = vpack.c.bf16 %v362_v6, %v360_v3  ;;  %v431_v37 = vrot.slane %v2299_v20, 1  ;;  %v432_v38 = vrot.slane %v2303_v21, 1  ;;  %v2034_v9 = vld [vmem:[%s2834_s3 + $0x1d8] sm:$0xff]  }
  0x1f   : > { %v468_v39 = vsel %vm465_vm8, %v466_v22, %v467_v23  ;;  %v273_v48 = vunpack.c.l.bf16 %v253_v42  ;;  %v274_v49 = vunpack.c.l.bf16 %v254_v43  ;;  %v276_v51 = vunpack.c.h.bf16 %v254_v43  ;;  %v2036_v23 = vld [vmem:[%s2834_s3 + $0x198] sm:$0xff]   ;;  %v255_v24 = vld [vmem:[%s2207_s12 + $0x24] sm:$0x1] }
  0x20   : > { %1781 = vmatpush3.bf16.msra.mxu0 %v2015_v26  ;;  %v427_v26 = vsel %vm424_vm1, %v425_v16, %v426_v17  ;;  %1732 = vmatprep.mubr.msk.bf16.mxu1 %vm1730_vm13, %v1731_v32  ;;  %v472_v59 = vrot.slane %v2299_v20, 2  ;;  %v473_v3 = vrot.slane %v2303_v21, 2  ;;  %v2415_v10 = vsel %vm424_vm1, %v431_v37, %v432_v38  ;;  %v2035_v17 = vld [vmem:[%s2834_s3 + $0x118] sm:$0xff]  }
  0x21   : > { %1821 = vmatpush3.bf16.msra.mxu1 %v2016_v27  ;;  %1782 = vmatprep.subr.bf16.mxu0 %v2017_v28  ;;  %v2317_v27 = vsel %vm424_vm1, %v428_v18, %v429_v19  ;;  %v469_v28 = vrot.slane %v382_v13, 2  ;;  %v321_v52 = vmul.f32 %v2223_v41, %v273_v48  ;;  %vm2362_vm15 = vcmp.le.f32.partialorder %v274_v49, -5e+29 }
  0x22   : > { %1822 = vmatprep.subr.bf16.mxu1 %v2018_v29  ;;  %v470_v29 = vrot.slane %v383_v14, 2  ;;  %v322_v54 = vmul.f32 %v2223_v41, %v274_v49  ;;  %vm1719_vm0 = vmneg %vm2362_vm15  ;;  %vm2381_vm2 = vcmp.le.f32.partialorder %v273_v48, -5e+29  ;;  %vm2397_vm4 = vcmp.le.f32.partialorder %v276_v51, -5e+29 }
  0x23   : > { %v347_v63 = vadd.f32 %v2228_v45, %v321_v52  ;;  %vm2393_vm3 = vmpackc.low %vm1719_vm0, %vm1713_vm14  ;;  %v2433_v21 = vsel %vm465_vm8, %v472_v59, %v473_v3  ;;  %v2041_v52 = vld [vmem:[%s2834_s3 + $0x168] sm:$0xff]  }
  0x24   : > { %1783 = vmatpush3.bf16.msra.mxu0 %v2019_v30  ;;  %v457_v30 = vpack.c.bf16 %v2317_v27, %v427_v26  ;;  %v2347_v40 = vsel %vm465_vm8, %v469_v28, %v470_v29  ;;  %v348_v0 = vadd.f32 %v2228_v45, %v322_v54  ;;  %v257_v26 = vld [vmem:[%s2207_s12 + $0x2c] sm:$0x1]  ;;  %v275_v28 = vunpack.c.l.bf16 %v255_v24  ;;  %vm1718_vm10 = vmneg %vm2397_vm4 }
  0x25   : > { %1823 = vmatpush3.bf16.msra.mxu1 %v2020_v31  ;;  %1848 = vmatprep.subr.bf16.mxu0 %v2021_v56  ;;  %v2329_v31 = vsel %vm2280_vm9, 0.0, %v2292_v15  ;;  %v498_v46 = vpack.c.bf16 %v2347_v40, %v468_v39  ;;  %v2030_v56 = vld [vmem:[%s2834_s3 + $0x1d0] sm:$0xff]   ;;  %v367_v6 = vmax.f32 %v347_v63, 0.0  ;;  %v2043_v63 = vld [vmem:[%s2834_s3 + $0x128] sm:$0xff]   ;;  %vm2583_vm14 = vmpackc.low %vm1718_vm10, %vm1719_vm0 }
  0x26   : > { %1888 = vmatprep.subr.bf16.mxu1 %v2022_v61  ;;  %1209 = vmatprep.mubr.bf16.mxu0 %v457_v30  ;;  %v434_v44 = vrot.slane %v2329_v31, 1  ;;  %v475_v58 = vrot.slane %v2329_v31, 2  ;;  %v324_v61 = vmul.f32 %v2223_v41, %v276_v51  ;;  %v2406_v7 = vmax.f32 %v348_v0, 0.0  ;;  %v258_v30 = vld [vmem:[%s2207_s12 + $0x30] ss:$8 sps:$4 sm:$0xff]   ;;  %v2037_v31 = vld [vmem:[%s2834_s3 + $0x160] sm:$0xff]  }
  0x27   : > { %1712 = vmatmul.mubr.msk.bf16.vlgmr.msra.gmra.mrb[0].mxu0 %vm2308_vm12, %v1711_v34  ;;  %v387_v13 = vsel %vm2381_vm2, 0.0, %v367_v6  ;;  %v2038_v34 = vld [vmem:[%s2834_s3 + $0x1e0] sm:$0xff]   ;;  %vm2483_vm7 = vcmp.le.f32.partialorder %v275_v28, -5e+29  ;;  %v323_v57 = vmul.f32 %v2223_v41, %v275_v28  ;;  %v278_v43 = vunpack.c.l.bf16 %v258_v30  ;;  %v2058_v28 = vld [vmem:[%s2834_s3 + $0x228] sm:$0xff]  }
  0x28   : > { %1849 = vmatpush3.bf16.msra.mxu0 %v2023_v25  ;;  %1275 = vmatmul.mubr.bf16.vlgmr.msra.gmra.mrb[0].mxu1 %v498_v46  ;;  %v350_v5 = vadd.f32 %v2228_v45, %v324_v61  ;;  %v2422_v14 = vsel %vm2362_vm15, 0.0, %v2406_v7  ;;  %v1736_v16 = vpack.c.bf16 %v2406_v7, %v2292_v15  ;;  %v435_v19 = vrot.slane %v387_v13, 1  ;;  %v2040_v51 = vld [vmem:[%s2834_s3 + $0x1a0] sm:$0xff]  }
  0x29   : > { %1850 = vmatprep.subr.bf16.mxu0 %v2025_v35  ;;  %1889 = vmatpush3.bf16.msra.mxu1 %v2024_v33  ;;  %v437_v20 = vrot.slane %v2422_v14, 1  ;;  %v476_v22 = vrot.slane %v387_v13, 2  ;;  %v2443_v25 = vpack.c.bf16 %v2292_v15, %v2286_v12  ;;  %v478_v33 = vrot.slane %v2422_v14, 2  ;;  %v2044_v13 = vld [vmem:[%s2834_s3 + $0x1a8] sm:$0xff]   ;;  %v263_v61 = vld [vmem:[%s2207_s12 + $0x44] sm:$0x1] }
  0x2a   : > { %1890 = vmatprep.subr.bf16.mxu1 %v2026_v36  ;;  %v2429_v18 = vmax.f32 %v350_v5, 0.0  ;;  %1737 = vmatprep.mubr.msk.bf16.mxu1 %vm2393_vm3, %v1736_v16  ;;  %v2456_v32 = vsel %vm424_vm1, %v434_v44, %v435_v19  ;;  %v277_v15 = vunpack.c.l.bf16 %v257_v26  ;;  %v2039_v44 = vld [vmem:[%s2834_s3 + $0x120] sm:$0xff]   ;;  %v349_v46 = vadd.f32 %v2228_v45, %v323_v57  ;;  %v2045_v26 = vld [vmem:[%s2834_s3 + $0x170] sm:$0xff]  }
  0x2b   : > { %v2460_v12 = vsel %vm465_vm8, %v475_v58, %v476_v22  ;;  %v2477_v36 = vpack.c.bf16 %v2456_v32, %v2415_v10  ;;  %vm2504_vm9 = vcmp.le.f32.partialorder %v278_v43, -5e+29  ;;  %v259_v22 = vld [vmem:[%s2207_s12 + $0x34] sm:$0x1] }
  0x2c   : > { %1851 = vmatpush3.bf16.msra.mxu0 %v2027_v47  ;;  %v2449_v29 = vsel %vm2397_vm4, 0.0, %v2429_v18  ;;  %v2481_v37 = vpack.c.bf16 %v2460_v12, %v2433_v21  ;;  %vm2488_vm5 = vcmp.le.f32.partialorder %v277_v15, -5e+29  ;;  %v325_v39 = vmul.f32 %v2223_v41, %v277_v15  ;;  %vm1724_vm11 = vmneg %vm2504_vm9  ;;  %v2046_v15 = vld [vmem:[%s2834_s3 + $0x1f0] sm:$0xff]  }
  0x2d   : > { %1852 = vmatprep.subr.bf16.mxu0 %v2029_v55  ;;  %1891 = vmatpush3.bf16.msra.mxu1 %v2028_v50  ;;  %v440_v42 = vrot.slane %v2449_v29, 1  ;;  %v280_v47 = vunpack.c.h.bf16 %v258_v30  ;;  %v326_v50 = vmul.f32 %v2223_v41, %v278_v43  ;;  %v369_v54 = vmax.f32 %v349_v46, 0.0  ;;  %vm2545_vm13 = vmpackc.low %vm1724_vm11, %vm1718_vm10 }
  0x2e   : > { %1892 = vmatprep.subr.bf16.mxu1 %v2030_v56  ;;  %1217 = vmatprep.mubr.bf16.mxu0 %v2477_v36  ;;  %v351_v48 = vadd.f32 %v2228_v45, %v325_v39  ;;  %v481_v55 = vrot.slane %v2449_v29, 2  ;;  %v2589_v29 = vpack.c.bf16 %v2429_v18, %v2406_v7  ;;  %v2047_v39 = vld [vmem:[%s2834_s3 + $0x130] sm:$0xff]  }
  0x2f   : > { %1717 = vmatmul.mubr.msk.bf16.gmra.mrb[4].mxu0 %vm2471_vm6, %v2443_v25  ;;  %v328_v56 = vmul.f32 %v2223_v41, %v280_v47  ;;  %v352_v59 = vadd.f32 %v2228_v45, %v326_v50  ;;  %vm2525_vm12 = vcmp.le.f32.partialorder %v280_v47, -5e+29  ;;  %v389_v62 = vsel %vm2483_vm7, 0.0, %v369_v54 }
  0x30   : > { %1853 = vmatpush3.bf16.msra.mxu0 %v2031_v60  ;;  %1283 = vmatmul.mubr.bf16.gmra.mrb[4].mxu1 %v2481_v37  ;;  %v371_v58 = vmax.f32 %v351_v48, 0.0  ;;  %v2042_v60 = vld [vmem:[%s2834_s3 + $0x1e8] sm:$0xff]   ;;  %v438_v3 = vrot.slane %v389_v62, 1  ;;  %v479_v5 = vrot.slane %v389_v62, 2  ;;  %vm1723_vm2 = vmneg %vm2525_vm12 }
  0x31   : > { %1854 = vmatprep.subr.bf16.mxu0 %v2033_v8  ;;  %1893 = vmatpush3.bf16.msra.mxu1 %v2032_v4  ;;  %v354_v0 = vadd.f32 %v2228_v45, %v328_v56  ;;  %v2537_v4 = vmax.f32 %v352_v59, 0.0  ;;  %v2052_v8 = vld [vmem:[%s2834_s3 + $0x1b8] sm:$0xff]  }
  0x32   : > { %1894 = vmatprep.subr.bf16.mxu1 %v2034_v9  ;;  %v391_v1 = vsel %vm2488_vm5, 0.0, %v371_v58  ;;  %v2555_v16 = vsel %vm424_vm1, %v437_v20, %v438_v3  ;;  %v2560_v19 = vsel %vm465_vm8, %v478_v33, %v479_v5  ;;  %v279_v33 = vunpack.c.l.bf16 %v259_v22  ;;  %v2049_v58 = vld [vmem:[%s2834_s3 + $0x178] sm:$0xff]   ;;  %vm2709_vm5 = vmpackc.low %vm1723_vm2, %vm1724_vm11 }
  0x33   : > { %v441_v6 = vrot.slane %v391_v1, 1  ;;  %v482_v9 = vrot.slane %v391_v1, 2  ;;  %v2564_v24 = vmax.f32 %v354_v0, 0.0  ;;  %v2575_v20 = vsel %vm2504_vm9, 0.0, %v2537_v4  ;;  %v2050_v1 = vld [vmem:[%s2834_s3 + $0x1f8] sm:$0xff]  }
  0x34   : > { %1855 = vmatpush3.bf16.msra.mxu0 %v2035_v17  ;;  %v1741_v17 = vpack.c.bf16 %v2537_v4, %v2429_v18  ;;  %v327_v38 = vmul.f32 %v2223_v41, %v279_v33  ;;  %vm2628_vm15 = vcmp.le.f32.partialorder %v279_v33, -5e+29 }
  0x35   : > { %1895 = vmatpush3.bf16.msra.mxu1 %v2036_v23  ;;  %1856 = vmatprep.subr.bf16.mxu0 %v2037_v31  ;;  %v261_v23 = vld [vmem:[%s2207_s12 + $0x3c] sm:$0x1]  ;;  %v2570_v14 = vsel %vm424_vm1, %v440_v42, %v441_v6  ;;  %v2592_v30 = vsel %vm465_vm8, %v481_v55, %v482_v9  ;;  %v2595_v31 = vld [vmem:[%s2207_s12 + $0x40] ss:$8 sps:$4 sm:$0xff]   ;;  %v394_v11 = vsel %vm2525_vm12, 0.0, %v2564_v24  ;;  %v2048_v42 = vld [vmem:[%s2834_s3 + $0x1b0] sm:$0xff]  }
  0x36   : > { %1896 = vmatprep.subr.bf16.mxu1 %v2038_v34  ;;  %v2599_v53 = vpack.c.bf16 %v2570_v14, %v2555_v16  ;;  %1742 = vmatprep.mubr.msk.bf16.mxu1 %vm2545_vm13, %v1741_v17  ;;  %v2605_v2 = vpack.c.bf16 %v2592_v30, %v2560_v19  ;;  %v281_v7 = vunpack.c.l.bf16 %v261_v23  ;;  %v282_v18 = vunpack.c.l.bf16 %v2595_v31  ;;  %v2051_v6 = vld [vmem:[%s2834_s3 + $0x138] sm:$0xff]   ;;  %v2053_v23 = vld [vmem:[%s2834_s3 + $0x200] sm:$0xff]  }
  0x37   : > { %v443_v34 = vrot.slane %v2575_v20, 1  ;;  %v353_v48 = vadd.f32 %v2228_v45, %v327_v38  ;;  %v446_v54 = vrot.slane %v394_v11, 1  ;;  %v487_v56 = vrot.slane %v394_v11, 2  ;;  %v265_v38 = vld [vmem:[%s2207_s12 + $0x4c] sm:$0x1] }
  0x38   : > { %1857 = vmatpush3.bf16.msra.mxu0 %v2039_v44  ;;  %1225 = vmatprep.mubr.bf16.mxu0 %v2599_v53  ;;  %v329_v57 = vmul.f32 %v2223_v41, %v281_v7  ;;  %vm2632_vm0 = vcmp.le.f32.partialorder %v282_v18, -5e+29  ;;  %v330_v46 = vmul.f32 %v2223_v41, %v282_v18  ;;  %vm2639_vm3 = vcmp.le.f32.partialorder %v281_v7, -5e+29 }
  0x39   : > { %1858 = vmatprep.subr.bf16.mxu0 %v2041_v52  ;;  %1897 = vmatpush3.bf16.msra.mxu1 %v2040_v51  ;;  %vm1743_vm4 = vmneg %vm2632_vm0  ;;  %v284_v51 = vunpack.c.h.bf16 %v2595_v31  ;;  %v484_v52 = vrot.slane %v2575_v20, 2  ;;  %v373_v59 = vmax.f32 %v353_v48, 0.0  ;;  %v2697_v7 = vpack.c.bf16 %v2564_v24, %v2537_v4 }
  0x3a   : > { %1898 = vmatprep.subr.bf16.mxu1 %v2042_v60  ;;  %1291 = vmatmul.mubr.bf16.gmra.mrb[8].mxu1 %v2605_v2  ;;  %v355_v50 = vadd.f32 %v2228_v45, %v329_v57  ;;  %v356_v55 = vadd.f32 %v2228_v45, %v330_v46  ;;  %vm2659_vm7 = vmpackc.low %vm1743_vm4, %vm1723_vm2  ;;  %v283_v57 = vunpack.c.l.bf16 %v263_v61  ;;  %v520_v11 = vpack.c.bf16 %v2415_v10, %v2317_v27  ;;  %v2054_v46 = vld [vmem:[%s2834_s3 + $0x208] sm:$0xff]  }
  0x3b   : > { %1722 = vmatmul.mubr.msk.bf16.gmra.mrb[8].mxu0 %vm2583_vm14, %v2589_v29  ;;  %v393_v3 = vsel %vm2628_vm15, 0.0, %v373_v59  ;;  %vm2736_vm9 = vcmp.le.f32.partialorder %v284_v51, -5e+29  ;;  %v533_v10 = vpack.c.bf16 %v2560_v19, %v2460_v12  ;;  %v2055_v12 = vld [vmem:[%s2834_s3 + $0x210] sm:$0xff]   ;;  %v521_v59 = vpack.c.bf16 %v2555_v16, %v2456_v32 }
  0x3c   : > { %1859 = vmatpush3.bf16.msra.mxu0 %v2043_v63  ;;  %v375_v60 = vmax.f32 %v355_v50, 0.0  ;;  %v332_v63 = vmul.f32 %v2223_v41, %v284_v51  ;;  %v2664_v0 = vmax.f32 %v356_v55, 0.0  ;;  %vm305_vm10 = vcmp.le.f32.partialorder %v283_v57, -5e+29 }
  0x3d   : > { %1899 = vmatpush3.bf16.msra.mxu1 %v2044_v13  ;;  %1860 = vmatprep.subr.bf16.mxu0 %v2045_v26  ;;  %v444_v13 = vrot.slane %v393_v3, 1  ;;  %v485_v26 = vrot.slane %v393_v3, 2 }
  0x3e   : > { %1900 = vmatprep.subr.bf16.mxu1 %v2046_v15  ;;  %v395_v5 = vsel %vm2639_vm3, 0.0, %v375_v60  ;;  %v2680_v9 = vadd.f32 %v2228_v45, %v332_v63  ;;  %v1746_v22 = vpack.c.bf16 %v2664_v0, %v2564_v24  ;;  %v532_v24 = vpack.c.bf16 %v2433_v21, %v2347_v40 }
  0x3f   : > { %v447_v17 = vrot.slane %v395_v5, 1  ;;  %v488_v20 = vrot.slane %v395_v5, 2  ;;  %v2688_v31 = vsel %vm424_vm1, %v443_v34, %v444_v13  ;;  %v2714_v34 = vsel %vm465_vm8, %v484_v52, %v485_v26  ;;  %v2057_v5 = vld [vmem:[%s2834_s3 + $0x220] sm:$0xff]   ;;  %v2060_v13 = vld [vmem:[%s2834_s3 + $0x238] sm:$0xff]  }
  0x40   : > { %1861 = vmatpush3.bf16.msra.mxu0 %v2047_v39  ;;  %1747 = vmatprep.mubr.msk.bf16.mxu1 %vm2659_vm7, %v1746_v22  ;;  %v285_v40 = vunpack.c.l.bf16 %v265_v38  ;;  %v378_v21 = vmax.f32 %v2680_v9, 0.0  ;;  %v534_v32 = vpack.c.bf16 %v2714_v34, %v2592_v30  ;;  %v522_v30 = vpack.c.bf16 %v2688_v31, %v2570_v14  ;;  %v2059_v14 = vld [vmem:[%s2834_s3 + $0x230] sm:$0xff]  }
  0x41   : > { %1901 = vmatpush3.bf16.msra.mxu1 %v2048_v42  ;;  %1862 = vmatprep.subr.bf16.mxu0 %v2049_v58  ;;  %v2691_v33 = vsel %vm424_vm1, %v446_v54, %v447_v17  ;;  %v2717_v4 = vsel %vm465_vm8, %v487_v56, %v488_v20  ;;  %v331_v42 = vmul.f32 %v2223_v41, %v283_v57 }
  0x42   : > { %1902 = vmatprep.subr.bf16.mxu1 %v2050_v1  ;;  %v2701_v18 = vpack.c.bf16 %v2691_v33, %v2688_v31  ;;  %v2723_v49 = vpack.c.bf16 %v2717_v4, %v2714_v34  ;;  %v333_v43 = vmul.f32 %v2223_v41, %v285_v40  ;;  %vm307_vm11 = vcmp.le.f32.partialorder %v285_v40, -5e+29 }
  0x43   : > { %v357_v47 = vadd.f32 %v2228_v45, %v331_v42  ;;  %v398_v41 = vsel %vm2736_vm9, 0.0, %v378_v21 }
  0x44   : > { %1863 = vmatpush3.bf16.msra.mxu0 %v2051_v6  ;;  %1233 = vmatprep.mubr.bf16.mxu0 %v2701_v18  ;;  %v359_v27 = vadd.f32 %v2228_v45, %v333_v43  ;;  %v556_v45 = vrot.slane %v398_v41, 2  ;;  %v547_v55 = vrot.slane %v398_v41, 1 }
  0x45   : > { %1903 = vmatpush3.bf16.msra.mxu1 %v2052_v8  ;;  %1940 = vmatprep.subr.bf16.mxu0 %v2053_v23  ;;  %v377_v48 = vmax.f32 %v357_v47, 0.0  ;;  %v1766_v8 = vpack.c.bf16 %v378_v21, %v2664_v0 }
  0x46   : > { %1964 = vmatprep.subr.bf16.mxu1 %v2053_v23  ;;  %1727 = vmatmul.mubr.msk.bf16.gmra.mrb[12].mxu0 %vm2709_vm5, %v2697_v7  ;;  %v379_v50 = vmax.f32 %v359_v27, 0.0 }
  0x47   : > { %1299 = vmatmul.mubr.bf16.gmra.mrb[12].mxu1 %v2723_v49  ;;  %1339 = vmatprep.mubr.bf16.mxu0 %v532_v24  ;;  %v397_v19 = vsel %vm305_vm10, 0.0, %v377_v48 }
  0x48   : > { %1404 = vmatprep.mubr.bf16.mxu1 %v2477_v36  ;;  %v396_v36 = vsel %vm2632_vm0, 0.0, %v2664_v0  ;;  %v399_v54 = vsel %vm307_vm11, 0.0, %v379_v50  ;;  %v517_v56 = vrot.slane %v397_v19, 1 }
  0x49   : > { %v516_v51 = vrot.slane %v396_v36, 1  ;;  %v528_v52 = vrot.slane %v396_v36, 2  ;;  %v557_v35 = vrot.slane %v399_v54, 2  ;;  %v548_v58 = vrot.slane %v399_v54, 1 }
  0x4b   : > { %v558_v62 = vsel %vm465_vm8, %v556_v45, %v557_v35  ;;  %v518_v63 = vsel %vm424_vm1, %v516_v51, %v517_v56  ;;  %v549_v3 = vsel %vm424_vm1, %v547_v55, %v548_v58  ;;  %vm1763_vm1 = vmneg %vm2736_vm9 }
  0x4c   : > { %v551_v16 = vpack.c.bf16 %v549_v3, %v518_v63  ;;  %v523_v6 = vpack.c.bf16 %v518_v63, %v2691_v33 }
  0x4e   : > { %1340 = vmatmul.mubr.bf16.vlgmr.msra.gmra.mrb[16].mxu0 %v520_v11 }
  0x4f   : > { %1752 = vmatmul.mubr.msk.bf16.vlgmr.msra.gmra.mrb[16].mxu1 %vm2471_vm6, %v2443_v25  ;;  %1941 = vmatpush3.bf16.msra.mxu0 %v2053_v23  ;;  %v529_v25 = vrot.slane %v397_v19, 2 }
  0x50   : > { %1972 = vmatpush3.bf16.msra.mxu1 %v2053_v23  ;;  %1942 = vmatprep.subr.bf16.mxu0 %v2054_v46 }
  0x51   : > { %1965 = vmatprep.subr.bf16.mxu1 %v2054_v46  ;;  %1347 = vmatprep.mubr.bf16.mxu0 %v533_v10  ;;  %v530_v60 = vsel %vm465_vm8, %v528_v52, %v529_v25  ;;  %vm1765_vm8 = vmpackc.low %vm1763_vm1, %vm1743_vm4 }
  0x52   : > { %1412 = vmatprep.mubr.bf16.mxu1 %v2599_v53  ;;  %v2056_v53 = vld [vmem:[%s2834_s3 + $0x218] sm:$0xff]   ;;  %v560_v1 = vpack.c.bf16 %v558_v62, %v530_v60 }
  0x53   : > { %1943 = vmatpush3.bf16.msra.mxu0 %v2054_v46 }
  0x54   : > { %1973 = vmatpush3.bf16.msra.mxu1 %v2054_v46  ;;  %1944 = vmatprep.subr.bf16.mxu0 %v2055_v12 }
  0x55   : > { %1966 = vmatprep.subr.bf16.mxu1 %v2055_v12 }
  0x56   : > { %1348 = vmatmul.mubr.bf16.gmra.mrb[20].mxu0 %v521_v59 }
  0x57   : > { %1757 = vmatmul.mubr.msk.bf16.gmra.mrb[20].mxu1 %vm2583_vm14, %v2589_v29  ;;  %1945 = vmatpush3.bf16.msra.mxu0 %v2055_v12  ;;  %v535_v29 = vpack.c.bf16 %v530_v60, %v2717_v4 }
  0x58   : > { %1974 = vmatpush3.bf16.msra.mxu1 %v2055_v12  ;;  %1946 = vmatprep.subr.bf16.mxu0 %v2056_v53 }
  0x59   : > { %1967 = vmatprep.subr.bf16.mxu1 %v2056_v53  ;;  %1355 = vmatprep.mubr.bf16.mxu0 %v534_v32 }
  0x5a   : > { %1420 = vmatprep.mubr.bf16.mxu1 %v2701_v18 }
  0x5b   : > { %1947 = vmatpush3.bf16.msra.mxu0 %v2056_v53 }
  0x5c   : > { %1975 = vmatpush3.bf16.msra.mxu1 %v2056_v53  ;;  %1948 = vmatprep.subr.bf16.mxu0 %v2057_v5 }
  0x5d   : > { %1968 = vmatprep.subr.bf16.mxu1 %v2057_v5 }
  0x5e   : > { %1356 = vmatmul.mubr.bf16.gmra.mrb[24].mxu0 %v522_v30 }
  0x5f   : > { %1762 = vmatmul.mubr.msk.bf16.gmra.mrb[24].mxu1 %vm2709_vm5, %v2697_v7  ;;  %1949 = vmatpush3.bf16.msra.mxu0 %v2057_v5 }
  0x60   : > { %1976 = vmatpush3.bf16.msra.mxu1 %v2057_v5  ;;  %1950 = vmatprep.subr.bf16.mxu0 %v2058_v28 }
  0x61   : > { %1969 = vmatprep.subr.bf16.mxu1 %v2058_v28  ;;  %1363 = vmatprep.mubr.bf16.mxu0 %v535_v29 }
  0x62   : > { %1428 = vmatprep.mubr.bf16.mxu1 %v551_v16 }
  0x63   : > { %1951 = vmatpush3.bf16.msra.mxu0 %v2058_v28 }
  0x64   : > { %1977 = vmatpush3.bf16.msra.mxu1 %v2058_v28  ;;  %1952 = vmatprep.subr.bf16.mxu0 %v2059_v14 }
  0x65   : > { %1970 = vmatprep.subr.bf16.mxu1 %v2059_v14 }
  0x66   : > { %1364 = vmatmul.mubr.bf16.gmra.mrb[28].mxu0 %v523_v6 }
  0x67   : > { %1767 = vmatmul.mubr.msk.bf16.gmra.mrb[28].mxu1 %vm1765_vm8, %v1766_v8  ;;  %1953 = vmatpush3.bf16.msra.mxu0 %v2059_v14 }
  0x68   : > { %1978 = vmatpush3.bf16.msra.mxu1 %v2059_v14  ;;  %1954 = vmatprep.subr.bf16.mxu0 %v2060_v13 }
  0x69   : > { %1971 = vmatprep.subr.bf16.mxu1 %v2060_v13  ;;  %1956 = vmatprep.mubr.bf16.mxu0 %v2481_v37 }
  0x6a   : > { %1960 = vmatprep.mubr.bf16.mxu1 %v2723_v49 }
  0x6b   : > { %1955 = vmatpush3.bf16.msra.mxu0 %v2060_v13 }
  0x6c   : > { %1979 = vmatpush3.bf16.msra.mxu1 %v2060_v13 }
  0x6e   : > { %1957 = vmatmul.mubr.bf16.vlgmr.msra.gmra.mrb[32].mxu0 %v2605_v2 }
  0x6f   : > { %1961 = vmatmul.mubr.bf16.vlgmr.msra.gmra.mrb[32].mxu1 %v560_v1 }
  0xfa   : > { %v1784_v44 = vpop.f32.mrb[0].mxu0 }
  0xfb   : > { %v1785_v0 = vpop.f32.mrb[1].mxu0  ;;  %v1824_v9 = vpop.f32.mrb[0].mxu1 }
  0xfc   : > { %v1786_v17 = vadd.f32 %v1785_v0, %v1784_v44  ;;  %v1787_v22 = vpop.f32.mrb[2].mxu0  ;;  %v1825_v23 = vpop.f32.mrb[1].mxu1 }
  0xfd   : > { %v1788_v26 = vpop.f32.mrb[3].mxu0  ;;  %v1826_v20 = vadd.f32 %v1825_v23, %v1824_v9  ;;  %v1827_v31 = vpop.f32.mrb[2].mxu1 }
  0xfe   : > { %v1789_v33 = vadd.f32 %v1788_v26, %v1787_v22  ;;  %v1828_v7 = vpop.f32.mrb[3].mxu1 }
  0xff   : > { %v1277_v18 = vadd.f32 %v1826_v20, %v1786_v17  ;;  %v1829_v37 = vadd.f32 %v1828_v7, %v1827_v31 }
 0x101   : > { %v1280_v15 = vadd.f32 %v1829_v37, %v1789_v33 }
 0x102   : > { %v1790_v4 = vpop.f32.mrb[4].mxu0 }
 0x103   : > { %v1830_v34 = vpop.f32.mrb[4].mxu1  ;;  %v1791_v49 = vpop.f32.mrb[5].mxu0 }
 0x104   : > { %v1831_v24 = vpop.f32.mrb[5].mxu1  ;;  %v1792_v38 = vadd.f32 %v1791_v49, %v1790_v4  ;;  %v1793_v57 = vpop.f32.mrb[6].mxu0 }
 0x105   : > { %v1832_v2 = vadd.f32 %v1831_v24, %v1830_v34  ;;  %v1833_v61 = vpop.f32.mrb[6].mxu1  ;;  %v1794_v21 = vpop.f32.mrb[7].mxu0 }
 0x106   : > { %v1834_v40 = vpop.f32.mrb[7].mxu1  ;;  %v1795_v42 = vadd.f32 %v1794_v21, %v1793_v57 }
 0x107   : > { %v1835_v11 = vadd.f32 %v1834_v40, %v1833_v61  ;;  %v1285_v39 = vadd.f32 %v1832_v2, %v1792_v38 }
 0x109   : > { %v1288_v43 = vadd.f32 %v1835_v11, %v1795_v42 }
 0x10d   : > { %v1836_v36 = vpop.f32.mrb[8].mxu1 }
 0x10e   : > { %v1796_v46 = vpop.f32.mrb[8].mxu0  ;;  %v1837_v47 = vpop.f32.mrb[9].mxu1 }
 0x10f   : > { %v1797_v27 = vpop.f32.mrb[9].mxu0  ;;  %v1838_v10 = vadd.f32 %v1837_v47, %v1836_v36  ;;  %v1839_v41 = vpop.f32.mrb[10].mxu1 }
 0x110   : > { %v1798_v48 = vadd.f32 %v1797_v27, %v1796_v46  ;;  %v1799_v50 = vpop.f32.mrb[10].mxu0  ;;  %v1840_v51 = vpop.f32.mrb[11].mxu1 }
 0x111   : > { %v1800_v52 = vpop.f32.mrb[11].mxu0  ;;  %v1841_v45 = vadd.f32 %v1840_v51, %v1839_v41 }
 0x112   : > { %v1293_v12 = vadd.f32 %v1838_v10, %v1798_v48  ;;  %v1801_v19 = vadd.f32 %v1800_v52, %v1799_v50 }
 0x114   : > { %v1296_v54 = vadd.f32 %v1841_v45, %v1801_v19 }
 0x119   : > { %v1802_v55 = vpop.f32.mrb[12].mxu0 }
 0x11a   : > { %v1842_v25 = vpop.f32.mrb[12].mxu1  ;;  %v1803_v35 = vpop.f32.mrb[13].mxu0 }
 0x11b   : > { %v1843_v56 = vpop.f32.mrb[13].mxu1  ;;  %v1804_v58 = vadd.f32 %v1803_v35, %v1802_v55  ;;  %v1805_v60 = vpop.f32.mrb[14].mxu0 }
 0x11c   : > { %v1844_v59 = vadd.f32 %v1843_v56, %v1842_v25  ;;  %v1845_v62 = vpop.f32.mrb[14].mxu1  ;;  %v1806_v63 = vpop.f32.mrb[15].mxu0 }
 0x11d   : > { %v1846_v53 = vpop.f32.mrb[15].mxu1  ;;  %v1807_v3 = vadd.f32 %v1806_v63, %v1805_v60 }
 0x11e   : > { %v2808_v1 = vadd.f32 %v1844_v59, %v1804_v58  ;;  %v1847_v32 = vadd.f32 %v1846_v53, %v1845_v62 }
 0x120   : > { %v2810_v16 = vadd.f32 %v1847_v32, %v1807_v3  ;;  %v1705_v32 = vld [vmem:[%s239_s15 + $0x8] sm:$0xff]  }
 0x121   : > { %v1864_v5 = vpop.f32.mrb[16].mxu0 }
 0x122   : > { %v1904_v30 = vpop.f32.mrb[16].mxu1  ;;  %v1865_v28 = vpop.f32.mrb[17].mxu0 }
 0x123   : > { %v1905_v29 = vpop.f32.mrb[17].mxu1  ;;  %v1866_v14 = vadd.f32 %v1865_v28, %v1864_v5  ;;  %v1867_v8 = vpop.f32.mrb[18].mxu0  ;;  %v1707_v5 = vld [vmem:[%s239_s15 + $0x18] sm:$0xff]   ;;  %v1706_v28 = vld [vmem:[%s239_s15 + $0x10] sm:$0xff]  }
 0x124   : > { %v1906_v6 = vadd.f32 %v1905_v29, %v1904_v30  ;;  %v1907_v13 = vpop.f32.mrb[18].mxu1  ;;  %v1868_v44 = vpop.f32.mrb[19].mxu0  ;;  %v1690_v30 = vld [vmem:[%s239_s15] sm:$0xff]  }
 0x125   : > { %v1908_v0 = vpop.f32.mrb[19].mxu1  ;;  %v1342_v9 = vadd.f32 %v1866_v14, %v1277_v18  ;;  %v1869_v17 = vadd.f32 %v1868_v44, %v1867_v8  ;;  %v1703_v8 = vunpack.c.l.bf16 %v1707_v5 }
 0x126   : > { %v1909_v22 = vadd.f32 %v1908_v0, %v1907_v13  ;;  %v1691_v0 = vunpack.c.l.bf16 %v1690_v30 }
 0x127   : > { %v1345_v23 = vadd.f32 %v1869_v17, %v1280_v15  ;;  %v2812_v26 = vadd.f32 %v1906_v6, %v1342_v9  ;;  %v1695_v6 = vunpack.c.l.bf16 %v1705_v32  ;;  %v1699_v9 = vunpack.c.l.bf16 %v1706_v28 }
 0x129   : > { %v1870_v20 = vpop.f32.mrb[20].mxu0  ;;  %v2814_v33 = vadd.f32 %v1909_v22, %v1345_v23 }
 0x12a   : > { %v1910_v31 = vpop.f32.mrb[20].mxu1  ;;  %v1871_v7 = vpop.f32.mrb[21].mxu0 }
 0x12b   : > { %v1911_v37 = vpop.f32.mrb[21].mxu1  ;;  %v1872_v34 = vadd.f32 %v1871_v7, %v1870_v20  ;;  %v1873_v24 = vpop.f32.mrb[22].mxu0  ;;  %v1704_v7 = vunpack.c.h.bf16 %v1707_v5 }
 0x12c   : > { %v1912_v4 = vadd.f32 %v1911_v37, %v1910_v31  ;;  %v1913_v49 = vpop.f32.mrb[22].mxu1  ;;  %v1874_v2 = vpop.f32.mrb[23].mxu0  ;;  %v1696_v31 = vunpack.c.h.bf16 %v1705_v32 }
 0x12d   : > { %v1914_v61 = vpop.f32.mrb[23].mxu1  ;;  %v1350_v38 = vadd.f32 %v1872_v34, %v1285_v39  ;;  %v1875_v57 = vadd.f32 %v1874_v2, %v1873_v24  ;;  %v1692_v24 = vunpack.c.h.bf16 %v1690_v30 }
 0x12e   : > { %v1915_v18 = vadd.f32 %v1914_v61, %v1913_v49  ;;  %v1700_v49 = vunpack.c.h.bf16 %v1706_v28 }
 0x12f   : > { %v1353_v40 = vadd.f32 %v1875_v57, %v1288_v43  ;;  %v1415_v21 = vadd.f32 %v1912_v4, %v1350_v38 }
 0x131   : > { %v1876_v15 = vpop.f32.mrb[24].mxu0  ;;  %v1418_v42 = vadd.f32 %v1915_v18, %v1353_v40 }
 0x132   : > { %v1916_v11 = vpop.f32.mrb[24].mxu1  ;;  %v1877_v36 = vpop.f32.mrb[25].mxu0 }
 0x133   : > { %v1917_v46 = vpop.f32.mrb[25].mxu1  ;;  %v1878_v47 = vadd.f32 %v1877_v36, %v1876_v15  ;;  %v1879_v10 = vpop.f32.mrb[26].mxu0 }
 0x134   : > { %v1918_v27 = vadd.f32 %v1917_v46, %v1916_v11  ;;  %v1919_v41 = vpop.f32.mrb[26].mxu1  ;;  %v1880_v48 = vpop.f32.mrb[27].mxu0 }
 0x135   : > { %v1920_v50 = vpop.f32.mrb[27].mxu1  ;;  %v1358_v51 = vadd.f32 %v1878_v47, %v1293_v12  ;;  %v1881_v52 = vadd.f32 %v1880_v48, %v1879_v10 }
 0x136   : > { %v1921_v45 = vadd.f32 %v1920_v50, %v1919_v41 }
 0x137   : > { %v1361_v39 = vadd.f32 %v1881_v52, %v1296_v54  ;;  %v1423_v19 = vadd.f32 %v1918_v27, %v1358_v51 }
 0x139   : > { %v1882_v43 = vpop.f32.mrb[28].mxu0  ;;  %v1426_v25 = vadd.f32 %v1921_v45, %v1361_v39 }
 0x13a   : > { %v1922_v55 = vpop.f32.mrb[28].mxu1  ;;  %v1883_v35 = vpop.f32.mrb[29].mxu0 }
 0x13b   : > { %v1923_v56 = vpop.f32.mrb[29].mxu1  ;;  %v1884_v58 = vadd.f32 %v1883_v35, %v1882_v43  ;;  %v1885_v60 = vpop.f32.mrb[30].mxu0 }
 0x13c   : > { %v1924_v59 = vadd.f32 %v1923_v56, %v1922_v55  ;;  %v1925_v62 = vpop.f32.mrb[30].mxu1  ;;  %v1886_v12 = vpop.f32.mrb[31].mxu0 }
 0x13d   : > { %v1926_v63 = vpop.f32.mrb[31].mxu1  ;;  %v1366_v54 = vadd.f32 %v1884_v58, %v2808_v1  ;;  %v1887_v53 = vadd.f32 %v1886_v12, %v1885_v60 }
 0x13e   : > { %v1927_v3 = vadd.f32 %v1926_v63, %v1925_v62 }
 0x13f   : > { %v1369_v29 = vadd.f32 %v1887_v53, %v2810_v16  ;;  %v1431_v14 = vadd.f32 %v1924_v59, %v1366_v54 }
 0x141   : > { %v1958_v13 = vpop.f32.mrb[32].mxu0  ;;  %v1434_v17 = vadd.f32 %v1927_v3, %v1369_v29 }
 0x142   : > { %v1962_v44 = vpop.f32.mrb[32].mxu1  ;;  %v1480_v22 = vadd.f32 %v1958_v13, %v1415_v21  ;;  %v1471_v1 = vpop.f32.mrb[33].mxu0 }
 0x143   : > { %v1496_v23 = vadd.f32 %v1962_v44, %v1431_v14  ;;  %v1487_v20 = vpop.f32.mrb[33].mxu1  ;;  %v1472_v16 = vadd.f32 %v1471_v1, %v2812_v26  ;;  %v1959_v34 = vpop.f32.mrb[34].mxu0 }
 0x144   : > { %v1488_v37 = vadd.f32 %v1487_v20, %v1423_v19  ;;  %v1963_v4 = vpop.f32.mrb[34].mxu1  ;;  %v1520_v2 = vadd.f32 %v1695_v6, %v1480_v22  ;;  %v1483_v38 = vadd.f32 %v1959_v34, %v1418_v42  ;;  %v1474_v18 = vpop.f32.mrb[35].mxu0 }
 0x145   : > { %v1524_v61 = vadd.f32 %v1703_v8, %v1496_v23  ;;  %v1499_v57 = vadd.f32 %v1963_v4, %v1434_v17  ;;  %v1490_v40 = vpop.f32.mrb[35].mxu1  ;;  %v1518_v21 = vadd.f32 %v1691_v0, %v1472_v16  ;;  %v1475_v11 = vadd.f32 %v1474_v18, %v2814_v33 }
 0x146   : > { %v1522_v15 = vadd.f32 %v1699_v9, %v1488_v37  ;;  %v1491_v36 = vadd.f32 %v1490_v40, %v1426_v25  ;;  %1528 = vst [vmem:[%s244_s21 + $0x10] sm:$0xff] %v1520_v2  ;;  %v1521_v46 = vadd.f32 %v1696_v31, %v1483_v38 }
 0x147   : > { %1532 = vst [vmem:[%s244_s21 + $0x30] sm:$0xff] %v1524_v61  ;;  %v1525_v26 = vadd.f32 %v1704_v7, %v1499_v57  ;;  %1526 = vst [vmem:[%s244_s21] sm:$0xff] %v1518_v21  ;;  %v1519_v47 = vadd.f32 %v1692_v24, %v1475_v11 }
 0x148   : > { %1530 = vst [vmem:[%s244_s21 + $0x20] sm:$0xff] %v1522_v15  ;;  %v1523_v27 = vadd.f32 %v1700_v49, %v1491_v36  ;;  %1529 = vst [vmem:[%s244_s21 + $0x18] sm:$0xff] %v1521_v46 }
 0x149   : > { %1533 = vst [vmem:[%s244_s21 + $0x38] sm:$0xff] %v1525_v26  ;;  %1527 = vst [vmem:[%s244_s21 + $0x8] sm:$0xff] %v1519_v47 }
 0x14a   : > { %1531 = vst [vmem:[%s244_s21 + $0x28] sm:$0xff] %v1523_v27 }
 0x14b PF: > { %s15_s18 = sadd.s32 1, %s2067_s18  }
 0x14c   : > { %p12_p4 = scmp.ge.s32.totalorder %s15_s18, 4  }
 0x14e   :  { %14 = sbr.rel (!%p12_p4) target bundleno = 1 (0x1), region = 73 }

</bundles_post_ra>
